<compile_context>
chip_gen: v7x
topology: tpu7x:2x2x1
jax: 0.10.0
libtpu: 0.0.40
codegen_flags: <defaults>
</compile_context>

<pallas_src>
import functools

import jax
import jax.numpy as jnp
from jax import lax
from jax.experimental import pallas as pl
from jax.experimental.pallas import tpu as pltpu

LANE = 128
_VMEM_LIMIT = 48 * 1024 * 1024   # > 16/32 MiB scoped defaults, < v7x 64 MiB physical


def _round_up(a, b):
    return (a + b - 1) // b * b


# ----------------------------------------------------------------------------
# Weight standardization: hoisted out of the Pallas grids (done ONCE per conv),
# f32 math, then pre-transposed to (K, Cout), zero-padded lane-dense, cast bf16.
# ----------------------------------------------------------------------------
def _standardize(w):
    w = w.astype(jnp.float32)
    m = jnp.mean(w, axis=(1, 2, 3), keepdims=True)
    v = jnp.mean(jnp.square(w - m), axis=(1, 2, 3), keepdims=True)
    return (w - m) / jnp.sqrt(v + 1e-5)


def _prep_w_1x1(w, cin_p, cout_p):
    # w: (Cout, Cin, 1, 1) OIHW -> standardized, transposed, padded (Cin_p, Cout_p) bf16
    ws = _standardize(w)
    cout, cin = ws.shape[0], ws.shape[1]
    wk = jnp.transpose(ws.reshape(cout, cin), (1, 0))
    wk = jnp.pad(wk, ((0, cin_p - cin), (0, cout_p - cout)))
    return wk.astype(jnp.bfloat16)


def _prep_w_3x3(w, cin_p, cout_p):
    # w: (Cout, Cin, 3, 3) -> (9, Cin_p, Cout_p) bf16: one matrix per tap
    ws = _standardize(w)
    cout, cin = ws.shape[0], ws.shape[1]
    wt = jnp.transpose(ws, (2, 3, 1, 0))                       # (3, 3, Cin, Cout)
    wt = jnp.pad(wt, ((0, 0), (0, 0), (0, cin_p - cin), (0, cout_p - cout)))
    return wt.reshape(9, cin_p, cout_p).astype(jnp.bfloat16)


# ----------------------------------------------------------------------------
# GroupNorm scale/shift from per-(sample, channel) sums (tiny, wrapper-side, f32).
# Padded channels (>= c_real) end up with scale = shift = 0 and stay inert.
# ----------------------------------------------------------------------------
def _gn_affine(ssum, ssq, gamma, beta, groups, count, eps, c_real):
    n, _, cp = ssum.shape
    cg = c_real // groups
    sg = ssum[:, 0, :c_real].reshape(n, groups, cg).sum(axis=2)          # (n, G)
    qg = ssq[:, 0, :c_real].reshape(n, groups, cg).sum(axis=2)           # (n, G)
    mean = sg / count
    var = jnp.maximum(qg / count - mean * mean, 0.0)
    inv = lax.rsqrt(var + eps)                                            # (n, G)
    inv_c = jnp.repeat(inv, cg, axis=1)                                   # (n, C)
    mean_c = jnp.repeat(mean, cg, axis=1)
    gamma = gamma.astype(jnp.float32).reshape(1, c_real)
    beta = beta.astype(jnp.float32).reshape(1, c_real)
    scale = inv_c * gamma
    shift = beta - mean_c * scale
    scale = jnp.pad(scale, ((0, 0), (0, cp - c_real))).reshape(n, 1, cp)
    shift = jnp.pad(shift, ((0, 0), (0, cp - c_real))).reshape(n, 1, cp)
    return scale, shift


# ----------------------------------------------------------------------------
# 1x1 StdConv = bf16 MXU matmul.  Emits (y bf16, sum, sum_sq) where the sums are
# accumulated across the HW-tile grid axis for the *consumer* GroupNorm.
# Optionally applies the *producer* GroupNorm affine + ReLU to the loaded x tile.
# ----------------------------------------------------------------------------
def _mm_kernel(x_ref, w_ref, y_ref, ssum_ref, ssq_ref, *, hw_real, tm, need_mask):
    j = pl.program_id(1)
    x = x_ref[0]                                                   # (tm, Cin) bf16
    if need_mask:
        rows = j * tm + lax.broadcasted_iota(jnp.int32, (tm, 1), 0)
        x = jnp.where(rows < hw_real, x, jnp.zeros_like(x))
    acc = jnp.dot(x, w_ref[...], preferred_element_type=jnp.float32)
    y_ref[0] = acc.astype(y_ref.dtype)

    @pl.when(j == 0)
    def _():
        ssum_ref[...] = jnp.zeros_like(ssum_ref)
        ssq_ref[...] = jnp.zeros_like(ssq_ref)

    ssum_ref[0] += jnp.sum(acc, axis=0, keepdims=True)
    ssq_ref[0] += jnp.sum(acc * acc, axis=0, keepdims=True)


def _mm_affine_kernel(x_ref, scale_ref, shift_ref, w_ref, y_ref, ssum_ref, ssq_ref,
                      *, hw_real, tm, need_mask):
    j = pl.program_id(1)
    xf = x_ref[0].astype(jnp.float32)                              # (tm, Cin)
    xf = jnp.maximum(xf * scale_ref[0] + shift_ref[0], 0.0)        # fused GN + ReLU
    if need_mask:
        rows = j * tm + lax.broadcasted_iota(jnp.int32, (tm, 1), 0)
        xf = jnp.where(rows < hw_real, xf, 0.0)
    acc = jnp.dot(xf.astype(jnp.bfloat16), w_ref[...],
                  preferred_element_type=jnp.float32)
    y_ref[0] = acc.astype(y_ref.dtype)

    @pl.when(j == 0)
    def _():
        ssum_ref[...] = jnp.zeros_like(ssum_ref)
        ssq_ref[...] = jnp.zeros_like(ssq_ref)

    ssum_ref[0] += jnp.sum(acc, axis=0, keepdims=True)
    ssq_ref[0] += jnp.sum(acc * acc, axis=0, keepdims=True)


def std_conv1x1(x3, w_kc, gn_scale=None, gn_shift=None, tm_max=1024):
    # x3: (N, HW, Cin_p) bf16; w_kc: (Cin_p, Cout_p) bf16 pre-standardized.
    n, hw, cin_p = x3.shape
    cout_p = w_kc.shape[1]
    tm = hw if hw <= tm_max else tm_max          # tm_max is a multiple of 8
    nt = (hw + tm - 1) // tm
    need_mask = (hw % tm) != 0

    x_spec = pl.BlockSpec((1, tm, cin_p), lambda i, j: (i, j, 0))
    w_spec = pl.BlockSpec((cin_p, cout_p), lambda i, j: (0, 0))
    aff_spec = pl.BlockSpec((1, 1, cin_p), lambda i, j: (i, 0, 0))
    y_spec = pl.BlockSpec((1, tm, cout_p), lambda i, j: (i, j, 0))
    st_spec = pl.BlockSpec((1, 1, cout_p), lambda i, j: (i, 0, 0))

    if gn_scale is None:
        kernel = functools.partial(_mm_kernel, hw_real=hw, tm=tm, need_mask=need_mask)
        in_specs = [x_spec, w_spec]
        args = (x3, w_kc)
    else:
        kernel = functools.partial(_mm_affine_kernel, hw_real=hw, tm=tm,
                                   need_mask=need_mask)
        in_specs = [x_spec, aff_spec, aff_spec, w_spec]
        args = (x3, gn_scale, gn_shift, w_kc)

    y, ssum, ssq = pl.pallas_call(
        kernel,
        out_shape=(jax.ShapeDtypeStruct((n, hw, cout_p), jnp.bfloat16),
                   jax.ShapeDtypeStruct((n, 1, cout_p), jnp.float32),
                   jax.ShapeDtypeStruct((n, 1, cout_p), jnp.float32)),
        grid=(n, nt),
        in_specs=in_specs,
        out_specs=[y_spec, st_spec, st_spec],
        compiler_params=pltpu.CompilerParams(
            dimension_semantics=("parallel", "arbitrary"),
            vmem_limit_bytes=_VMEM_LIMIT),
    )(*args)
    return y, ssum, ssq


# ----------------------------------------------------------------------------
# 3x3 StdConv (padding=1, stride s) without HBM im2col.  The padded input is
# phase-decomposed in the wrapper; in-kernel, per column offset dw a SINGLE ref
# window is read (covering every row offset of that phase), then cheap row slices
# of the loaded value feed the MXU.  Also emits per-(sample, channel) sums.
# ----------------------------------------------------------------------------
def _conv3x3_kernel(x_ref, w_ref, y_ref, ssum_ref, ssq_ref, *, stride, ho, wo):
    s = stride
    cin_p = x_ref.shape[-1]
    cout_p = y_ref.shape[-1]
    acc = jnp.zeros((ho * wo, cout_p), jnp.float32)
    for dw in range(3):
        pw, qw = dw % s, dw // s
        for ph in range(s):
            dhs = [dh for dh in range(3) if dh % s == ph]
            if not dhs:
                continue
            q0 = min(dh // s for dh in dhs)
            q1 = max(dh // s for dh in dhs)
            rows = ho + (q1 - q0)
            # one window read per (dw, ph): (rows, wo, Cin_p)
            xw = x_ref[ph * s + pw, q0:q0 + rows, qw:qw + wo, :]
            for dh in dhs:
                qh = dh // s
                xs = xw[qh - q0:qh - q0 + ho]                     # (ho, wo, Cin_p)
                acc = acc + jnp.dot(xs.reshape(ho * wo, cin_p), w_ref[dh * 3 + dw],
                                    preferred_element_type=jnp.float32)
    y_ref[0] = acc.astype(y_ref.dtype)
    ssum_ref[0] = jnp.sum(acc, axis=0, keepdims=True)
    ssq_ref[0] = jnp.sum(acc * acc, axis=0, keepdims=True)


def std_conv3x3(x_nhwc, w_taps, stride):
    # x_nhwc: (N, H, W, Cin_p) bf16; w_taps: (9, Cin_p, Cout_p) bf16.
    n, h, w, cin_p = x_nhwc.shape
    cout_p = w_taps.shape[-1]
    s = stride
    ho = (h - 1) // s + 1
    wo = (w - 1) // s + 1
    q = 2 // s
    hh = max(ho + q, -(-(h + 2) // s))
    wh = max(wo + q, -(-(w + 2) // s))
    xp = jnp.pad(x_nhwc, ((0, 0), (1, 1), (1, 1), (0, 0)))                 # conv pad=1
    xp = jnp.pad(xp, ((0, 0), (0, s * hh - (h + 2)), (0, s * wh - (w + 2)), (0, 0)))
    # Phase decomposition: xph[n*s*s + ph*s + pw, i, j, c] = xp[n, i*s+ph, j*s+pw, c]
    xph = (xp.reshape(n, hh, s, wh, s, cin_p)
             .transpose(0, 2, 4, 1, 3, 5)
             .reshape(n * s * s, hh, wh, cin_p))
    kernel = functools.partial(_conv3x3_kernel, stride=s, ho=ho, wo=wo)
    y, ssum, ssq = pl.pallas_call(
        kernel,
        out_shape=(jax.ShapeDtypeStruct((n, ho * wo, cout_p), jnp.bfloat16),
                   jax.ShapeDtypeStruct((n, 1, cout_p), jnp.float32),
                   jax.ShapeDtypeStruct((n, 1, cout_p), jnp.float32)),
        grid=(n,),
        in_specs=[
            pl.BlockSpec((s * s, hh, wh, cin_p), lambda i: (i, 0, 0, 0)),
            pl.BlockSpec((9, cin_p, cout_p), lambda i: (0, 0, 0)),
        ],
        out_specs=[
            pl.BlockSpec((1, ho * wo, cout_p), lambda i: (i, 0, 0)),
            pl.BlockSpec((1, 1, cout_p), lambda i: (i, 0, 0)),
            pl.BlockSpec((1, 1, cout_p), lambda i: (i, 0, 0)),
        ],
        compiler_params=pltpu.CompilerParams(
            dimension_semantics=("parallel",),
            vmem_limit_bytes=_VMEM_LIMIT),
    )(xph, w_taps)
    return y, ssum, ssq


# ----------------------------------------------------------------------------
# PreActBottleneck forward (NCHW in / NCHW out).
# ----------------------------------------------------------------------------
def preact_bottleneck(x_nchw, params, stride):
    n, cin, h, w = x_nchw.shape
    cmid = params['conv1_w'].shape[0]
    cout = params['conv3_w'].shape[0]
    cin_p = _round_up(cin, LANE)
    cmid_p = _round_up(cmid, LANE)
    cout_p = _round_up(cout, LANE)
    ho = (h - 1) // stride + 1
    wo = (w - 1) // stride + 1

    # NCHW -> NHWC (C on the 128-lane axis), pad channels lane-dense, bf16 storage.
    x4 = jnp.transpose(x_nchw, (0, 2, 3, 1)).astype(jnp.float32)
    x4 = jnp.pad(x4, ((0, 0), (0, 0), (0, 0), (0, cin_p - cin))).astype(jnp.bfloat16)
    x3 = x4.reshape(n, h * w, cin_p)

    # Hoisted, once-per-call weight standardization + transpose + lane padding (bf16).
    w1 = _prep_w_1x1(params['conv1_w'], cin_p, cmid_p)
    w2 = _prep_w_3x3(params['conv2_w'], cmid_p, cmid_p)
    w3 = _prep_w_1x1(params['conv3_w'], cmid_p, cout_p)

    # Residual branch: StdConv1x1(stride) with fused gn_proj stats.
    if 'downsample_w' in params:
        wd = _prep_w_1x1(params['downsample_w'], cin_p, cout_p)
        xs = x4[:, ::stride, ::stride, :] if stride > 1 else x4
        res, dsum, dsq = std_conv1x1(xs.reshape(n, ho * wo, cin_p), wd)
        sc_p, sh_p = _gn_affine(dsum, dsq, params['gn_proj_w'], params['gn_proj_b'],
                                cout, float(ho * wo), 1e-5, cout)
    else:
        res, sc_p, sh_p = x3, None, None      # identity: cin == cout, stride == 1

    # conv1 (1x1) + GN1 stats.
    y1, s1, q1 = std_conv1x1(x3, w1)
    sc1, sh1 = _gn_affine(s1, q1, params['gn1_w'], params['gn1_b'],
                          32, float(h * w * (cmid // 32)), 1e-6, cmid)
    # GN1 affine + ReLU applied pre-padding; XLA fuses it into conv2's pad/phase prep.
    y1a = jnp.maximum(y1.astype(jnp.float32) * sc1 + sh1, 0.0).astype(jnp.bfloat16)
    y1a = y1a.reshape(n, h, w, cmid_p)

    # conv2 (3x3, stride) + GN2 stats.
    y2, s2, q2 = std_conv3x3(y1a, w2, stride)
    sc2, sh2 = _gn_affine(s2, q2, params['gn2_w'], params['gn2_b'],
                          32, float(ho * wo * (cmid // 32)), 1e-6, cmid)

    # conv3 (1x1) with GN2 affine + ReLU fused on its input, + GN3 stats.
    y3, s3, q3 = std_conv1x1(y2, w3, gn_scale=sc2, gn_shift=sh2)
    sc3, sh3 = _gn_affine(s3, q3, params['gn3_w'], params['gn3_b'],
                          32, float(ho * wo * (cout // 32)), 1e-6, cout)

    # Final: GN3 affine (+ gn_proj affine on the residual) + add + ReLU, fused by XLA
    # with the channel un-padding and the NHWC->NCHW transpose (single memory pass).
    y3f = y3.astype(jnp.float32) * sc3 + sh3
    resf = res.astype(jnp.float32)
    if sc_p is not None:
        resf = resf * sc_p + sh_p
    out = jnp.maximum(y3f + resf, 0.0)
    out = out[:, :, :cout].reshape(n, ho, wo, cout)
    return jnp.transpose(out, (0, 3, 1, 2))


# ----------------------------------------------------------------------------
# Pure-JAX f32 reference (for correctness check)
# ----------------------------------------------------------------------------
def _ref_std_conv(x, w, stride, padding):
    m = jnp.mean(w, axis=(1, 2, 3), keepdims=True)
    v = jnp.mean(jnp.square(w - m), axis=(1, 2, 3), keepdims=True)
    ws = (w - m) / jnp.sqrt(v + 1e-5)
    return lax.conv_general_dilated(
        x, ws, (stride, stride), [(padding, padding)] * 2,
        dimension_numbers=('NCHW', 'OIHW', 'NCHW'),
        precision=lax.Precision.HIGHEST)


def _ref_gn(x, gamma, beta, g, eps):
    n, c, h, w = x.shape
    xr = x.reshape(n, g, (c // g) * h * w)
    m = jnp.mean(xr, axis=2, keepdims=True)
    v = jnp.mean(jnp.square(xr - m), axis=2, keepdims=True)
    y = ((xr - m) / jnp.sqrt(v + eps)).reshape(n, c, h, w)
    return y * gamma.reshape(1, c, 1, 1) + beta.reshape(1, c, 1, 1)


def _ref_forward(x, params, stride):
    if 'downsample_w' in params:
        residual = _ref_std_conv(x, params['downsample_w'], stride, 0)
        residual = _ref_gn(residual, params['gn_proj_w'], params['gn_proj_b'],
                           residual.shape[1], 1e-5)
    else:
        residual = x
    y = jax.nn.relu(_ref_gn(_ref_std_conv(x, params['conv1_w'], 1, 0),
                            params['gn1_w'], params['gn1_b'], 32, 1e-6))
    y = jax.nn.relu(_ref_gn(_ref_std_conv(y, params['conv2_w'], stride, 1),
                            params['gn2_w'], params['gn2_b'], 32, 1e-6))
    y = _ref_gn(_ref_std_conv(y, params['conv3_w'], 1, 0),
                params['gn3_w'], params['gn3_b'], 32, 1e-6)
    return jax.nn.relu(residual + y)


def _make_params(key, cin, cout, cmid, with_downsample):
    ks = jax.random.split(key, 12)
    p = {
        'conv1_w': 0.1 * jax.random.normal(ks[0], (cmid, cin, 1, 1), jnp.float32),
        'conv2_w': 0.1 * jax.random.normal(ks[1], (cmid, cmid, 3, 3), jnp.float32),
        'conv3_w': 0.1 * jax.random.normal(ks[2], (cout, cmid, 1, 1), jnp.float32),
        'gn1_w': 1.0 + 0.1 * jax.random.normal(ks[4], (cmid,), jnp.float32),
        'gn1_b': 0.1 * jax.random.normal(ks[5], (cmid,), jnp.float32),
        'gn2_w': 1.0 + 0.1 * jax.random.normal(ks[6], (cmid,), jnp.float32),
        'gn2_b': 0.1 * jax.random.normal(ks[7], (cmid,), jnp.float32),
        'gn3_w': 1.0 + 0.1 * jax.random.normal(ks[8], (cout,), jnp.float32),
        'gn3_b': 0.1 * jax.random.normal(ks[9], (cout,), jnp.float32),
    }
    if with_downsample:
        p['downsample_w'] = 0.1 * jax.random.normal(ks[3], (cout, cin, 1, 1), jnp.float32)
        p['gn_proj_w'] = 1.0 + 0.1 * jax.random.normal(ks[10], (cout,), jnp.float32)
        p['gn_proj_b'] = 0.1 * jax.random.normal(ks[11], (cout,), jnp.float32)
    return p


if __name__ == "__main__":
    def run_case(case_key, cin, cout, cmid, stride, n, h, w):
        params = _make_params(case_key, cin, cout, cmid,
                              with_downsample=(stride != 1 or cin != cout))
        x = jax.random.normal(jax.random.fold_in(case_key, 99), (n, cin, h, w), jnp.float32)
        fn = jax.jit(lambda xx: preact_bottleneck(xx, params, stride))
        out = jax.block_until_ready(fn(x))
        ref = jax.block_until_ready(_ref_forward(x, params, stride))
        assert out.shape == ref.shape, (out.shape, ref.shape)
        err_max = float(jnp.max(jnp.abs(out - ref)))
        err_mean = float(jnp.mean(jnp.abs(out - ref)))
        # bf16 activation / MXU path: loosened vs the old f32-only 1e-3 check.
        assert err_max < 0.15 and err_mean < 0.02, \
            f"mismatch vs reference: max={err_max}, mean={err_mean}"

    key = jax.random.PRNGKey(0)
    # Projection-shortcut case: stride 2, cin != cout (downsample + gn_proj path).
    run_case(jax.random.fold_in(key, 0), cin=64, cout=128, cmid=32, stride=2, n=2, h=16, w=16)
    # Identity-shortcut case: stride 1, cin == cout.
    run_case(jax.random.fold_in(key, 1), cin=64, cout=64, cmid=32, stride=1, n=2, h=8, w=8)

    print("KERNEL_OK")
</pallas_src>

<mosaic_0001>
module attributes {stable_mosaic.version = 11 : i64} {
  func.func @_mm_kernel(%arg0: i32, %arg1: i32, %arg2: memref<1x64x128xbf16, #tpu.memory_space<vmem>>, %arg3: memref<128x128xbf16, #tpu.memory_space<vmem>>, %arg4: memref<1x64x128xbf16, #tpu.memory_space<vmem>>, %arg5: memref<1x1x128xf32, #tpu.memory_space<vmem>>, %arg6: memref<1x1x128xf32, #tpu.memory_space<vmem>>) attributes {dimension_semantics = [#tpu.dimension_semantics<parallel>, #tpu.dimension_semantics<arbitrary>], iteration_bounds = array<i64: 2, 1>, scalar_prefetch = 0 : i64, scratch_operands = 0 : i64, tpu.core_type = #tpu.core_type<tc>, window_params = [{transform_indices = @transform_0, window_bounds = array<i64: 1, 64, 128>}, {pipeline_mode = #tpu.pipeline_mode<synchronous>, transform_indices = @transform_1, window_bounds = array<i64: 128, 128>}, {transform_indices = @transform_2, window_bounds = array<i64: 1, 64, 128>}, {transform_indices = @transform_3, window_bounds = array<i64: 1, 1, 128>}, {transform_indices = @transform_4, window_bounds = array<i64: 1, 1, 128>}]} {
    %c0 = arith.constant 0 : index
    %c0_0 = arith.constant 0 : index
    %c0_1 = arith.constant 0 : index
    %0 = vector.load %arg2[%c0, %c0_0, %c0_1] : memref<1x64x128xbf16, #tpu.memory_space<vmem>>, vector<1x64x128xbf16>
    %1 = vector.shape_cast %0 : vector<1x64x128xbf16> to vector<64x128xbf16>
    %c0_2 = arith.constant 0 : index
    %c0_3 = arith.constant 0 : index
    %2 = vector.load %arg3[%c0_2, %c0_3] : memref<128x128xbf16, #tpu.memory_space<vmem>>, vector<128x128xbf16>
    %cst = arith.constant dense<0.000000e+00> : vector<64x128xf32>
    %3 = tpu.matmul %1, %2, %cst {dimension_numbers = #tpu.dot_dimension_numbers<[1], [0], [0], [1], [0, 0, 1, 1], [], []>} : vector<64x128xbf16>, vector<128x128xbf16>, vector<64x128xf32> -> vector<64x128xf32>
    %4 = arith.truncf %3 : vector<64x128xf32> to vector<64x128xbf16>
    %c0_4 = arith.constant 0 : index
    %c0_5 = arith.constant 0 : index
    %c0_6 = arith.constant 0 : index
    %5 = vector.load %arg4[%c0_4, %c0_5, %c0_6] : memref<1x64x128xbf16, #tpu.memory_space<vmem>>, vector<1x64x128xbf16>
    %6 = vector.shape_cast %5 : vector<1x64x128xbf16> to vector<64x128xbf16>
    %7 = vector.shape_cast %4 : vector<64x128xbf16> to vector<1x64x128xbf16>
    tpu.vector_store %arg4[%c0_4, %c0_5, %c0_6], %7 {strides = array<i32>} : memref<1x64x128xbf16, #tpu.memory_space<vmem>>, vector<1x64x128xbf16>,
    %c0_i32 = arith.constant 0 : i32
    %8 = arith.cmpi eq, %arg1, %c0_i32 : i32
    %9 = arith.extui %8 : i1 to i32
    %c0_i32_7 = arith.constant 0 : i32
    %10 = arith.cmpi ne, %9, %c0_i32_7 : i32
    scf.if %10 {
      %cst_22 = arith.constant 0.000000e+00 : f32
      %28 = vector.broadcast %cst_22 : f32 to vector<1x1x128xf32>
      %c0_23 = arith.constant 0 : index
      %c0_24 = arith.constant 0 : index
      %c0_25 = arith.constant 0 : index
      %29 = vector.load %arg5[%c0_23, %c0_24, %c0_25] : memref<1x1x128xf32, #tpu.memory_space<vmem>>, vector<1x1x128xf32>
      tpu.vector_store %arg5[%c0_23, %c0_24, %c0_25], %28 {strides = array<i32>} : memref<1x1x128xf32, #tpu.memory_space<vmem>>, vector<1x1x128xf32>,
      %cst_26 = arith.constant 0.000000e+00 : f32
      %30 = vector.broadcast %cst_26 : f32 to vector<1x1x128xf32>
      %c0_27 = arith.constant 0 : index
      %c0_28 = arith.constant 0 : index
      %c0_29 = arith.constant 0 : index
      %31 = vector.load %arg6[%c0_27, %c0_28, %c0_29] : memref<1x1x128xf32, #tpu.memory_space<vmem>>, vector<1x1x128xf32>
      tpu.vector_store %arg6[%c0_27, %c0_28, %c0_29], %30 {strides = array<i32>} : memref<1x1x128xf32, #tpu.memory_space<vmem>>, vector<1x1x128xf32>,
    } else {
    }
    %c0_8 = arith.constant 0 : index
    %c0_9 = arith.constant 0 : index
    %c0_10 = arith.constant 0 : index
    %11 = vector.load %arg5[%c0_8, %c0_9, %c0_10] : memref<1x1x128xf32, #tpu.memory_space<vmem>>, vector<1x1x128xf32>
    %12 = vector.shape_cast %11 : vector<1x1x128xf32> to vector<1x128xf32>
    %cst_11 = arith.constant dense<0.000000e+00> : vector<128xf32>
    %13 = vector.multi_reduction <add>, %3, %cst_11 [0] : vector<64x128xf32> to vector<128xf32>
    %14 = vector.shape_cast %13 : vector<128xf32> to vector<1x128xf32>
    %15 = arith.addf %12, %14 : vector<1x128xf32>
    %c0_12 = arith.constant 0 : index
    %c0_13 = arith.constant 0 : index
    %c0_14 = arith.constant 0 : index
    %16 = vector.load %arg5[%c0_12, %c0_13, %c0_14] : memref<1x1x128xf32, #tpu.memory_space<vmem>>, vector<1x1x128xf32>
    %17 = vector.shape_cast %16 : vector<1x1x128xf32> to vector<1x128xf32>
    %18 = vector.shape_cast %15 : vector<1x128xf32> to vector<1x1x128xf32>
    tpu.vector_store %arg5[%c0_12, %c0_13, %c0_14], %18 {strides = array<i32>} : memref<1x1x128xf32, #tpu.memory_space<vmem>>, vector<1x1x128xf32>,
    %c0_15 = arith.constant 0 : index
    %c0_16 = arith.constant 0 : index
    %c0_17 = arith.constant 0 : index
    %19 = vector.load %arg6[%c0_15, %c0_16, %c0_17] : memref<1x1x128xf32, #tpu.memory_space<vmem>>, vector<1x1x128xf32>
    %20 = vector.shape_cast %19 : vector<1x1x128xf32> to vector<1x128xf32>
    %21 = arith.mulf %3, %3 : vector<64x128xf32>
    %cst_18 = arith.constant dense<0.000000e+00> : vector<128xf32>
    %22 = vector.multi_reduction <add>, %21, %cst_18 [0] : vector<64x128xf32> to vector<128xf32>
    %23 = vector.shape_cast %22 : vector<128xf32> to vector<1x128xf32>
    %24 = arith.addf %20, %23 : vector<1x128xf32>
    %c0_19 = arith.constant 0 : index
    %c0_20 = arith.constant 0 : index
    %c0_21 = arith.constant 0 : index
    %25 = vector.load %arg6[%c0_19, %c0_20, %c0_21] : memref<1x1x128xf32, #tpu.memory_space<vmem>>, vector<1x1x128xf32>
    %26 = vector.shape_cast %25 : vector<1x1x128xf32> to vector<1x128xf32>
    %27 = vector.shape_cast %24 : vector<1x128xf32> to vector<1x1x128xf32>
    tpu.vector_store %arg6[%c0_19, %c0_20, %c0_21], %27 {strides = array<i32>} : memref<1x1x128xf32, #tpu.memory_space<vmem>>, vector<1x1x128xf32>,
    return
  }
  func.func @transform_0(%arg0: i32, %arg1: i32) -> (i32, i32, i32) {
    %c0_i32 = arith.constant 0 : i32
    %c0_i32_0 = arith.constant 0 : i32
    return %arg0, %arg1, %c0_i32 : i32, i32, i32
  }
  func.func @transform_1(%arg0: i32, %arg1: i32) -> (i32, i32) {
    %c0_i32 = arith.constant 0 : i32
    %c0_i32_0 = arith.constant 0 : i32
    %c0_i32_1 = arith.constant 0 : i32
    return %c0_i32, %c0_i32_0 : i32, i32
  }
  func.func @transform_2(%arg0: i32, %arg1: i32) -> (i32, i32, i32) {
    %c0_i32 = arith.constant 0 : i32
    %c0_i32_0 = arith.constant 0 : i32
    return %arg0, %arg1, %c0_i32 : i32, i32, i32
  }
  func.func @transform_3(%arg0: i32, %arg1: i32) -> (i32, i32, i32) {
    %c0_i32 = arith.constant 0 : i32
    %c0_i32_0 = arith.constant 0 : i32
    %c0_i32_1 = arith.constant 0 : i32
    return %arg0, %c0_i32, %c0_i32_0 : i32, i32, i32
  }
  func.func @transform_4(%arg0: i32, %arg1: i32) -> (i32, i32, i32) {
    %c0_i32 = arith.constant 0 : i32
    %c0_i32_0 = arith.constant 0 : i32
    %c0_i32_1 = arith.constant 0 : i32
    return %arg0, %c0_i32, %c0_i32_0 : i32, i32, i32
  }
}

module attributes {stable_mosaic.version = 11 : i64} {
  func.func @_mm_kernel(%arg0: i32, %arg1: i32, %arg2: memref<1x256x128xbf16, #tpu.memory_space<vmem>>, %arg3: memref<128x128xbf16, #tpu.memory_space<vmem>>, %arg4: memref<1x256x128xbf16, #tpu.memory_space<vmem>>, %arg5: memref<1x1x128xf32, #tpu.memory_space<vmem>>, %arg6: memref<1x1x128xf32, #tpu.memory_space<vmem>>) attributes {dimension_semantics = [#tpu.dimension_semantics<parallel>, #tpu.dimension_semantics<arbitrary>], iteration_bounds = array<i64: 2, 1>, scalar_prefetch = 0 : i64, scratch_operands = 0 : i64, tpu.core_type = #tpu.core_type<tc>, window_params = [{transform_indices = @transform_0, window_bounds = array<i64: 1, 256, 128>}, {pipeline_mode = #tpu.pipeline_mode<synchronous>, transform_indices = @transform_1, window_bounds = array<i64: 128, 128>}, {transform_indices = @transform_2, window_bounds = array<i64: 1, 256, 128>}, {transform_indices = @transform_3, window_bounds = array<i64: 1, 1, 128>}, {transform_indices = @transform_4, window_bounds = array<i64: 1, 1, 128>}]} {
    %c0 = arith.constant 0 : index
    %c0_0 = arith.constant 0 : index
    %c0_1 = arith.constant 0 : index
    %0 = vector.load %arg2[%c0, %c0_0, %c0_1] : memref<1x256x128xbf16, #tpu.memory_space<vmem>>, vector<1x256x128xbf16>
    %1 = vector.shape_cast %0 : vector<1x256x128xbf16> to vector<256x128xbf16>
    %c0_2 = arith.constant 0 : index
    %c0_3 = arith.constant 0 : index
    %2 = vector.load %arg3[%c0_2, %c0_3] : memref<128x128xbf16, #tpu.memory_space<vmem>>, vector<128x128xbf16>
    %cst = arith.constant dense<0.000000e+00> : vector<256x128xf32>
    %3 = tpu.matmul %1, %2, %cst {dimension_numbers = #tpu.dot_dimension_numbers<[1], [0], [0], [1], [0, 0, 1, 1], [], []>} : vector<256x128xbf16>, vector<128x128xbf16>, vector<256x128xf32> -> vector<256x128xf32>
    %4 = arith.truncf %3 : vector<256x128xf32> to vector<256x128xbf16>
    %c0_4 = arith.constant 0 : index
    %c0_5 = arith.constant 0 : index
    %c0_6 = arith.constant 0 : index
    %5 = vector.load %arg4[%c0_4, %c0_5, %c0_6] : memref<1x256x128xbf16, #tpu.memory_space<vmem>>, vector<1x256x128xbf16>
    %6 = vector.shape_cast %5 : vector<1x256x128xbf16> to vector<256x128xbf16>
    %7 = vector.shape_cast %4 : vector<256x128xbf16> to vector<1x256x128xbf16>
    tpu.vector_store %arg4[%c0_4, %c0_5, %c0_6], %7 {strides = array<i32>} : memref<1x256x128xbf16, #tpu.memory_space<vmem>>, vector<1x256x128xbf16>,
    %c0_i32 = arith.constant 0 : i32
    %8 = arith.cmpi eq, %arg1, %c0_i32 : i32
    %9 = arith.extui %8 : i1 to i32
    %c0_i32_7 = arith.constant 0 : i32
    %10 = arith.cmpi ne, %9, %c0_i32_7 : i32
    scf.if %10 {
      %cst_22 = arith.constant 0.000000e+00 : f32
      %28 = vector.broadcast %cst_22 : f32 to vector<1x1x128xf32>
      %c0_23 = arith.constant 0 : index
      %c0_24 = arith.constant 0 : index
      %c0_25 = arith.constant 0 : index
      %29 = vector.load %arg5[%c0_23, %c0_24, %c0_25] : memref<1x1x128xf32, #tpu.memory_space<vmem>>, vector<1x1x128xf32>
      tpu.vector_store %arg5[%c0_23, %c0_24, %c0_25], %28 {strides = array<i32>} : memref<1x1x128xf32, #tpu.memory_space<vmem>>, vector<1x1x128xf32>,
      %cst_26 = arith.constant 0.000000e+00 : f32
      %30 = vector.broadcast %cst_26 : f32 to vector<1x1x128xf32>
      %c0_27 = arith.constant 0 : index
      %c0_28 = arith.constant 0 : index
      %c0_29 = arith.constant 0 : index
      %31 = vector.load %arg6[%c0_27, %c0_28, %c0_29] : memref<1x1x128xf32, #tpu.memory_space<vmem>>, vector<1x1x128xf32>
      tpu.vector_store %arg6[%c0_27, %c0_28, %c0_29], %30 {strides = array<i32>} : memref<1x1x128xf32, #tpu.memory_space<vmem>>, vector<1x1x128xf32>,
    } else {
    }
    %c0_8 = arith.constant 0 : index
    %c0_9 = arith.constant 0 : index
    %c0_10 = arith.constant 0 : index
    %11 = vector.load %arg5[%c0_8, %c0_9, %c0_10] : memref<1x1x128xf32, #tpu.memory_space<vmem>>, vector<1x1x128xf32>
    %12 = vector.shape_cast %11 : vector<1x1x128xf32> to vector<1x128xf32>
    %cst_11 = arith.constant dense<0.000000e+00> : vector<128xf32>
    %13 = vector.multi_reduction <add>, %3, %cst_11 [0] : vector<256x128xf32> to vector<128xf32>
    %14 = vector.shape_cast %13 : vector<128xf32> to vector<1x128xf32>
    %15 = arith.addf %12, %14 : vector<1x128xf32>
    %c0_12 = arith.constant 0 : index
    %c0_13 = arith.constant 0 : index
    %c0_14 = arith.constant 0 : index
    %16 = vector.load %arg5[%c0_12, %c0_13, %c0_14] : memref<1x1x128xf32, #tpu.memory_space<vmem>>, vector<1x1x128xf32>
    %17 = vector.shape_cast %16 : vector<1x1x128xf32> to vector<1x128xf32>
    %18 = vector.shape_cast %15 : vector<1x128xf32> to vector<1x1x128xf32>
    tpu.vector_store %arg5[%c0_12, %c0_13, %c0_14], %18 {strides = array<i32>} : memref<1x1x128xf32, #tpu.memory_space<vmem>>, vector<1x1x128xf32>,
    %c0_15 = arith.constant 0 : index
    %c0_16 = arith.constant 0 : index
    %c0_17 = arith.constant 0 : index
    %19 = vector.load %arg6[%c0_15, %c0_16, %c0_17] : memref<1x1x128xf32, #tpu.memory_space<vmem>>, vector<1x1x128xf32>
    %20 = vector.shape_cast %19 : vector<1x1x128xf32> to vector<1x128xf32>
    %21 = arith.mulf %3, %3 : vector<256x128xf32>
    %cst_18 = arith.constant dense<0.000000e+00> : vector<128xf32>
    %22 = vector.multi_reduction <add>, %21, %cst_18 [0] : vector<256x128xf32> to vector<128xf32>
    %23 = vector.shape_cast %22 : vector<128xf32> to vector<1x128xf32>
    %24 = arith.addf %20, %23 : vector<1x128xf32>
    %c0_19 = arith.constant 0 : index
    %c0_20 = arith.constant 0 : index
    %c0_21 = arith.constant 0 : index
    %25 = vector.load %arg6[%c0_19, %c0_20, %c0_21] : memref<1x1x128xf32, #tpu.memory_space<vmem>>, vector<1x1x128xf32>
    %26 = vector.shape_cast %25 : vector<1x1x128xf32> to vector<1x128xf32>
    %27 = vector.shape_cast %24 : vector<1x128xf32> to vector<1x1x128xf32>
    tpu.vector_store %arg6[%c0_19, %c0_20, %c0_21], %27 {strides = array<i32>} : memref<1x1x128xf32, #tpu.memory_space<vmem>>, vector<1x1x128xf32>,
    return
  }
  func.func @transform_0(%arg0: i32, %arg1: i32) -> (i32, i32, i32) {
    %c0_i32 = arith.constant 0 : i32
    %c0_i32_0 = arith.constant 0 : i32
    return %arg0, %arg1, %c0_i32 : i32, i32, i32
  }
  func.func @transform_1(%arg0: i32, %arg1: i32) -> (i32, i32) {
    %c0_i32 = arith.constant 0 : i32
    %c0_i32_0 = arith.constant 0 : i32
    %c0_i32_1 = arith.constant 0 : i32
    return %c0_i32, %c0_i32_0 : i32, i32
  }
  func.func @transform_2(%arg0: i32, %arg1: i32) -> (i32, i32, i32) {
    %c0_i32 = arith.constant 0 : i32
    %c0_i32_0 = arith.constant 0 : i32
    return %arg0, %arg1, %c0_i32 : i32, i32, i32
  }
  func.func @transform_3(%arg0: i32, %arg1: i32) -> (i32, i32, i32) {
    %c0_i32 = arith.constant 0 : i32
    %c0_i32_0 = arith.constant 0 : i32
    %c0_i32_1 = arith.constant 0 : i32
    return %arg0, %c0_i32, %c0_i32_0 : i32, i32, i32
  }
  func.func @transform_4(%arg0: i32, %arg1: i32) -> (i32, i32, i32) {
    %c0_i32 = arith.constant 0 : i32
    %c0_i32_0 = arith.constant 0 : i32
    %c0_i32_1 = arith.constant 0 : i32
    return %arg0, %c0_i32, %c0_i32_0 : i32, i32, i32
  }
}

module attributes {stable_mosaic.version = 11 : i64} {
  func.func @_mm_affine_kernel(%arg0: i32, %arg1: i32, %arg2: memref<1x64x128xbf16, #tpu.memory_space<vmem>>, %arg3: memref<1x1x128xf32, #tpu.memory_space<vmem>>, %arg4: memref<1x1x128xf32, #tpu.memory_space<vmem>>, %arg5: memref<128x128xbf16, #tpu.memory_space<vmem>>, %arg6: memref<1x64x128xbf16, #tpu.memory_space<vmem>>, %arg7: memref<1x1x128xf32, #tpu.memory_space<vmem>>, %arg8: memref<1x1x128xf32, #tpu.memory_space<vmem>>) attributes {dimension_semantics = [#tpu.dimension_semantics<parallel>, #tpu.dimension_semantics<arbitrary>], iteration_bounds = array<i64: 2, 1>, scalar_prefetch = 0 : i64, scratch_operands = 0 : i64, tpu.core_type = #tpu.core_type<tc>, window_params = [{transform_indices = @transform_0, window_bounds = array<i64: 1, 64, 128>}, {transform_indices = @transform_1, window_bounds = array<i64: 1, 1, 128>}, {transform_indices = @transform_2, window_bounds = array<i64: 1, 1, 128>}, {pipeline_mode = #tpu.pipeline_mode<synchronous>, transform_indices = @transform_3, window_bounds = array<i64: 128, 128>}, {transform_indices = @transform_4, window_bounds = array<i64: 1, 64, 128>}, {transform_indices = @transform_5, window_bounds = array<i64: 1, 1, 128>}, {transform_indices = @transform_6, window_bounds = array<i64: 1, 1, 128>}]} {
    %c0 = arith.constant 0 : index
    %c0_0 = arith.constant 0 : index
    %c0_1 = arith.constant 0 : index
    %0 = vector.load %arg2[%c0, %c0_0, %c0_1] : memref<1x64x128xbf16, #tpu.memory_space<vmem>>, vector<1x64x128xbf16>
    %1 = vector.shape_cast %0 : vector<1x64x128xbf16> to vector<64x128xbf16>
    %2 = arith.extf %1 : vector<64x128xbf16> to vector<64x128xf32>
    %c0_2 = arith.constant 0 : index
    %c0_3 = arith.constant 0 : index
    %c0_4 = arith.constant 0 : index
    %3 = vector.load %arg3[%c0_2, %c0_3, %c0_4] : memref<1x1x128xf32, #tpu.memory_space<vmem>>, vector<1x1x128xf32>
    %4 = vector.shape_cast %3 : vector<1x1x128xf32> to vector<1x128xf32>
    %5 = vector.broadcast %4 : vector<1x128xf32> to vector<64x128xf32>
    %6 = arith.mulf %2, %5 : vector<64x128xf32>
    %c0_5 = arith.constant 0 : index
    %c0_6 = arith.constant 0 : index
    %c0_7 = arith.constant 0 : index
    %7 = vector.load %arg4[%c0_5, %c0_6, %c0_7] : memref<1x1x128xf32, #tpu.memory_space<vmem>>, vector<1x1x128xf32>
    %8 = vector.shape_cast %7 : vector<1x1x128xf32> to vector<1x128xf32>
    %9 = vector.broadcast %8 : vector<1x128xf32> to vector<64x128xf32>
    %10 = arith.addf %6, %9 : vector<64x128xf32>
    %cst = arith.constant 0.000000e+00 : f32
    %11 = vector.broadcast %cst : f32 to vector<64x128xf32>
    %12 = arith.maximumf %10, %11 : vector<64x128xf32>
    %13 = arith.truncf %12 : vector<64x128xf32> to vector<64x128xbf16>
    %c0_8 = arith.constant 0 : index
    %c0_9 = arith.constant 0 : index
    %14 = vector.load %arg5[%c0_8, %c0_9] : memref<128x128xbf16, #tpu.memory_space<vmem>>, vector<128x128xbf16>
    %cst_10 = arith.constant dense<0.000000e+00> : vector<64x128xf32>
    %15 = tpu.matmul %13, %14, %cst_10 {dimension_numbers = #tpu.dot_dimension_numbers<[1], [0], [0], [1], [0, 0, 1, 1], [], []>} : vector<64x128xbf16>, vector<128x128xbf16>, vector<64x128xf32> -> vector<64x128xf32>
    %16 = arith.truncf %15 : vector<64x128xf32> to vector<64x128xbf16>
    %c0_11 = arith.constant 0 : index
    %c0_12 = arith.constant 0 : index
    %c0_13 = arith.constant 0 : index
    %17 = vector.load %arg6[%c0_11, %c0_12, %c0_13] : memref<1x64x128xbf16, #tpu.memory_space<vmem>>, vector<1x64x128xbf16>
    %18 = vector.shape_cast %17 : vector<1x64x128xbf16> to vector<64x128xbf16>
    %19 = vector.shape_cast %16 : vector<64x128xbf16> to vector<1x64x128xbf16>
    tpu.vector_store %arg6[%c0_11, %c0_12, %c0_13], %19 {strides = array<i32>} : memref<1x64x128xbf16, #tpu.memory_space<vmem>>, vector<1x64x128xbf16>,
    %c0_i32 = arith.constant 0 : i32
    %20 = arith.cmpi eq, %arg1, %c0_i32 : i32
    %21 = arith.extui %20 : i1 to i32
    %c0_i32_14 = arith.constant 0 : i32
    %22 = arith.cmpi ne, %21, %c0_i32_14 : i32
    scf.if %22 {
      %cst_29 = arith.constant 0.000000e+00 : f32
      %40 = vector.broadcast %cst_29 : f32 to vector<1x1x128xf32>
      %c0_30 = arith.constant 0 : index
      %c0_31 = arith.constant 0 : index
      %c0_32 = arith.constant 0 : index
      %41 = vector.load %arg7[%c0_30, %c0_31, %c0_32] : memref<1x1x128xf32, #tpu.memory_space<vmem>>, vector<1x1x128xf32>
      tpu.vector_store %arg7[%c0_30, %c0_31, %c0_32], %40 {strides = array<i32>} : memref<1x1x128xf32, #tpu.memory_space<vmem>>, vector<1x1x128xf32>,
      %cst_33 = arith.constant 0.000000e+00 : f32
      %42 = vector.broadcast %cst_33 : f32 to vector<1x1x128xf32>
      %c0_34 = arith.constant 0 : index
      %c0_35 = arith.constant 0 : index
      %c0_36 = arith.constant 0 : index
      %43 = vector.load %arg8[%c0_34, %c0_35, %c0_36] : memref<1x1x128xf32, #tpu.memory_space<vmem>>, vector<1x1x128xf32>
      tpu.vector_store %arg8[%c0_34, %c0_35, %c0_36], %42 {strides = array<i32>} : memref<1x1x128xf32, #tpu.memory_space<vmem>>, vector<1x1x128xf32>,
    } else {
    }
    %c0_15 = arith.constant 0 : index
    %c0_16 = arith.constant 0 : index
    %c0_17 = arith.constant 0 : index
    %23 = vector.load %arg7[%c0_15, %c0_16, %c0_17] : memref<1x1x128xf32, #tpu.memory_space<vmem>>, vector<1x1x128xf32>
    %24 = vector.shape_cast %23 : vector<1x1x128xf32> to vector<1x128xf32>
    %cst_18 = arith.constant dense<0.000000e+00> : vector<128xf32>
    %25 = vector.multi_reduction <add>, %15, %cst_18 [0] : vector<64x128xf32> to vector<128xf32>
    %26 = vector.shape_cast %25 : vector<128xf32> to vector<1x128xf32>
    %27 = arith.addf %24, %26 : vector<1x128xf32>
    %c0_19 = arith.constant 0 : index
    %c0_20 = arith.constant 0 : index
    %c0_21 = arith.constant 0 : index
    %28 = vector.load %arg7[%c0_19, %c0_20, %c0_21] : memref<1x1x128xf32, #tpu.memory_space<vmem>>, vector<1x1x128xf32>
    %29 = vector.shape_cast %28 : vector<1x1x128xf32> to vector<1x128xf32>
    %30 = vector.shape_cast %27 : vector<1x128xf32> to vector<1x1x128xf32>
    tpu.vector_store %arg7[%c0_19, %c0_20, %c0_21], %30 {strides = array<i32>} : memref<1x1x128xf32, #tpu.memory_space<vmem>>, vector<1x1x128xf32>,
    %c0_22 = arith.constant 0 : index
    %c0_23 = arith.constant 0 : index
    %c0_24 = arith.constant 0 : index
    %31 = vector.load %arg8[%c0_22, %c0_23, %c0_24] : memref<1x1x128xf32, #tpu.memory_space<vmem>>, vector<1x1x128xf32>
    %32 = vector.shape_cast %31 : vector<1x1x128xf32> to vector<1x128xf32>
    %33 = arith.mulf %15, %15 : vector<64x128xf32>
    %cst_25 = arith.constant dense<0.000000e+00> : vector<128xf32>
    %34 = vector.multi_reduction <add>, %33, %cst_25 [0] : vector<64x128xf32> to vector<128xf32>
    %35 = vector.shape_cast %34 : vector<128xf32> to vector<1x128xf32>
    %36 = arith.addf %32, %35 : vector<1x128xf32>
    %c0_26 = arith.constant 0 : index
    %c0_27 = arith.constant 0 : index
    %c0_28 = arith.constant 0 : index
    %37 = vector.load %arg8[%c0_26, %c0_27, %c0_28] : memref<1x1x128xf32, #tpu.memory_space<vmem>>, vector<1x1x128xf32>
    %38 = vector.shape_cast %37 : vector<1x1x128xf32> to vector<1x128xf32>
    %39 = vector.shape_cast %36 : vector<1x128xf32> to vector<1x1x128xf32>
    tpu.vector_store %arg8[%c0_26, %c0_27, %c0_28], %39 {strides = array<i32>} : memref<1x1x128xf32, #tpu.memory_space<vmem>>, vector<1x1x128xf32>,
    return
  }
  func.func @transform_0(%arg0: i32, %arg1: i32) -> (i32, i32, i32) {
    %c0_i32 = arith.constant 0 : i32
    %c0_i32_0 = arith.constant 0 : i32
    return %arg0, %arg1, %c0_i32 : i32, i32, i32
  }
  func.func @transform_1(%arg0: i32, %arg1: i32) -> (i32, i32, i32) {
    %c0_i32 = arith.constant 0 : i32
    %c0_i32_0 = arith.constant 0 : i32
    %c0_i32_1 = arith.constant 0 : i32
    return %arg0, %c0_i32, %c0_i32_0 : i32, i32, i32
  }
  func.func @transform_2(%arg0: i32, %arg1: i32) -> (i32, i32, i32) {
    %c0_i32 = arith.constant 0 : i32
    %c0_i32_0 = arith.constant 0 : i32
    %c0_i32_1 = arith.constant 0 : i32
    return %arg0, %c0_i32, %c0_i32_0 : i32, i32, i32
  }
  func.func @transform_3(%arg0: i32, %arg1: i32) -> (i32, i32) {
    %c0_i32 = arith.constant 0 : i32
    %c0_i32_0 = arith.constant 0 : i32
    %c0_i32_1 = arith.constant 0 : i32
    return %c0_i32, %c0_i32_0 : i32, i32
  }
  func.func @transform_4(%arg0: i32, %arg1: i32) -> (i32, i32, i32) {
    %c0_i32 = arith.constant 0 : i32
    %c0_i32_0 = arith.constant 0 : i32
    return %arg0, %arg1, %c0_i32 : i32, i32, i32
  }
  func.func @transform_5(%arg0: i32, %arg1: i32) -> (i32, i32, i32) {
    %c0_i32 = arith.constant 0 : i32
    %c0_i32_0 = arith.constant 0 : i32
    %c0_i32_1 = arith.constant 0 : i32
    return %arg0, %c0_i32, %c0_i32_0 : i32, i32, i32
  }
  func.func @transform_6(%arg0: i32, %arg1: i32) -> (i32, i32, i32) {
    %c0_i32 = arith.constant 0 : i32
    %c0_i32_0 = arith.constant 0 : i32
    %c0_i32_1 = arith.constant 0 : i32
    return %arg0, %c0_i32, %c0_i32_0 : i32, i32, i32
  }
}

module attributes {stable_mosaic.version = 11 : i64} {
  func.func @_conv3x3_kernel(%arg0: i32, %arg1: memref<4x9x9x128xbf16, #tpu.memory_space<vmem>>, %arg2: memref<9x128x128xbf16, #tpu.memory_space<vmem>>, %arg3: memref<1x64x128xbf16, #tpu.memory_space<vmem>>, %arg4: memref<1x1x128xf32, #tpu.memory_space<vmem>>, %arg5: memref<1x1x128xf32, #tpu.memory_space<vmem>>) attributes {dimension_semantics = [#tpu.dimension_semantics<parallel>], iteration_bounds = array<i64: 2>, scalar_prefetch = 0 : i64, scratch_operands = 0 : i64, tpu.core_type = #tpu.core_type<tc>, window_params = [{transform_indices = @transform_0, window_bounds = array<i64: 4, 9, 9, 128>}, {pipeline_mode = #tpu.pipeline_mode<synchronous>, transform_indices = @transform_1, window_bounds = array<i64: 9, 128, 128>}, {transform_indices = @transform_2, window_bounds = array<i64: 1, 64, 128>}, {transform_indices = @transform_3, window_bounds = array<i64: 1, 1, 128>}, {transform_indices = @transform_4, window_bounds = array<i64: 1, 1, 128>}]} {
    %cst = arith.constant 0.000000e+00 : f32
    %0 = vector.broadcast %cst : f32 to vector<64x128xf32>
    %c0 = arith.constant 0 : index
    %c0_0 = arith.constant 0 : index
    %c0_1 = arith.constant 0 : index
    %c0_2 = arith.constant 0 : index
    %1 = vector.load %arg1[%c0, %c0_0, %c0_1, %c0_2] : memref<4x9x9x128xbf16, #tpu.memory_space<vmem>>, vector<1x9x8x128xbf16>
    %2 = vector.shape_cast %1 : vector<1x9x8x128xbf16> to vector<9x8x128xbf16>
    %3 = vector.extract_strided_slice %2 {offsets = [0, 0, 0], sizes = [8, 8, 128], strides = [1, 1, 1]} : vector<9x8x128xbf16> to vector<8x8x128xbf16>
    %4 = vector.shape_cast %3 : vector<8x8x128xbf16> to vector<64x128xbf16>
    %c0_3 = arith.constant 0 : index
    %c0_4 = arith.constant 0 : index
    %c0_5 = arith.constant 0 : index
    %5 = vector.load %arg2[%c0_3, %c0_4, %c0_5] : memref<9x128x128xbf16, #tpu.memory_space<vmem>>, vector<1x128x128xbf16>
    %6 = vector.shape_cast %5 : vector<1x128x128xbf16> to vector<128x128xbf16>
    %cst_6 = arith.constant dense<0.000000e+00> : vector<64x128xf32>
    %7 = tpu.matmul %4, %6, %cst_6 {dimension_numbers = #tpu.dot_dimension_numbers<[1], [0], [0], [1], [0, 0, 1, 1], [], []>} : vector<64x128xbf16>, vector<128x128xbf16>, vector<64x128xf32> -> vector<64x128xf32>
    %8 = arith.addf %0, %7 : vector<64x128xf32>
    %9 = vector.extract_strided_slice %2 {offsets = [1, 0, 0], sizes = [8, 8, 128], strides = [1, 1, 1]} : vector<9x8x128xbf16> to vector<8x8x128xbf16>
    %10 = vector.shape_cast %9 : vector<8x8x128xbf16> to vector<64x128xbf16>
    %c6 = arith.constant 6 : index
    %c0_7 = arith.constant 0 : index
    %c0_8 = arith.constant 0 : index
    %11 = vector.load %arg2[%c6, %c0_7, %c0_8] : memref<9x128x128xbf16, #tpu.memory_space<vmem>>, vector<1x128x128xbf16>
    %12 = vector.shape_cast %11 : vector<1x128x128xbf16> to vector<128x128xbf16>
    %cst_9 = arith.constant dense<0.000000e+00> : vector<64x128xf32>
    %13 = tpu.matmul %10, %12, %cst_9 {dimension_numbers = #tpu.dot_dimension_numbers<[1], [0], [0], [1], [0, 0, 1, 1], [], []>} : vector<64x128xbf16>, vector<128x128xbf16>, vector<64x128xf32> -> vector<64x128xf32>
    %14 = arith.addf %8, %13 : vector<64x128xf32>
    %c2 = arith.constant 2 : index
    %c0_10 = arith.constant 0 : index
    %c0_11 = arith.constant 0 : index
    %c0_12 = arith.constant 0 : index
    %15 = vector.load %arg1[%c2, %c0_10, %c0_11, %c0_12] : memref<4x9x9x128xbf16, #tpu.memory_space<vmem>>, vector<1x8x8x128xbf16>
    %16 = vector.shape_cast %15 : vector<1x8x8x128xbf16> to vector<8x8x128xbf16>
    %17 = vector.shape_cast %16 : vector<8x8x128xbf16> to vector<64x128xbf16>
    %c3 = arith.constant 3 : index
    %c0_13 = arith.constant 0 : index
    %c0_14 = arith.constant 0 : index
    %18 = vector.load %arg2[%c3, %c0_13, %c0_14] : memref<9x128x128xbf16, #tpu.memory_space<vmem>>, vector<1x128x128xbf16>
    %19 = vector.shape_cast %18 : vector<1x128x128xbf16> to vector<128x128xbf16>
    %cst_15 = arith.constant dense<0.000000e+00> : vector<64x128xf32>
    %20 = tpu.matmul %17, %19, %cst_15 {dimension_numbers = #tpu.dot_dimension_numbers<[1], [0], [0], [1], [0, 0, 1, 1], [], []>} : vector<64x128xbf16>, vector<128x128xbf16>, vector<64x128xf32> -> vector<64x128xf32>
    %21 = arith.addf %14, %20 : vector<64x128xf32>
    %c1 = arith.constant 1 : index
    %c0_16 = arith.constant 0 : index
    %c0_17 = arith.constant 0 : index
    %c0_18 = arith.constant 0 : index
    %22 = vector.load %arg1[%c1, %c0_16, %c0_17, %c0_18] : memref<4x9x9x128xbf16, #tpu.memory_space<vmem>>, vector<1x9x8x128xbf16>
    %23 = vector.shape_cast %22 : vector<1x9x8x128xbf16> to vector<9x8x128xbf16>
    %24 = vector.extract_strided_slice %23 {offsets = [0, 0, 0], sizes = [8, 8, 128], strides = [1, 1, 1]} : vector<9x8x128xbf16> to vector<8x8x128xbf16>
    %25 = vector.shape_cast %24 : vector<8x8x128xbf16> to vector<64x128xbf16>
    %c1_19 = arith.constant 1 : index
    %c0_20 = arith.constant 0 : index
    %c0_21 = arith.constant 0 : index
    %26 = vector.load %arg2[%c1_19, %c0_20, %c0_21] : memref<9x128x128xbf16, #tpu.memory_space<vmem>>, vector<1x128x128xbf16>
    %27 = vector.shape_cast %26 : vector<1x128x128xbf16> to vector<128x128xbf16>
    %cst_22 = arith.constant dense<0.000000e+00> : vector<64x128xf32>
    %28 = tpu.matmul %25, %27, %cst_22 {dimension_numbers = #tpu.dot_dimension_numbers<[1], [0], [0], [1], [0, 0, 1, 1], [], []>} : vector<64x128xbf16>, vector<128x128xbf16>, vector<64x128xf32> -> vector<64x128xf32>
    %29 = arith.addf %21, %28 : vector<64x128xf32>
    %30 = vector.extract_strided_slice %23 {offsets = [1, 0, 0], sizes = [8, 8, 128], strides = [1, 1, 1]} : vector<9x8x128xbf16> to vector<8x8x128xbf16>
    %31 = vector.shape_cast %30 : vector<8x8x128xbf16> to vector<64x128xbf16>
    %c7 = arith.constant 7 : index
    %c0_23 = arith.constant 0 : index
    %c0_24 = arith.constant 0 : index
    %32 = vector.load %arg2[%c7, %c0_23, %c0_24] : memref<9x128x128xbf16, #tpu.memory_space<vmem>>, vector<1x128x128xbf16>
    %33 = vector.shape_cast %32 : vector<1x128x128xbf16> to vector<128x128xbf16>
    %cst_25 = arith.constant dense<0.000000e+00> : vector<64x128xf32>
    %34 = tpu.matmul %31, %33, %cst_25 {dimension_numbers = #tpu.dot_dimension_numbers<[1], [0], [0], [1], [0, 0, 1, 1], [], []>} : vector<64x128xbf16>, vector<128x128xbf16>, vector<64x128xf32> -> vector<64x128xf32>
    %35 = arith.addf %29, %34 : vector<64x128xf32>
    %c3_26 = arith.constant 3 : index
    %c0_27 = arith.constant 0 : index
    %c0_28 = arith.constant 0 : index
    %c0_29 = arith.constant 0 : index
    %36 = vector.load %arg1[%c3_26, %c0_27, %c0_28, %c0_29] : memref<4x9x9x128xbf16, #tpu.memory_space<vmem>>, vector<1x8x8x128xbf16>
    %37 = vector.shape_cast %36 : vector<1x8x8x128xbf16> to vector<8x8x128xbf16>
    %38 = vector.shape_cast %37 : vector<8x8x128xbf16> to vector<64x128xbf16>
    %c4 = arith.constant 4 : index
    %c0_30 = arith.constant 0 : index
    %c0_31 = arith.constant 0 : index
    %39 = vector.load %arg2[%c4, %c0_30, %c0_31] : memref<9x128x128xbf16, #tpu.memory_space<vmem>>, vector<1x128x128xbf16>
    %40 = vector.shape_cast %39 : vector<1x128x128xbf16> to vector<128x128xbf16>
    %cst_32 = arith.constant dense<0.000000e+00> : vector<64x128xf32>
    %41 = tpu.matmul %38, %40, %cst_32 {dimension_numbers = #tpu.dot_dimension_numbers<[1], [0], [0], [1], [0, 0, 1, 1], [], []>} : vector<64x128xbf16>, vector<128x128xbf16>, vector<64x128xf32> -> vector<64x128xf32>
    %42 = arith.addf %35, %41 : vector<64x128xf32>
    %c0_33 = arith.constant 0 : index
    %c0_34 = arith.constant 0 : index
    %c1_35 = arith.constant 1 : index
    %c0_36 = arith.constant 0 : index
    %43 = vector.load %arg1[%c0_33, %c0_34, %c1_35, %c0_36] : memref<4x9x9x128xbf16, #tpu.memory_space<vmem>>, vector<1x9x8x128xbf16>
    %44 = vector.shape_cast %43 : vector<1x9x8x128xbf16> to vector<9x8x128xbf16>
    %45 = vector.extract_strided_slice %44 {offsets = [0, 0, 0], sizes = [8, 8, 128], strides = [1, 1, 1]} : vector<9x8x128xbf16> to vector<8x8x128xbf16>
    %46 = vector.shape_cast %45 : vector<8x8x128xbf16> to vector<64x128xbf16>
    %c2_37 = arith.constant 2 : index
    %c0_38 = arith.constant 0 : index
    %c0_39 = arith.constant 0 : index
    %47 = vector.load %arg2[%c2_37, %c0_38, %c0_39] : memref<9x128x128xbf16, #tpu.memory_space<vmem>>, vector<1x128x128xbf16>
    %48 = vector.shape_cast %47 : vector<1x128x128xbf16> to vector<128x128xbf16>
    %cst_40 = arith.constant dense<0.000000e+00> : vector<64x128xf32>
    %49 = tpu.matmul %46, %48, %cst_40 {dimension_numbers = #tpu.dot_dimension_numbers<[1], [0], [0], [1], [0, 0, 1, 1], [], []>} : vector<64x128xbf16>, vector<128x128xbf16>, vector<64x128xf32> -> vector<64x128xf32>
    %50 = arith.addf %42, %49 : vector<64x128xf32>
    %51 = vector.extract_strided_slice %44 {offsets = [1, 0, 0], sizes = [8, 8, 128], strides = [1, 1, 1]} : vector<9x8x128xbf16> to vector<8x8x128xbf16>
    %52 = vector.shape_cast %51 : vector<8x8x128xbf16> to vector<64x128xbf16>
    %c8 = arith.constant 8 : index
    %c0_41 = arith.constant 0 : index
    %c0_42 = arith.constant 0 : index
    %53 = vector.load %arg2[%c8, %c0_41, %c0_42] : memref<9x128x128xbf16, #tpu.memory_space<vmem>>, vector<1x128x128xbf16>
    %54 = vector.shape_cast %53 : vector<1x128x128xbf16> to vector<128x128xbf16>
    %cst_43 = arith.constant dense<0.000000e+00> : vector<64x128xf32>
    %55 = tpu.matmul %52, %54, %cst_43 {dimension_numbers = #tpu.dot_dimension_numbers<[1], [0], [0], [1], [0, 0, 1, 1], [], []>} : vector<64x128xbf16>, vector<128x128xbf16>, vector<64x128xf32> -> vector<64x128xf32>
    %56 = arith.addf %50, %55 : vector<64x128xf32>
    %c2_44 = arith.constant 2 : index
    %c0_45 = arith.constant 0 : index
    %c1_46 = arith.constant 1 : index
    %c0_47 = arith.constant 0 : index
    %57 = vector.load %arg1[%c2_44, %c0_45, %c1_46, %c0_47] : memref<4x9x9x128xbf16, #tpu.memory_space<vmem>>, vector<1x8x8x128xbf16>
    %58 = vector.shape_cast %57 : vector<1x8x8x128xbf16> to vector<8x8x128xbf16>
    %59 = vector.shape_cast %58 : vector<8x8x128xbf16> to vector<64x128xbf16>
    %c5 = arith.constant 5 : index
    %c0_48 = arith.constant 0 : index
    %c0_49 = arith.constant 0 : index
    %60 = vector.load %arg2[%c5, %c0_48, %c0_49] : memref<9x128x128xbf16, #tpu.memory_space<vmem>>, vector<1x128x128xbf16>
    %61 = vector.shape_cast %60 : vector<1x128x128xbf16> to vector<128x128xbf16>
    %cst_50 = arith.constant dense<0.000000e+00> : vector<64x128xf32>
    %62 = tpu.matmul %59, %61, %cst_50 {dimension_numbers = #tpu.dot_dimension_numbers<[1], [0], [0], [1], [0, 0, 1, 1], [], []>} : vector<64x128xbf16>, vector<128x128xbf16>, vector<64x128xf32> -> vector<64x128xf32>
    %63 = arith.addf %56, %62 : vector<64x128xf32>
    %64 = arith.truncf %63 : vector<64x128xf32> to vector<64x128xbf16>
    %c0_51 = arith.constant 0 : index
    %c0_52 = arith.constant 0 : index
    %c0_53 = arith.constant 0 : index
    %65 = vector.load %arg3[%c0_51, %c0_52, %c0_53] : memref<1x64x128xbf16, #tpu.memory_space<vmem>>, vector<1x64x128xbf16>
    %66 = vector.shape_cast %65 : vector<1x64x128xbf16> to vector<64x128xbf16>
    %67 = vector.shape_cast %64 : vector<64x128xbf16> to vector<1x64x128xbf16>
    tpu.vector_store %arg3[%c0_51, %c0_52, %c0_53], %67 {strides = array<i32>} : memref<1x64x128xbf16, #tpu.memory_space<vmem>>, vector<1x64x128xbf16>,
    %cst_54 = arith.constant dense<0.000000e+00> : vector<128xf32>
    %68 = vector.multi_reduction <add>, %63, %cst_54 [0] : vector<64x128xf32> to vector<128xf32>
    %69 = vector.shape_cast %68 : vector<128xf32> to vector<1x128xf32>
    %c0_55 = arith.constant 0 : index
    %c0_56 = arith.constant 0 : index
    %c0_57 = arith.constant 0 : index
    %70 = vector.load %arg4[%c0_55, %c0_56, %c0_57] : memref<1x1x128xf32, #tpu.memory_space<vmem>>, vector<1x1x128xf32>
    %71 = vector.shape_cast %70 : vector<1x1x128xf32> to vector<1x128xf32>
    %72 = vector.shape_cast %69 : vector<1x128xf32> to vector<1x1x128xf32>
    tpu.vector_store %arg4[%c0_55, %c0_56, %c0_57], %72 {strides = array<i32>} : memref<1x1x128xf32, #tpu.memory_space<vmem>>, vector<1x1x128xf32>,
    %73 = arith.mulf %63, %63 : vector<64x128xf32>
    %cst_58 = arith.constant dense<0.000000e+00> : vector<128xf32>
    %74 = vector.multi_reduction <add>, %73, %cst_58 [0] : vector<64x128xf32> to vector<128xf32>
    %75 = vector.shape_cast %74 : vector<128xf32> to vector<1x128xf32>
    %c0_59 = arith.constant 0 : index
    %c0_60 = arith.constant 0 : index
    %c0_61 = arith.constant 0 : index
    %76 = vector.load %arg5[%c0_59, %c0_60, %c0_61] : memref<1x1x128xf32, #tpu.memory_space<vmem>>, vector<1x1x128xf32>
    %77 = vector.shape_cast %76 : vector<1x1x128xf32> to vector<1x128xf32>
    %78 = vector.shape_cast %75 : vector<1x128xf32> to vector<1x1x128xf32>
    tpu.vector_store %arg5[%c0_59, %c0_60, %c0_61], %78 {strides = array<i32>} : memref<1x1x128xf32, #tpu.memory_space<vmem>>, vector<1x1x128xf32>,
    return
  }
  func.func @transform_0(%arg0: i32) -> (i32, i32, i32, i32) {
    %c0_i32 = arith.constant 0 : i32
    %c0_i32_0 = arith.constant 0 : i32
    %c0_i32_1 = arith.constant 0 : i32
    %c0_i32_2 = arith.constant 0 : i32
    return %arg0, %c0_i32, %c0_i32_0, %c0_i32_1 : i32, i32, i32, i32
  }
  func.func @transform_1(%arg0: i32) -> (i32, i32, i32) {
    %c0_i32 = arith.constant 0 : i32
    %c0_i32_0 = arith.constant 0 : i32
    %c0_i32_1 = arith.constant 0 : i32
    %c0_i32_2 = arith.constant 0 : i32
    return %c0_i32, %c0_i32_0, %c0_i32_1 : i32, i32, i32
  }
  func.func @transform_2(%arg0: i32) -> (i32, i32, i32) {
    %c0_i32 = arith.constant 0 : i32
    %c0_i32_0 = arith.constant 0 : i32
    %c0_i32_1 = arith.constant 0 : i32
    return %arg0, %c0_i32, %c0_i32_0 : i32, i32, i32
  }
  func.func @transform_3(%arg0: i32) -> (i32, i32, i32) {
    %c0_i32 = arith.constant 0 : i32
    %c0_i32_0 = arith.constant 0 : i32
    %c0_i32_1 = arith.constant 0 : i32
    return %arg0, %c0_i32, %c0_i32_0 : i32, i32, i32
  }
  func.func @transform_4(%arg0: i32) -> (i32, i32, i32) {
    %c0_i32 = arith.constant 0 : i32
    %c0_i32_0 = arith.constant 0 : i32
    %c0_i32_1 = arith.constant 0 : i32
    return %arg0, %c0_i32, %c0_i32_0 : i32, i32, i32
  }
}

</mosaic_0001>

<bundles_post_ra>
// kernel: _lambda_.4
= control target key start
LH: loop header
LB: loop body
LE: loop exit
PB: predicated region body
PF: predicated region fallthrough
CT: control target
= control target key end

     0   :  { %s842_s15 = smov 0   ;;  %s844_s16 = smov 0   ;;  %s930_s0 = inlined_call_operand.vmem [shape: bf16[2,64,128], index: 0, kind: input, shape index: {}]   ;;  %s931_s1 = inlined_call_operand.vmem [shape: bf16[128,128], index: 1, kind: input, shape index: {}]   ;;  %s932_s2 = inlined_call_operand.vmem [shape: bf16[2,64,128], index: 2, kind: output, shape index: {0}]   ;;  %s933_s3 = inlined_call_operand.vmem [shape: f32[2,1,128], index: 3, kind: output, shape index: {1}]   ;;  %s934_s4 = inlined_call_operand.vmem [shape: f32[2,1,128], index: 4, kind: output, shape index: {2}]  }
   0x1   :  { %s846_s17 = smov 0  }
   0x2 LB: > { %s27_s18 = sadd.s32 1, %s810_s16  ;;  %p643_p0 = scmp.ge.s32.totalorder %s814_s17, 1  ;;  %s814_s17 = sphi %s846_s17, %s15_s17   ;;  %s810_s16 = sphi %s844_s16, %s936_s16   ;;  %s806_s15 = sphi %s842_s15, %s935_s15  }
   0x3   : > { %p29_p1 = scmp.ge.s32.totalorder %s27_s18, 2  ;;  %p188_p2 = scmp.lt.s32.totalorder %s814_s17, 3 }
   0x5   : > { %s938_s18 = smov (%p29_p1, %s27_s18), 0  ;;  %p189_p3 = pnand %p643_p0, %p188_p2 }
   0x6   : > { %v780_v0 = vld [vmem:[%s931_s1] sm:$0xff] (!%p189_p3)   ;;  %p229_p4 = scmp.lt.s32.totalorder (!%p189_p3), %s806_s15, 1  ;;  %v781_v1 = vld [vmem:[%s931_s1 + $0x8] sm:$0xff] (!%p189_p3)   ;;  %v782_v2 = vld [vmem:[%s931_s1 + $0x10] sm:$0xff] (!%p189_p3)   ;;  %v816_v12 = vmov (!%p189_p3), 0.0  }
   0x7   : > { %192 = sbr.rel (%p189_p3) target bundleno = 285 (0x11d), region = 28  ;;  %715 = vmatprep.subr.bf16.mxu0 (!%p189_p3), %v780_v0  ;;  %739 = vmatprep.subr.bf16.mxu1 (!%p189_p3), %v780_v0  ;;  %v783_v3 = vld [vmem:[%s931_s1 + $0x18] sm:$0xff] (!%p189_p3)   ;;  %v784_v6 = vld [vmem:[%s931_s1 + $0x20] sm:$0xff] (!%p189_p3)   ;;  %v785_v7 = vld [vmem:[%s931_s1 + $0x28] sm:$0xff] (!%p189_p3)  }
   0x8   : > { %716 = vmatpush3.bf16.msra.mxu0 (!%p189_p3), %v780_v0  ;;  %747 = vmatpush3.bf16.msra.mxu1 (!%p189_p3), %v780_v0  ;;  %v786_v8 = vld [vmem:[%s931_s1 + $0x30] sm:$0xff] (!%p189_p3)   ;;  %v787_v9 = vld [vmem:[%s931_s1 + $0x38] sm:$0xff] (!%p189_p3)  }
   0x9   : > { %717 = vmatprep.subr.bf16.mxu0 (!%p189_p3), %v781_v1  ;;  %740 = vmatprep.subr.bf16.mxu1 (!%p189_p3), %v781_v1 }
   0xc   : > { %718 = vmatpush3.bf16.msra.mxu0 (!%p189_p3), %v781_v1  ;;  %748 = vmatpush3.bf16.msra.mxu1 (!%p189_p3), %v781_v1 }
   0xd   : > { %719 = vmatprep.subr.bf16.mxu0 (!%p189_p3), %v782_v2  ;;  %741 = vmatprep.subr.bf16.mxu1 (!%p189_p3), %v782_v2 }
   0xe   : > { %s940_s15 = smov (!%p229_p4, %s806_s15), 1 }
   0xf   : > { %s670_s25 = sshll.u32 %s940_s15, 5  ;;  %s902_s19 = scalar_lea.vmem %s933_s3, %s940_s15 }
  0x10   : > { %s877_s28 = scalar_lea.vmem %s930_s0, %s670_s25  ;;  %720 = vmatpush3.bf16.msra.mxu0 %v782_v2  ;;  %749 = vmatpush3.bf16.msra.mxu1 %v782_v2  ;;  %s908_s22 = scalar_lea.vmem %s934_s4, %s940_s15  ;;  %460 = vst [vmem:[%s902_s19] sm:$0x1] %v816_v12 }
  0x11   : > { %v788_v4 = vld [vmem:[%s877_s28] sm:$0xff]   ;;  %v790_v5 = vld [vmem:[%s877_s28 + $0x10] sm:$0xff]   ;;  %721 = vmatprep.subr.bf16.mxu0 %v783_v3  ;;  %742 = vmatprep.subr.bf16.mxu1 %v783_v3  ;;  %v789_v10 = vld [vmem:[%s877_s28 + $0x8] sm:$0xff]   ;;  %461 = vst [vmem:[%s908_s22] sm:$0x1] %v816_v12  ;;  %s246_s26 = scalar_lea.vmem %s932_s2, %s670_s25 }
  0x12   : > { %731 = vmatprep.mubr.bf16.mxu0 %v788_v4  ;;  %735 = vmatprep.mubr.bf16.mxu1 %v790_v5  ;;  %v791_v11 = vld [vmem:[%s877_s28 + $0x18] sm:$0xff]  }
  0x14   : > { %722 = vmatpush3.bf16.msra.mxu0 %v783_v3  ;;  %750 = vmatpush3.bf16.msra.mxu1 %v783_v3 }
  0x15   : > { %723 = vmatprep.subr.bf16.mxu0 %v784_v6  ;;  %743 = vmatprep.subr.bf16.mxu1 %v784_v6 }
  0x17   : > { %v462_v56 = vld [vmem:[%s902_s19] sm:$0x1] }
  0x18   : > { %724 = vmatpush3.bf16.msra.mxu0 %v784_v6  ;;  %751 = vmatpush3.bf16.msra.mxu1 %v784_v6  ;;  %v478_v59 = vld [vmem:[%s908_s22] sm:$0x1] }
  0x19   : > { %725 = vmatprep.subr.bf16.mxu0 %v785_v7  ;;  %744 = vmatprep.subr.bf16.mxu1 %v785_v7 }
  0x1c   : > { %726 = vmatpush3.bf16.msra.mxu0 %v785_v7  ;;  %752 = vmatpush3.bf16.msra.mxu1 %v785_v7 }
  0x1d   : > { %727 = vmatprep.subr.bf16.mxu0 %v786_v8  ;;  %745 = vmatprep.subr.bf16.mxu1 %v786_v8 }
  0x20   : > { %728 = vmatpush3.bf16.msra.mxu0 %v786_v8  ;;  %753 = vmatpush3.bf16.msra.mxu1 %v786_v8 }
  0x21   : > { %729 = vmatprep.subr.bf16.mxu0 %v787_v9  ;;  %746 = vmatprep.subr.bf16.mxu1 %v787_v9 }
  0x24   : > { %730 = vmatpush3.bf16.msra.mxu0 %v787_v9  ;;  %754 = vmatpush3.bf16.msra.mxu1 %v787_v9 }
  0x27   : > { %732 = vmatmul.mubr.bf16.vlgmr.msra.gmra.mrb[0].mxu0 %v789_v10  ;;  %736 = vmatmul.mubr.bf16.vlgmr.msra.gmra.mrb[0].mxu1 %v791_v11 }
  0xfa   : > { %v733_v13 = vpop.f32.mrb[0].mxu0  ;;  %v737_v14 = vpop.f32.mrb[0].mxu1 }
  0xfb   : > { %v385_v15 = vpop.f32.mrb[1].mxu0  ;;  %v401_v16 = vpop.f32.mrb[1].mxu1  ;;  %v481_v28 = vmul.f32 %v733_v13, %v733_v13  ;;  %v485_v40 = vmul.f32 %v737_v14, %v737_v14 }
  0xfc   : > { %v734_v17 = vpop.f32.mrb[2].mxu0  ;;  %v738_v18 = vpop.f32.mrb[2].mxu1  ;;  %v479_v19 = vmul.f32 %v385_v15, %v385_v15  ;;  %v483_v34 = vmul.f32 %v401_v16, %v401_v16 }
  0xfd   : > { %v688_v20 = vpack.c.bf16 %v734_v17, %v733_v13  ;;  %v388_v21 = vpop.f32.mrb[3].mxu0  ;;  %v698_v22 = vpack.c.bf16 %v738_v18, %v737_v14  ;;  %v404_v23 = vpop.f32.mrb[3].mxu1  ;;  %v482_v31 = vmul.f32 %v734_v17, %v734_v17  ;;  %v486_v43 = vmul.f32 %v738_v18, %v738_v18 }
  0xfe   : > { %v683_v24 = vpack.c.bf16 %v388_v21, %v385_v15  ;;  %v463_v25 = vadd.f32 %v388_v21, %v385_v15  ;;  %v480_v26 = vmul.f32 %v388_v21, %v388_v21  ;;  %v693_v27 = vpack.c.bf16 %v404_v23, %v401_v16 }
  0xff   : > { %700 = vst [vmem:[%s246_s26 + $0x8] sm:$0xff] %v688_v20   ;;  %702 = vst [vmem:[%s246_s26 + $0x18] sm:$0xff] %v698_v22   ;;  %v484_v39 = vmul.f32 %v404_v23, %v404_v23 }
 0x100   : > { %684 = vst [vmem:[%s246_s26] sm:$0xff] %v683_v24   ;;  %v464_v29 = vadd.f32 %v733_v13, %v463_v25  ;;  %v487_v30 = vadd.f32 %v480_v26, %v479_v19  ;;  %701 = vst [vmem:[%s246_s26 + $0x10] sm:$0xff] %v693_v27  }
 0x102   : > { %v488_v32 = vadd.f32 %v487_v30, %v481_v28  ;;  %v465_v33 = vadd.f32 %v734_v17, %v464_v29 }
 0x104   : > { %v466_v35 = vadd.f32 %v465_v33, %v401_v16  ;;  %v489_v36 = vadd.f32 %v488_v32, %v482_v31 }
 0x106   : > { %v490_v37 = vadd.f32 %v489_v36, %v483_v34  ;;  %v467_v38 = vadd.f32 %v466_v35, %v404_v23 }
 0x108   : > { %v468_v41 = vadd.f32 %v737_v14, %v467_v38  ;;  %v491_v42 = vadd.f32 %v490_v37, %v484_v39 }
 0x10a   : > { %v469_v44 = vadd.f32 %v738_v18, %v468_v41  ;;  %v492_v45 = vadd.f32 %v491_v42, %v485_v40 }
 0x10c   : > { %v470_v46 = vrot.slane %v469_v44, 4  ;;  %v493_v47 = vadd.f32 %v492_v45, %v486_v43 }
 0x10e   : > { %v471_v48 = vadd.f32 %v470_v46, %v469_v44  ;;  %v494_v49 = vrot.slane %v493_v47, 4 }
 0x110   : > { %v472_v50 = vrot.slane %v471_v48, 2  ;;  %v495_v51 = vadd.f32 %v494_v49, %v493_v47 }
 0x112   : > { %v473_v52 = vadd.f32 %v472_v50, %v471_v48  ;;  %v496_v53 = vrot.slane %v495_v51, 2 }
 0x114   : > { %v474_v54 = vrot.slane %v473_v52, 1  ;;  %v497_v55 = vadd.f32 %v496_v53, %v495_v51 }
 0x116   : > { %v475_v57 = vadd.f32 %v474_v54, %v473_v52  ;;  %v498_v58 = vrot.slane %v497_v55, 1 }
 0x118   : > { %v476_v60 = vadd.f32 %v475_v57, %v462_v56  ;;  %v499_v61 = vadd.f32 %v498_v58, %v497_v55 }
 0x11a   : > { %477 = vst [vmem:[%s902_s19] sm:$0x1] %v476_v60  ;;  %v500_v62 = vadd.f32 %v499_v61, %v478_v59 }
 0x11c   : > { %501 = vst [vmem:[%s908_s22] sm:$0x1] %v500_v62 }
 0x11d PF: > { %s15_s17 = sadd.s32 1, %s814_s17   ;;  %s935_s15 = smov %s810_s16 }
 0x11e   : > { %p12_p5 = scmp.ge.s32.totalorder %s15_s17, 4   ;;  %s936_s16 = smov %s938_s18 }
 0x120   :  { %14 = sbr.rel (!%p12_p5) target bundleno = 2 (0x2), region = 86 }

// kernel: _lambda_.5
= control target key start
LH: loop header
LB: loop body
LE: loop exit
PB: predicated region body
PF: predicated region fallthrough
CT: control target
= control target key end

     0   :  { %s1406_s15 = smov 0   ;;  %s1408_s16 = smov 0   ;;  %s1608_s0 = inlined_call_operand.vmem [shape: bf16[2,256,128], index: 0, kind: input, shape index: {}]   ;;  %s1609_s1 = inlined_call_operand.vmem [shape: bf16[128,128], index: 1, kind: input, shape index: {}]   ;;  %s1610_s2 = inlined_call_operand.vmem [shape: bf16[2,256,128], index: 2, kind: output, shape index: {0}]   ;;  %s1611_s3 = inlined_call_operand.vmem [shape: f32[2,1,128], index: 3, kind: output, shape index: {1}]   ;;  %s1612_s4 = inlined_call_operand.vmem [shape: f32[2,1,128], index: 4, kind: output, shape index: {2}]  }
   0x1   :  { %s1410_s17 = smov 0  }
   0x2 LB: > { %s27_s18 = sadd.s32 1, %s1374_s16  ;;  %p1027_p0 = scmp.ge.s32.totalorder %s1378_s17, 1  ;;  %s1378_s17 = sphi %s1410_s17, %s15_s17   ;;  %s1374_s16 = sphi %s1408_s16, %s1614_s16   ;;  %s1370_s15 = sphi %s1406_s15, %s1613_s15  }
   0x3   : > { %p29_p1 = scmp.ge.s32.totalorder %s27_s18, 2  ;;  %p188_p2 = scmp.lt.s32.totalorder %s1378_s17, 3 }
   0x5   : > { %s1616_s18 = smov (%p29_p1, %s27_s18), 0  ;;  %p189_p3 = pnand %p1027_p0, %p188_p2 }
   0x6   : > { %v1332_v0 = vld [vmem:[%s1609_s1] sm:$0xff] (!%p189_p3)   ;;  %p229_p4 = scmp.lt.s32.totalorder (!%p189_p3), %s1370_s15, 1  ;;  %v1333_v1 = vld [vmem:[%s1609_s1 + $0x8] sm:$0xff] (!%p189_p3)   ;;  %v1334_v2 = vld [vmem:[%s1609_s1 + $0x10] sm:$0xff] (!%p189_p3)   ;;  %v1380_v24 = vmov (!%p189_p3), 0.0  }
   0x7   : > { %192 = sbr.rel (%p189_p3) target bundleno = 333 (0x14d), region = 28  ;;  %1243 = vmatprep.subr.bf16.mxu0 (!%p189_p3), %v1332_v0  ;;  %1291 = vmatprep.subr.bf16.mxu1 (!%p189_p3), %v1332_v0  ;;  %v1335_v3 = vld [vmem:[%s1609_s1 + $0x18] sm:$0xff] (!%p189_p3)   ;;  %v1336_v5 = vld [vmem:[%s1609_s1 + $0x20] sm:$0xff] (!%p189_p3)   ;;  %v1337_v6 = vld [vmem:[%s1609_s1 + $0x28] sm:$0xff] (!%p189_p3)  }
   0x8   : > { %1244 = vmatpush3.bf16.msra.mxu0 (!%p189_p3), %v1332_v0  ;;  %1299 = vmatpush3.bf16.msra.mxu1 (!%p189_p3), %v1332_v0  ;;  %v1338_v8 = vld [vmem:[%s1609_s1 + $0x30] sm:$0xff] (!%p189_p3)   ;;  %v1339_v9 = vld [vmem:[%s1609_s1 + $0x38] sm:$0xff] (!%p189_p3)  }
   0x9   : > { %1245 = vmatprep.subr.bf16.mxu0 (!%p189_p3), %v1333_v1  ;;  %1292 = vmatprep.subr.bf16.mxu1 (!%p189_p3), %v1333_v1 }
   0xc   : > { %1246 = vmatpush3.bf16.msra.mxu0 (!%p189_p3), %v1333_v1  ;;  %1300 = vmatpush3.bf16.msra.mxu1 (!%p189_p3), %v1333_v1 }
   0xd   : > { %1247 = vmatprep.subr.bf16.mxu0 (!%p189_p3), %v1334_v2  ;;  %1293 = vmatprep.subr.bf16.mxu1 (!%p189_p3), %v1334_v2 }
   0xe   : > { %s1618_s15 = smov (!%p229_p4, %s1370_s15), 1 }
   0xf   : > { %s1090_s25 = sshll.u32 %s1618_s15, 7  ;;  %s1478_s19 = scalar_lea.vmem %s1611_s3, %s1618_s15 }
  0x10   : > { %s1441_s28 = scalar_lea.vmem %s1608_s0, %s1090_s25  ;;  %1248 = vmatpush3.bf16.msra.mxu0 %v1334_v2  ;;  %1301 = vmatpush3.bf16.msra.mxu1 %v1334_v2  ;;  %s1484_s22 = scalar_lea.vmem %s1612_s4, %s1618_s15  ;;  %772 = vst [vmem:[%s1478_s19] sm:$0x1] %v1380_v24 }
  0x11   : > { %v1340_v4 = vld [vmem:[%s1441_s28] sm:$0xff]   ;;  %1249 = vmatprep.subr.bf16.mxu0 %v1335_v3  ;;  %1294 = vmatprep.subr.bf16.mxu1 %v1335_v3  ;;  %v1341_v10 = vld [vmem:[%s1441_s28 + $0x8] sm:$0xff]   ;;  %v1342_v12 = vld [vmem:[%s1441_s28 + $0x10] sm:$0xff]   ;;  %773 = vst [vmem:[%s1484_s22] sm:$0x1] %v1380_v24  ;;  %s1497_s26 = scalar_lea.vmem %s1610_s2, %s1090_s25 }
  0x12   : > { %1259 = vmatprep.mubr.bf16.mxu0 %v1340_v4  ;;  %v1348_v7 = vld [vmem:[%s1441_s28 + $0x40] sm:$0xff]   ;;  %v1349_v11 = vld [vmem:[%s1441_s28 + $0x48] sm:$0xff]   ;;  %v1350_v13 = vld [vmem:[%s1441_s28 + $0x50] sm:$0xff]  }
  0x13   : > { %1275 = vmatprep.mubr.bf16.mxu1 %v1348_v7  ;;  %v1343_v14 = vld [vmem:[%s1441_s28 + $0x18] sm:$0xff]   ;;  %v1344_v16 = vld [vmem:[%s1441_s28 + $0x20] sm:$0xff]   ;;  %v1345_v18 = vld [vmem:[%s1441_s28 + $0x28] sm:$0xff]  }
  0x14   : > { %1250 = vmatpush3.bf16.msra.mxu0 %v1335_v3  ;;  %1302 = vmatpush3.bf16.msra.mxu1 %v1335_v3  ;;  %v1351_v15 = vld [vmem:[%s1441_s28 + $0x58] sm:$0xff]   ;;  %v1352_v17 = vld [vmem:[%s1441_s28 + $0x60] sm:$0xff]   ;;  %v1353_v19 = vld [vmem:[%s1441_s28 + $0x68] sm:$0xff]  }
  0x15   : > { %1251 = vmatprep.subr.bf16.mxu0 %v1336_v5  ;;  %1295 = vmatprep.subr.bf16.mxu1 %v1336_v5  ;;  %v1346_v20 = vld [vmem:[%s1441_s28 + $0x30] sm:$0xff]   ;;  %v1347_v22 = vld [vmem:[%s1441_s28 + $0x38] sm:$0xff]  }
  0x16   : > { %v1354_v21 = vld [vmem:[%s1441_s28 + $0x70] sm:$0xff]   ;;  %v1355_v23 = vld [vmem:[%s1441_s28 + $0x78] sm:$0xff]  }
  0x18   : > { %1252 = vmatpush3.bf16.msra.mxu0 %v1336_v5  ;;  %1303 = vmatpush3.bf16.msra.mxu1 %v1336_v5 }
  0x19   : > { %1253 = vmatprep.subr.bf16.mxu0 %v1337_v6  ;;  %1296 = vmatprep.subr.bf16.mxu1 %v1337_v6 }
  0x1c   : > { %1254 = vmatpush3.bf16.msra.mxu0 %v1337_v6  ;;  %1304 = vmatpush3.bf16.msra.mxu1 %v1337_v6 }
  0x1d   : > { %1255 = vmatprep.subr.bf16.mxu0 %v1338_v8  ;;  %1297 = vmatprep.subr.bf16.mxu1 %v1338_v8 }
  0x20   : > { %1256 = vmatpush3.bf16.msra.mxu0 %v1338_v8  ;;  %1305 = vmatpush3.bf16.msra.mxu1 %v1338_v8 }
  0x21   : > { %1257 = vmatprep.subr.bf16.mxu0 %v1339_v9  ;;  %1298 = vmatprep.subr.bf16.mxu1 %v1339_v9 }
  0x24   : > { %1258 = vmatpush3.bf16.msra.mxu0 %v1339_v9  ;;  %1306 = vmatpush3.bf16.msra.mxu1 %v1339_v9 }
  0x27   : > { %1260 = vmatmul.mubr.bf16.vlgmr.msra.gmra.mrb[0].mxu0 %v1341_v10  ;;  %1276 = vmatmul.mubr.bf16.vlgmr.msra.gmra.mrb[0].mxu1 %v1349_v11 }
  0x28   : > { %1263 = vmatprep.mubr.bf16.mxu0 %v1342_v12  ;;  %1279 = vmatprep.mubr.bf16.mxu1 %v1350_v13 }
  0x2f   : > { %1264 = vmatmul.mubr.bf16.gmra.mrb[4].mxu0 %v1343_v14  ;;  %1280 = vmatmul.mubr.bf16.gmra.mrb[4].mxu1 %v1351_v15 }
  0x30   : > { %1267 = vmatprep.mubr.bf16.mxu0 %v1344_v16  ;;  %1283 = vmatprep.mubr.bf16.mxu1 %v1352_v17 }
  0x37   : > { %1268 = vmatmul.mubr.bf16.gmra.mrb[8].mxu0 %v1345_v18  ;;  %1284 = vmatmul.mubr.bf16.gmra.mrb[8].mxu1 %v1353_v19 }
  0x38   : > { %1271 = vmatprep.mubr.bf16.mxu0 %v1346_v20  ;;  %1287 = vmatprep.mubr.bf16.mxu1 %v1354_v21 }
  0x3f   : > { %1272 = vmatmul.mubr.bf16.gmra.mrb[12].mxu0 %v1347_v22  ;;  %1288 = vmatmul.mubr.bf16.gmra.mrb[12].mxu1 %v1355_v23 }
  0xfa   : > { %v1261_v25 = vpop.f32.mrb[0].mxu0  ;;  %v1488_v26 = vpop.f32.mrb[0].mxu1 }
  0xfb   : > { %v481_v27 = vpop.f32.mrb[1].mxu0  ;;  %v1490_v28 = vpop.f32.mrb[1].mxu1  ;;  %v817_v40 = vmul.f32 %v1261_v25, %v1261_v25 }
  0xfc   : > { %v1262_v29 = vpop.f32.mrb[2].mxu0  ;;  %v1499_v30 = vpop.f32.mrb[2].mxu1  ;;  %v815_v31 = vmul.f32 %v481_v27, %v481_v27 }
  0xfd   : > { %v1132_v32 = vpack.c.bf16 %v1262_v29, %v1261_v25  ;;  %v484_v33 = vpop.f32.mrb[3].mxu0  ;;  %v1172_v34 = vpack.c.bf16 %v1499_v30, %v1488_v26  ;;  %v1503_v35 = vpop.f32.mrb[3].mxu1  ;;  %v818_v43 = vmul.f32 %v1262_v29, %v1262_v29 }
  0xfe   : > { %v1127_v36 = vpack.c.bf16 %v484_v33, %v481_v27  ;;  %v775_v37 = vadd.f32 %v484_v33, %v481_v27  ;;  %v816_v38 = vmul.f32 %v484_v33, %v484_v33  ;;  %v1167_v39 = vpack.c.bf16 %v1503_v35, %v1490_v28 }
  0xff   : > { %1204 = vst [vmem:[%s1497_s26 + $0x8] sm:$0xff] %v1132_v32   ;;  %1212 = vst [vmem:[%s1497_s26 + $0x48] sm:$0xff] %v1172_v34  }
 0x100   : > { %1128 = vst [vmem:[%s1497_s26] sm:$0xff] %v1127_v36   ;;  %v776_v41 = vadd.f32 %v1261_v25, %v775_v37  ;;  %v847_v42 = vadd.f32 %v816_v38, %v815_v31  ;;  %1211 = vst [vmem:[%s1497_s26 + $0x40] sm:$0xff] %v1167_v39  }
 0x102   : > { %v848_v44 = vadd.f32 %v847_v42, %v817_v40  ;;  %v1265_v45 = vpop.f32.mrb[4].mxu0  ;;  %v777_v46 = vadd.f32 %v1262_v29, %v776_v41  ;;  %v1511_v47 = vpop.f32.mrb[4].mxu1 }
 0x103   : > { %v497_v48 = vpop.f32.mrb[5].mxu0  ;;  %v1513_v49 = vpop.f32.mrb[5].mxu1  ;;  %v821_v0 = vmul.f32 %v1265_v45, %v1265_v45 }
 0x104   : > { %v778_v50 = vadd.f32 %v777_v46, %v497_v48  ;;  %v819_v51 = vmul.f32 %v497_v48, %v497_v48  ;;  %v849_v52 = vadd.f32 %v848_v44, %v818_v43  ;;  %v1266_v53 = vpop.f32.mrb[6].mxu0  ;;  %v1515_v54 = vpop.f32.mrb[6].mxu1 }
 0x105   : > { %v1142_v55 = vpack.c.bf16 %v1266_v53, %v1265_v45  ;;  %v500_v56 = vpop.f32.mrb[7].mxu0  ;;  %v1182_v57 = vpack.c.bf16 %v1515_v54, %v1511_v47  ;;  %v1519_v58 = vpop.f32.mrb[7].mxu1  ;;  %v822_v3 = vmul.f32 %v1266_v53, %v1266_v53 }
 0x106   : > { %v850_v59 = vadd.f32 %v849_v52, %v819_v51  ;;  %v1137_v60 = vpack.c.bf16 %v500_v56, %v497_v48  ;;  %v779_v61 = vadd.f32 %v778_v50, %v500_v56  ;;  %v820_v62 = vmul.f32 %v500_v56, %v500_v56 }
 0x107   : > { %1206 = vst [vmem:[%s1497_s26 + $0x18] sm:$0xff] %v1142_v55   ;;  %1214 = vst [vmem:[%s1497_s26 + $0x58] sm:$0xff] %v1182_v57   ;;  %v1177_v63 = vpack.c.bf16 %v1519_v58, %v1513_v49 }
 0x108   : > { %1205 = vst [vmem:[%s1497_s26 + $0x10] sm:$0xff] %v1137_v60   ;;  %v780_v1 = vadd.f32 %v1265_v45, %v779_v61  ;;  %v851_v2 = vadd.f32 %v850_v59, %v820_v62  ;;  %v831_v62 = vmul.f32 %v1490_v28, %v1490_v28 }
 0x109   : > { %1213 = vst [vmem:[%s1497_s26 + $0x50] sm:$0xff] %v1177_v63  }
 0x10a   : > { %v852_v4 = vadd.f32 %v851_v2, %v821_v0  ;;  %v1269_v5 = vpop.f32.mrb[8].mxu0  ;;  %v781_v6 = vadd.f32 %v1266_v53, %v780_v1  ;;  %v1527_v7 = vpop.f32.mrb[8].mxu1 }
 0x10b   : > { %v513_v8 = vpop.f32.mrb[9].mxu0  ;;  %v1529_v9 = vpop.f32.mrb[9].mxu1  ;;  %v825_v24 = vmul.f32 %v1269_v5, %v1269_v5 }
 0x10c   : > { %v782_v10 = vadd.f32 %v781_v6, %v513_v8  ;;  %v823_v11 = vmul.f32 %v513_v8, %v513_v8  ;;  %v853_v12 = vadd.f32 %v852_v4, %v822_v3  ;;  %v1270_v13 = vpop.f32.mrb[10].mxu0  ;;  %v1531_v14 = vpop.f32.mrb[10].mxu1  ;;  %v832_v3 = vmul.f32 %v1503_v35, %v1503_v35 }
 0x10d   : > { %v1152_v15 = vpack.c.bf16 %v1270_v13, %v1269_v5  ;;  %v516_v16 = vpop.f32.mrb[11].mxu0  ;;  %v1192_v17 = vpack.c.bf16 %v1531_v14, %v1527_v7  ;;  %v1535_v18 = vpop.f32.mrb[11].mxu1  ;;  %v826_v29 = vmul.f32 %v1270_v13, %v1270_v13  ;;  %v833_v4 = vmul.f32 %v1488_v26, %v1488_v26 }
 0x10e   : > { %v854_v19 = vadd.f32 %v853_v12, %v823_v11  ;;  %v1147_v20 = vpack.c.bf16 %v516_v16, %v513_v8  ;;  %v783_v21 = vadd.f32 %v782_v10, %v516_v16  ;;  %v824_v22 = vmul.f32 %v516_v16, %v516_v16 }
 0x10f   : > { %1208 = vst [vmem:[%s1497_s26 + $0x28] sm:$0xff] %v1152_v15   ;;  %1216 = vst [vmem:[%s1497_s26 + $0x68] sm:$0xff] %v1192_v17   ;;  %v1187_v23 = vpack.c.bf16 %v1535_v18, %v1529_v9  ;;  %v834_v8 = vmul.f32 %v1499_v30, %v1499_v30  ;;  %v836_v16 = vmul.f32 %v1519_v58, %v1519_v58 }
 0x110   : > { %1207 = vst [vmem:[%s1497_s26 + $0x20] sm:$0xff] %v1147_v20   ;;  %v784_v25 = vadd.f32 %v1269_v5, %v783_v21  ;;  %v855_v27 = vadd.f32 %v854_v19, %v824_v22 }
 0x111   : > { %1215 = vst [vmem:[%s1497_s26 + $0x60] sm:$0xff] %v1187_v23  }
 0x112   : > { %v856_v31 = vadd.f32 %v855_v27, %v825_v24  ;;  %v1273_v32 = vpop.f32.mrb[12].mxu0  ;;  %v785_v33 = vadd.f32 %v1270_v13, %v784_v25  ;;  %v1543_v34 = vpop.f32.mrb[12].mxu1  ;;  %v840_v25 = vmul.f32 %v1535_v18, %v1535_v18 }
 0x113   : > { %v529_v36 = vpop.f32.mrb[13].mxu0  ;;  %v593_v37 = vpop.f32.mrb[13].mxu1  ;;  %v829_v55 = vmul.f32 %v1273_v32, %v1273_v32 }
 0x114   : > { %v786_v38 = vadd.f32 %v785_v33, %v529_v36  ;;  %v827_v39 = vmul.f32 %v529_v36, %v529_v36  ;;  %v857_v40 = vadd.f32 %v856_v31, %v826_v29  ;;  %v1274_v41 = vpop.f32.mrb[14].mxu0  ;;  %v1545_v42 = vpop.f32.mrb[14].mxu1 }
 0x115   : > { %v1162_v43 = vpack.c.bf16 %v1274_v41, %v1273_v32  ;;  %v532_v44 = vpop.f32.mrb[15].mxu0  ;;  %v1202_v45 = vpack.c.bf16 %v1545_v42, %v1543_v34  ;;  %v596_v46 = vpop.f32.mrb[15].mxu1  ;;  %v830_v59 = vmul.f32 %v1274_v41, %v1274_v41 }
 0x116   : > { %v858_v48 = vadd.f32 %v857_v40, %v827_v39  ;;  %v1157_v50 = vpack.c.bf16 %v532_v44, %v529_v36  ;;  %v787_v51 = vadd.f32 %v786_v38, %v532_v44  ;;  %v828_v52 = vmul.f32 %v532_v44, %v532_v44 }
 0x117   : > { %1210 = vst [vmem:[%s1497_s26 + $0x38] sm:$0xff] %v1162_v43   ;;  %1218 = vst [vmem:[%s1497_s26 + $0x78] sm:$0xff] %v1202_v45   ;;  %v1197_v53 = vpack.c.bf16 %v596_v46, %v593_v37  ;;  %v844_v40 = vmul.f32 %v596_v46, %v596_v46  ;;  %v846_v43 = vmul.f32 %v1545_v42, %v1545_v42 }
 0x118   : > { %1209 = vst [vmem:[%s1497_s26 + $0x30] sm:$0xff] %v1157_v50   ;;  %v788_v56 = vadd.f32 %v1273_v32, %v787_v51  ;;  %v859_v57 = vadd.f32 %v858_v48, %v828_v52 }
 0x119   : > { %1217 = vst [vmem:[%s1497_s26 + $0x70] sm:$0xff] %v1197_v53  }
 0x11a   : > { %v860_v60 = vadd.f32 %v859_v57, %v829_v55  ;;  %v789_v61 = vadd.f32 %v1274_v41, %v788_v56  ;;  %v774_v56 = vld [vmem:[%s1478_s19] sm:$0x1] }
 0x11c   : > { %v790_v63 = vadd.f32 %v789_v61, %v1490_v28  ;;  %v861_v0 = vadd.f32 %v860_v60, %v830_v59  ;;  %v835_v28 = vmul.f32 %v1513_v49, %v1513_v49  ;;  %v814_v60 = vld [vmem:[%s1484_s22] sm:$0x1] }
 0x11e   : > { %v862_v1 = vadd.f32 %v861_v0, %v831_v62  ;;  %v791_v2 = vadd.f32 %v790_v63, %v1503_v35 }
 0x120   : > { %v792_v5 = vadd.f32 %v1488_v26, %v791_v2  ;;  %v863_v6 = vadd.f32 %v862_v1, %v832_v3  ;;  %v837_v26 = vmul.f32 %v1511_v47, %v1511_v47 }
 0x122   : > { %v864_v10 = vadd.f32 %v863_v6, %v833_v4  ;;  %v793_v11 = vadd.f32 %v1499_v30, %v792_v5  ;;  %v838_v30 = vmul.f32 %v1515_v54, %v1515_v54 }
 0x124   : > { %v794_v12 = vadd.f32 %v793_v11, %v1513_v49  ;;  %v865_v13 = vadd.f32 %v864_v10, %v834_v8  ;;  %v839_v49 = vmul.f32 %v1529_v9, %v1529_v9 }
 0x126   : > { %v866_v15 = vadd.f32 %v865_v13, %v835_v28  ;;  %v795_v35 = vadd.f32 %v794_v12, %v1519_v58 }
 0x128   : > { %v796_v17 = vadd.f32 %v1511_v47, %v795_v35  ;;  %v867_v19 = vadd.f32 %v866_v15, %v836_v16  ;;  %v841_v47 = vmul.f32 %v1527_v7, %v1527_v7 }
 0x12a   : > { %v868_v20 = vadd.f32 %v867_v19, %v837_v26  ;;  %v797_v21 = vadd.f32 %v1515_v54, %v796_v17  ;;  %v842_v54 = vmul.f32 %v1531_v14, %v1531_v14 }
 0x12c   : > { %v798_v22 = vadd.f32 %v797_v21, %v1529_v9  ;;  %v869_v23 = vadd.f32 %v868_v20, %v838_v30  ;;  %v843_v9 = vmul.f32 %v593_v37, %v593_v37 }
 0x12e   : > { %v870_v24 = vadd.f32 %v869_v23, %v839_v49  ;;  %v799_v58 = vadd.f32 %v798_v22, %v1535_v18  ;;  %v845_v18 = vmul.f32 %v1543_v34, %v1543_v34 }
 0x130   : > { %v800_v27 = vadd.f32 %v1527_v7, %v799_v58  ;;  %v871_v29 = vadd.f32 %v870_v24, %v840_v25 }
 0x132   : > { %v872_v31 = vadd.f32 %v871_v29, %v841_v47  ;;  %v801_v32 = vadd.f32 %v1531_v14, %v800_v27 }
 0x134   : > { %v802_v33 = vadd.f32 %v801_v32, %v593_v37  ;;  %v873_v36 = vadd.f32 %v872_v31, %v842_v54 }
 0x136   : > { %v874_v38 = vadd.f32 %v873_v36, %v843_v9  ;;  %v803_v39 = vadd.f32 %v802_v33, %v596_v46 }
 0x138   : > { %v804_v41 = vadd.f32 %v1543_v34, %v803_v39  ;;  %v875_v7 = vadd.f32 %v874_v38, %v844_v40 }
 0x13a   : > { %v805_v44 = vadd.f32 %v1545_v42, %v804_v41  ;;  %v876_v14 = vadd.f32 %v875_v7, %v845_v18 }
 0x13c   : > { %v806_v45 = vrot.slane %v805_v44, 4  ;;  %v877_v37 = vadd.f32 %v876_v14, %v846_v43 }
 0x13e   : > { %v807_v48 = vadd.f32 %v806_v45, %v805_v44  ;;  %v878_v46 = vrot.slane %v877_v37, 4 }
 0x140   : > { %v808_v50 = vrot.slane %v807_v48, 2  ;;  %v879_v51 = vadd.f32 %v878_v46, %v877_v37 }
 0x142   : > { %v809_v52 = vadd.f32 %v808_v50, %v807_v48  ;;  %v880_v53 = vrot.slane %v879_v51, 2 }
 0x144   : > { %v810_v55 = vrot.slane %v809_v52, 1  ;;  %v881_v34 = vadd.f32 %v880_v53, %v879_v51 }
 0x146   : > { %v811_v57 = vadd.f32 %v810_v55, %v809_v52  ;;  %v882_v59 = vrot.slane %v881_v34, 1 }
 0x148   : > { %v812_v61 = vadd.f32 %v811_v57, %v774_v56  ;;  %v883_v62 = vadd.f32 %v882_v59, %v881_v34 }
 0x14a   : > { %813 = vst [vmem:[%s1478_s19] sm:$0x1] %v812_v61  ;;  %v884_v42 = vadd.f32 %v883_v62, %v814_v60 }
 0x14c   : > { %885 = vst [vmem:[%s1484_s22] sm:$0x1] %v884_v42 }
 0x14d PF: > { %s15_s17 = sadd.s32 1, %s1378_s17   ;;  %s1613_s15 = smov %s1374_s16 }
 0x14e   : > { %p12_p5 = scmp.ge.s32.totalorder %s15_s17, 4   ;;  %s1614_s16 = smov %s1616_s18 }
 0x150   :  { %14 = sbr.rel (!%p12_p5) target bundleno = 2 (0x2), region = 86 }

// kernel: squeeze.15
= control target key start
LH: loop header
LB: loop body
LE: loop exit
PB: predicated region body
PF: predicated region fallthrough
CT: control target
= control target key end

     0   :  { %s354_s8 = smov 116   ;;  %s355_s9 = smov 120   ;;  %vm7_vm0 = vcmask 31744   ;;  %s653_s0 = inlined_call_operand.vmem [shape: f32[2,128], index: 0, kind: input, shape index: {}]   ;;  %s654_s1 = inlined_call_operand.vmem [shape: f32[2,32,4], index: 1, kind: output, shape index: {}]  }
   0x1   :  { %v4_v0 = vld [vmem:[%s653_s0] sm:$0x3]  ;;  %s353_s0 = smov 124   ;;  %s356_s10 = smov 112  }
   0x2   :  { %5 = vst [vmem:[#allocation0] sm:$0x3] %v4_v0  ;;  %s357_s11 = smov 108   ;;  %s358_s12 = smov 104  }
   0x3   :  { %s359_s13 = smov 100   ;;  %s360_s14 = smov 96  }
   0x4   :  { %s361_s15 = smov 92   ;;  %s362_s16 = smov 88  }
   0x5   :  { %s363_s17 = smov 84   ;;  %s364_s18 = smov 80  }
   0x6   :  { %s365_s19 = smov 76   ;;  %s366_s20 = smov 72  }
   0x7   :  { %s367_s21 = smov 68   ;;  %s368_s22 = smov 64  }
   0x8   :  { %s369_s23 = smov 60   ;;  %s370_s24 = smov 56  }
   0x9   :  { %v11_v1 = vld [vmem:[#allocation0] sm:$0x3]   ;;  %s371_s25 = smov 52   ;;  %s372_s26 = smov 48  }
   0xa   :  { %v27_v2 = vld [vmem:[#allocation0] sm:$0x3]   ;;  %12 = vrot.lane.b32.xlu0 %v11_v1, %s353_s0  ;;  %s373_s27 = smov 44   ;;  %s374_s28 = smov 40  }
   0xb   :  { %28 = vrot.lane.b32.xlu1 %v27_v2, %s354_s8  ;;  %v19_v3 = vld [vmem:[#allocation0] sm:$0x3]   ;;  %s375_s29 = smov 36   ;;  %s376_s30 = smov 32  }
   0xc   :  { %v35_v4 = vld [vmem:[#allocation0] sm:$0x3]   ;;  %s377_s6 = smov 28   ;;  %s378_s7 = smov 24  }
   0xd   :  { %v43_v5 = vld [vmem:[#allocation0] sm:$0x3]   ;;  %s379_s0 = smov 20   ;;  %s380_s8 = smov 16  }
   0xe   :  { %20 = vrot.lane.b32.xlu0 %v19_v3, %s355_s9  ;;  %v51_v6 = vld [vmem:[#allocation0] sm:$0x3]   ;;  %s381_s9 = smov 12  }
   0xf   :  { %36 = vrot.lane.b32.xlu1 %v35_v4, %s356_s10  ;;  %v59_v7 = vld [vmem:[#allocation0] sm:$0x3]   ;;  %s382_s10 = smov 8  }
  0x10   :  { %v67_v8 = vld [vmem:[#allocation0] sm:$0x3]  }
  0x11   :  { %v75_v9 = vld [vmem:[#allocation0] sm:$0x3]  }
  0x12   :  { %44 = vrot.lane.b32.xlu0 %v43_v5, %s357_s11  ;;  %v83_v10 = vld [vmem:[#allocation0] sm:$0x3]   ;;  %s383_s11 = smov 4  }
  0x13   :  { %52 = vrot.lane.b32.xlu1 %v51_v6, %s358_s12  ;;  %v91_v11 = vld [vmem:[#allocation0] sm:$0x3]  }
  0x14   :  { %v99_v12 = vld [vmem:[#allocation0] sm:$0x3]  }
  0x15   :  { %v107_v13 = vld [vmem:[#allocation0] sm:$0x3]  }
  0x16   :  { %60 = vrot.lane.b32.xlu0 %v59_v7, %s359_s13  ;;  %v115_v14 = vld [vmem:[#allocation0] sm:$0x3]  }
  0x17   :  { %68 = vrot.lane.b32.xlu1 %v67_v8, %s360_s14  ;;  %v123_v15 = vld [vmem:[#allocation0] sm:$0x3]  }
  0x18   :  { %v131_v16 = vld [vmem:[#allocation0] sm:$0x3]  }
  0x19   :  { %v139_v17 = vld [vmem:[#allocation0] sm:$0x3]  }
  0x1a   :  { %76 = vrot.lane.b32.xlu0 %v75_v9, %s361_s15  ;;  %v147_v18 = vld [vmem:[#allocation0] sm:$0x3]  }
  0x1b   :  { %84 = vrot.lane.b32.xlu1 %v83_v10, %s362_s16  ;;  %v155_v19 = vld [vmem:[#allocation0] sm:$0x3]  }
  0x1c   :  { %v163_v20 = vld [vmem:[#allocation0] sm:$0x3]  }
  0x1d   :  { %v171_v21 = vld [vmem:[#allocation0] sm:$0x3]  }
  0x1e   :  { %92 = vrot.lane.b32.xlu0 %v91_v11, %s363_s17  ;;  %v179_v22 = vld [vmem:[#allocation0] sm:$0x3]  }
  0x1f   :  { %100 = vrot.lane.b32.xlu1 %v99_v12, %s364_s18  ;;  %v187_v23 = vld [vmem:[#allocation0] sm:$0x3]  }
  0x20   :  { %v195_v24 = vld [vmem:[#allocation0] sm:$0x3]  }
  0x21   :  { %v203_v25 = vld [vmem:[#allocation0] sm:$0x3]  }
  0x22   :  { %108 = vrot.lane.b32.xlu0 %v107_v13, %s365_s19  ;;  %v211_v26 = vld [vmem:[#allocation0] sm:$0x3]  }
  0x23   :  { %116 = vrot.lane.b32.xlu1 %v115_v14, %s366_s20  ;;  %v6_v27 = vld [vmem:[#allocation0] sm:$0x3]  }
  0x24   :  { %8 = vst.msk [vmem:[%s654_s1] sm:$0x1] %vm7_vm0, %v6_v27   ;;  %259 = vst.msk [vmem:[%s654_s1 + $0x1f] sm:$0x2] %vm7_vm0, %v6_v27   ;;  %v219_v28 = vld [vmem:[#allocation0] sm:$0x3]  }
  0x25   :  { %v227_v29 = vld [vmem:[#allocation0] sm:$0x3]  }
  0x26   :  { %124 = vrot.lane.b32.xlu0 %v123_v15, %s367_s21  ;;  %v235_v30 = vld [vmem:[#allocation0] sm:$0x3]  }
  0x27   :  { %132 = vrot.lane.b32.xlu1 %v131_v16, %s368_s22  ;;  %v243_v31 = vld [vmem:[#allocation0] sm:$0x3]  }
  0x28   :  { %v251_v32 = vld [vmem:[#allocation0] sm:$0x3]  }
  0x2a   :  { %140 = vrot.lane.b32.xlu0 %v139_v17, %s369_s23 }
  0x2b   :  { %148 = vrot.lane.b32.xlu1 %v147_v18, %s370_s24 }
  0x2e   :  { %156 = vrot.lane.b32.xlu0 %v155_v19, %s371_s25 }
  0x2f   :  { %164 = vrot.lane.b32.xlu1 %v163_v20, %s372_s26 }
  0x32   :  { %172 = vrot.lane.b32.xlu0 %v171_v21, %s373_s27 }
  0x33   :  { %180 = vrot.lane.b32.xlu1 %v179_v22, %s374_s28 }
  0x36   :  { %188 = vrot.lane.b32.xlu0 %v187_v23, %s375_s29 }
  0x37   :  { %196 = vrot.lane.b32.xlu1 %v195_v24, %s376_s30 }
  0x3a   :  { %204 = vrot.lane.b32.xlu0 %v203_v25, %s377_s6 }
  0x3b   :  { %212 = vrot.lane.b32.xlu1 %v211_v26, %s378_s7 }
  0x3e   :  { %220 = vrot.lane.b32.xlu0 %v219_v28, %s379_s0 }
  0x3f   :  { %228 = vrot.lane.b32.xlu1 %v227_v29, %s380_s8 }
  0x42   :  { %236 = vrot.lane.b32.xlu0 %v235_v30, %s381_s9 }
  0x43   :  { %244 = vrot.lane.b32.xlu1 %v243_v31, %s382_s10 }
  0x46   :  { %252 = vrot.lane.b32.xlu0 %v251_v32, %s383_s11 }
  0x7c   :  { %v13_v33 = vpop.permute.xlu0 %12  }
  0x7d   :  { %v29_v34 = vpop.permute.xlu1 %28   ;;  %260 = vst.msk [vmem:[%s654_s1 + $0x1] sm:$0x1] %vm7_vm0, %v13_v33   ;;  %261 = vst.msk [vmem:[%s654_s1 + $0x20] sm:$0x2] %vm7_vm0, %v13_v33  }
  0x7e   :  { %264 = vst.msk [vmem:[%s654_s1 + $0x3] sm:$0x1] %vm7_vm0, %v29_v34   ;;  %265 = vst.msk [vmem:[%s654_s1 + $0x22] sm:$0x2] %vm7_vm0, %v29_v34  }
  0x80   :  { %v21_v35 = vpop.permute.xlu0 %20  }
  0x81   :  { %v37_v36 = vpop.permute.xlu1 %36   ;;  %262 = vst.msk [vmem:[%s654_s1 + $0x2] sm:$0x1] %vm7_vm0, %v21_v35   ;;  %263 = vst.msk [vmem:[%s654_s1 + $0x21] sm:$0x2] %vm7_vm0, %v21_v35  }
  0x82   :  { %266 = vst.msk [vmem:[%s654_s1 + $0x4] sm:$0x1] %vm7_vm0, %v37_v36   ;;  %267 = vst.msk [vmem:[%s654_s1 + $0x23] sm:$0x2] %vm7_vm0, %v37_v36  }
  0x84   :  { %v45_v37 = vpop.permute.xlu0 %44  }
  0x85   :  { %v53_v38 = vpop.permute.xlu1 %52   ;;  %268 = vst.msk [vmem:[%s654_s1 + $0x5] sm:$0x1] %vm7_vm0, %v45_v37   ;;  %269 = vst.msk [vmem:[%s654_s1 + $0x24] sm:$0x2] %vm7_vm0, %v45_v37  }
  0x86   :  { %270 = vst.msk [vmem:[%s654_s1 + $0x6] sm:$0x1] %vm7_vm0, %v53_v38   ;;  %271 = vst.msk [vmem:[%s654_s1 + $0x25] sm:$0x2] %vm7_vm0, %v53_v38  }
  0x88   :  { %v61_v39 = vpop.permute.xlu0 %60  }
  0x89   :  { %v69_v40 = vpop.permute.xlu1 %68   ;;  %272 = vst.msk [vmem:[%s654_s1 + $0x7] sm:$0x1] %vm7_vm0, %v61_v39   ;;  %273 = vst.msk [vmem:[%s654_s1 + $0x26] sm:$0x2] %vm7_vm0, %v61_v39  }
  0x8a   :  { %274 = vst.msk [vmem:[%s654_s1 + $0x8] sm:$0x1] %vm7_vm0, %v69_v40   ;;  %275 = vst.msk [vmem:[%s654_s1 + $0x27] sm:$0x2] %vm7_vm0, %v69_v40  }
  0x8c   :  { %v77_v41 = vpop.permute.xlu0 %76  }
  0x8d   :  { %v85_v42 = vpop.permute.xlu1 %84   ;;  %276 = vst.msk [vmem:[%s654_s1 + $0x9] sm:$0x1] %vm7_vm0, %v77_v41   ;;  %277 = vst.msk [vmem:[%s654_s1 + $0x28] sm:$0x2] %vm7_vm0, %v77_v41  }
  0x8e   :  { %278 = vst.msk [vmem:[%s654_s1 + $0xa] sm:$0x1] %vm7_vm0, %v85_v42   ;;  %279 = vst.msk [vmem:[%s654_s1 + $0x29] sm:$0x2] %vm7_vm0, %v85_v42  }
  0x90   :  { %v93_v43 = vpop.permute.xlu0 %92  }
  0x91   :  { %v101_v44 = vpop.permute.xlu1 %100   ;;  %280 = vst.msk [vmem:[%s654_s1 + $0xb] sm:$0x1] %vm7_vm0, %v93_v43   ;;  %281 = vst.msk [vmem:[%s654_s1 + $0x2a] sm:$0x2] %vm7_vm0, %v93_v43  }
  0x92   :  { %282 = vst.msk [vmem:[%s654_s1 + $0xc] sm:$0x1] %vm7_vm0, %v101_v44   ;;  %283 = vst.msk [vmem:[%s654_s1 + $0x2b] sm:$0x2] %vm7_vm0, %v101_v44  }
  0x94   :  { %v109_v45 = vpop.permute.xlu0 %108  }
  0x95   :  { %v117_v46 = vpop.permute.xlu1 %116   ;;  %284 = vst.msk [vmem:[%s654_s1 + $0xd] sm:$0x1] %vm7_vm0, %v109_v45   ;;  %285 = vst.msk [vmem:[%s654_s1 + $0x2c] sm:$0x2] %vm7_vm0, %v109_v45  }
  0x96   :  { %286 = vst.msk [vmem:[%s654_s1 + $0xe] sm:$0x1] %vm7_vm0, %v117_v46   ;;  %287 = vst.msk [vmem:[%s654_s1 + $0x2d] sm:$0x2] %vm7_vm0, %v117_v46  }
  0x98   :  { %v125_v47 = vpop.permute.xlu0 %124  }
  0x99   :  { %v133_v48 = vpop.permute.xlu1 %132   ;;  %288 = vst.msk [vmem:[%s654_s1 + $0xf] sm:$0x1] %vm7_vm0, %v125_v47   ;;  %289 = vst.msk [vmem:[%s654_s1 + $0x2e] sm:$0x2] %vm7_vm0, %v125_v47  }
  0x9a   :  { %290 = vst.msk [vmem:[%s654_s1 + $0x10] sm:$0x1] %vm7_vm0, %v133_v48   ;;  %291 = vst.msk [vmem:[%s654_s1 + $0x2f] sm:$0x2] %vm7_vm0, %v133_v48  }
  0x9c   :  { %v141_v49 = vpop.permute.xlu0 %140  }
  0x9d   :  { %v149_v50 = vpop.permute.xlu1 %148   ;;  %292 = vst.msk [vmem:[%s654_s1 + $0x11] sm:$0x1] %vm7_vm0, %v141_v49   ;;  %293 = vst.msk [vmem:[%s654_s1 + $0x30] sm:$0x2] %vm7_vm0, %v141_v49  }
  0x9e   :  { %294 = vst.msk [vmem:[%s654_s1 + $0x12] sm:$0x1] %vm7_vm0, %v149_v50   ;;  %295 = vst.msk [vmem:[%s654_s1 + $0x31] sm:$0x2] %vm7_vm0, %v149_v50  }
  0xa0   :  { %v157_v51 = vpop.permute.xlu0 %156  }
  0xa1   :  { %v165_v52 = vpop.permute.xlu1 %164   ;;  %296 = vst.msk [vmem:[%s654_s1 + $0x13] sm:$0x1] %vm7_vm0, %v157_v51   ;;  %297 = vst.msk [vmem:[%s654_s1 + $0x32] sm:$0x2] %vm7_vm0, %v157_v51  }
  0xa2   :  { %298 = vst.msk [vmem:[%s654_s1 + $0x14] sm:$0x1] %vm7_vm0, %v165_v52   ;;  %299 = vst.msk [vmem:[%s654_s1 + $0x33] sm:$0x2] %vm7_vm0, %v165_v52  }
  0xa4   :  { %v173_v53 = vpop.permute.xlu0 %172  }
  0xa5   :  { %v181_v54 = vpop.permute.xlu1 %180   ;;  %300 = vst.msk [vmem:[%s654_s1 + $0x15] sm:$0x1] %vm7_vm0, %v173_v53   ;;  %301 = vst.msk [vmem:[%s654_s1 + $0x34] sm:$0x2] %vm7_vm0, %v173_v53  }
  0xa6   :  { %302 = vst.msk [vmem:[%s654_s1 + $0x16] sm:$0x1] %vm7_vm0, %v181_v54   ;;  %303 = vst.msk [vmem:[%s654_s1 + $0x35] sm:$0x2] %vm7_vm0, %v181_v54  }
  0xa8   :  { %v189_v55 = vpop.permute.xlu0 %188  }
  0xa9   :  { %v197_v56 = vpop.permute.xlu1 %196   ;;  %304 = vst.msk [vmem:[%s654_s1 + $0x17] sm:$0x1] %vm7_vm0, %v189_v55   ;;  %305 = vst.msk [vmem:[%s654_s1 + $0x36] sm:$0x2] %vm7_vm0, %v189_v55  }
  0xaa   :  { %306 = vst.msk [vmem:[%s654_s1 + $0x18] sm:$0x1] %vm7_vm0, %v197_v56   ;;  %307 = vst.msk [vmem:[%s654_s1 + $0x37] sm:$0x2] %vm7_vm0, %v197_v56  }
  0xac   :  { %v205_v57 = vpop.permute.xlu0 %204  }
  0xad   :  { %v213_v58 = vpop.permute.xlu1 %212   ;;  %308 = vst.msk [vmem:[%s654_s1 + $0x19] sm:$0x1] %vm7_vm0, %v205_v57   ;;  %309 = vst.msk [vmem:[%s654_s1 + $0x38] sm:$0x2] %vm7_vm0, %v205_v57  }
  0xae   :  { %310 = vst.msk [vmem:[%s654_s1 + $0x1a] sm:$0x1] %vm7_vm0, %v213_v58   ;;  %311 = vst.msk [vmem:[%s654_s1 + $0x39] sm:$0x2] %vm7_vm0, %v213_v58  }
  0xb0   :  { %v221_v59 = vpop.permute.xlu0 %220  }
  0xb1   :  { %v229_v60 = vpop.permute.xlu1 %228   ;;  %312 = vst.msk [vmem:[%s654_s1 + $0x1b] sm:$0x1] %vm7_vm0, %v221_v59   ;;  %313 = vst.msk [vmem:[%s654_s1 + $0x3a] sm:$0x2] %vm7_vm0, %v221_v59  }
  0xb2   :  { %314 = vst.msk [vmem:[%s654_s1 + $0x1c] sm:$0x1] %vm7_vm0, %v229_v60   ;;  %315 = vst.msk [vmem:[%s654_s1 + $0x3b] sm:$0x2] %vm7_vm0, %v229_v60  }
  0xb4   :  { %v237_v61 = vpop.permute.xlu0 %236  }
  0xb5   :  { %v245_v62 = vpop.permute.xlu1 %244   ;;  %316 = vst.msk [vmem:[%s654_s1 + $0x1d] sm:$0x1] %vm7_vm0, %v237_v61   ;;  %317 = vst.msk [vmem:[%s654_s1 + $0x3c] sm:$0x2] %vm7_vm0, %v237_v61  }
  0xb6   :  { %318 = vst.msk [vmem:[%s654_s1 + $0x1e] sm:$0x1] %vm7_vm0, %v245_v62   ;;  %319 = vst.msk [vmem:[%s654_s1 + $0x3d] sm:$0x2] %vm7_vm0, %v245_v62  }
  0xb8   :  { %v253_v63 = vpop.permute.xlu0 %252  }
  0xb9   :  { %320 = vst.msk [vmem:[%s654_s1 + $0x1f] sm:$0x1] %vm7_vm0, %v253_v63   ;;  %321 = vst.msk [vmem:[%s654_s1 + $0x3e] sm:$0x2] %vm7_vm0, %v253_v63  }

// kernel: _lambda_.7
= control target key start
LH: loop header
LB: loop body
LE: loop exit
PB: predicated region body
PF: predicated region fallthrough
CT: control target
= control target key end

     0   :  { %s991_s21 = smov 0   ;;  %s993_s22 = smov 0   ;;  %s1081_s0 = inlined_call_operand.vmem [shape: bf16[2,64,128], index: 0, kind: input, shape index: {}]   ;;  %s1082_s1 = inlined_call_operand.vmem [shape: f32[2,1,128], index: 1, kind: input, shape index: {}]   ;;  %s1083_s2 = inlined_call_operand.vmem [shape: f32[2,1,128], index: 2, kind: input, shape index: {}]   ;;  %s1084_s3 = inlined_call_operand.vmem [shape: bf16[128,128], index: 3, kind: input, shape index: {}]   ;;  %s1085_s4 = inlined_call_operand.vmem [shape: bf16[2,64,128], index: 4, kind: output, shape index: {0}]   ;;  %s1086_s5 = inlined_call_operand.vmem [shape: f32[2,1,128], index: 5, kind: output, shape index: {1}]   ;;  %s1087_s6 = inlined_call_operand.vmem [shape: f32[2,1,128], index: 6, kind: output, shape index: {2}]  }
   0x1   :  { %s995_s23 = smov 0  }
   0x2 LB: > { %s29_s24 = sadd.s32 1, %s949_s22  ;;  %p769_p0 = scmp.ge.s32.totalorder %s953_s23, 1  ;;  %s953_s23 = sphi %s995_s23, %s17_s23   ;;  %s949_s22 = sphi %s993_s22, %s1089_s22   ;;  %s945_s21 = sphi %s991_s21, %s1088_s21  }
   0x3   : > { %p31_p1 = scmp.ge.s32.totalorder %s29_s24, 2  ;;  %p254_p2 = scmp.lt.s32.totalorder %s953_s23, 3 }
   0x5   : > { %s1091_s24 = smov (%p31_p1, %s29_s24), 0  ;;  %p255_p3 = pnand %p769_p0, %p254_p2 }
   0x6   : > { %v923_v0 = vld [vmem:[%s1084_s3] sm:$0xff] (!%p255_p3)   ;;  %p305_p4 = scmp.lt.s32.totalorder (!%p255_p3), %s945_s21, 1  ;;  %v924_v1 = vld [vmem:[%s1084_s3 + $0x8] sm:$0xff] (!%p255_p3)   ;;  %v925_v2 = vld [vmem:[%s1084_s3 + $0x10] sm:$0xff] (!%p255_p3)   ;;  %v955_v50 = vmov (!%p255_p3), 0.0  }
   0x7   : > { %258 = sbr.rel (%p255_p3) target bundleno = 286 (0x11e), region = 36  ;;  %858 = vmatprep.subr.bf16.mxu0 (!%p255_p3), %v923_v0  ;;  %882 = vmatprep.subr.bf16.mxu1 (!%p255_p3), %v923_v0  ;;  %v926_v3 = vld [vmem:[%s1084_s3 + $0x18] sm:$0xff] (!%p255_p3)   ;;  %v927_v16 = vld [vmem:[%s1084_s3 + $0x20] sm:$0xff] (!%p255_p3)   ;;  %v928_v29 = vld [vmem:[%s1084_s3 + $0x28] sm:$0xff] (!%p255_p3)  }
   0x8   : > { %859 = vmatpush3.bf16.msra.mxu0 (!%p255_p3), %v923_v0  ;;  %890 = vmatpush3.bf16.msra.mxu1 (!%p255_p3), %v923_v0  ;;  %v929_v38 = vld [vmem:[%s1084_s3 + $0x30] sm:$0xff] (!%p255_p3)   ;;  %v930_v43 = vld [vmem:[%s1084_s3 + $0x38] sm:$0xff] (!%p255_p3)  }
   0x9   : > { %860 = vmatprep.subr.bf16.mxu0 (!%p255_p3), %v924_v1  ;;  %883 = vmatprep.subr.bf16.mxu1 (!%p255_p3), %v924_v1 }
   0xc   : > { %861 = vmatpush3.bf16.msra.mxu0 (!%p255_p3), %v924_v1  ;;  %891 = vmatpush3.bf16.msra.mxu1 (!%p255_p3), %v924_v1 }
   0xd   : > { %862 = vmatprep.subr.bf16.mxu0 (!%p255_p3), %v925_v2  ;;  %884 = vmatprep.subr.bf16.mxu1 (!%p255_p3), %v925_v2 }
   0xe   : > { %s1093_s21 = smov (!%p305_p4, %s945_s21), 1 }
   0xf   : > { %s794_s7 = sshll.u32 %s1093_s21, 5  ;;  %s316_s13 = scalar_lea.vmem %s1082_s1, %s1093_s21 }
  0x10   : > { %s312_s10 = scalar_lea.vmem %s1081_s0, %s794_s7  ;;  %s319_s16 = scalar_lea.vmem %s1083_s2, %s1093_s21  ;;  %v774_v5 = vld [vmem:[%s316_s13] ss:$0 sm:$0xff]  ;;  %863 = vmatpush3.bf16.msra.mxu0 %v925_v2  ;;  %892 = vmatpush3.bf16.msra.mxu1 %v925_v2 }
  0x11   : > { %v805_v4 = vld [vmem:[%s312_s10] sm:$0xff]   ;;  %v841_v8 = vld [vmem:[%s312_s10 + $0x10] sm:$0xff]   ;;  %v840_v10 = vld [vmem:[%s312_s10 + $0x8] sm:$0xff]   ;;  %864 = vmatprep.subr.bf16.mxu0 %v926_v3  ;;  %885 = vmatprep.subr.bf16.mxu1 %v926_v3  ;;  %s1059_s13 = scalar_lea.vmem %s1087_s6, %s1093_s21 }
  0x12   : > { %v806_v6 = vunpack.c.l.bf16 %v805_v4  ;;  %v807_v7 = vunpack.c.h.bf16 %v805_v4  ;;  %v775_v9 = vld [vmem:[%s319_s16] ss:$0 sm:$0xff]  ;;  %v814_v11 = vunpack.c.l.bf16 %v841_v8  ;;  %v815_v12 = vunpack.c.h.bf16 %v841_v8  ;;  %v842_v15 = vld [vmem:[%s312_s10 + $0x18] sm:$0xff]   ;;  %s1053_s10 = scalar_lea.vmem %s1086_s5, %s1093_s21  ;;  %569 = vst [vmem:[%s1059_s13] sm:$0x1] %v955_v50  ;;  %s328_s16 = scalar_lea.vmem %s1085_s4, %s794_s7 }
  0x13   : > { %v810_v20 = vunpack.c.l.bf16 %v840_v10  ;;  %v811_v22 = vunpack.c.h.bf16 %v840_v10  ;;  %v818_v24 = vunpack.c.l.bf16 %v842_v15  ;;  %v819_v25 = vunpack.c.h.bf16 %v842_v15  ;;  %568 = vst [vmem:[%s1053_s10] sm:$0x1] %v955_v50 }
  0x14   : > { %v360_v13 = vmul.f32 %v806_v6, %v774_v5  ;;  %v361_v14 = vmul.f32 %v807_v7, %v774_v5  ;;  %v364_v17 = vmul.f32 %v814_v11, %v774_v5  ;;  %v365_v21 = vmul.f32 %v815_v12, %v774_v5  ;;  %865 = vmatpush3.bf16.msra.mxu0 %v926_v3 }
  0x15   : > { %893 = vmatpush3.bf16.msra.mxu1 %v926_v3  ;;  %866 = vmatprep.subr.bf16.mxu0 %v927_v16  ;;  %v362_v33 = vmul.f32 %v810_v20, %v774_v5  ;;  %v363_v34 = vmul.f32 %v811_v22, %v774_v5  ;;  %v366_v35 = vmul.f32 %v818_v24, %v774_v5 }
  0x16   : > { %v375_v18 = vadd.f32 %v775_v9, %v360_v13  ;;  %v376_v19 = vadd.f32 %v775_v9, %v361_v14  ;;  %v379_v23 = vadd.f32 %v775_v9, %v364_v17  ;;  %v380_v28 = vadd.f32 %v775_v9, %v365_v21  ;;  %886 = vmatprep.subr.bf16.mxu1 %v927_v16 }
  0x17   : > { %v367_v36 = vmul.f32 %v819_v25, %v774_v5  ;;  %v377_v39 = vadd.f32 %v775_v9, %v362_v33  ;;  %v378_v40 = vadd.f32 %v775_v9, %v363_v34  ;;  %v381_v41 = vadd.f32 %v775_v9, %v366_v35 }
  0x18   : > { %v383_v26 = vmax.f32 %v375_v18, 0.0  ;;  %v384_v27 = vmax.f32 %v376_v19, 0.0  ;;  %v387_v30 = vmax.f32 %v379_v23, 0.0  ;;  %v388_v32 = vmax.f32 %v380_v28, 0.0  ;;  %867 = vmatpush3.bf16.msra.mxu0 %v927_v16 }
  0x19   : > { %894 = vmatpush3.bf16.msra.mxu1 %v927_v16  ;;  %868 = vmatprep.subr.bf16.mxu0 %v928_v29  ;;  %v382_v42 = vadd.f32 %v775_v9, %v367_v36  ;;  %v385_v44 = vmax.f32 %v377_v39, 0.0  ;;  %v386_v45 = vmax.f32 %v378_v40, 0.0  ;;  %v389_v46 = vmax.f32 %v381_v41, 0.0  ;;  %v586_v33 = vld [vmem:[%s1059_s13] sm:$0x1] }
  0x1a   : > { %v391_v31 = vpack.c.bf16 %v384_v27, %v383_v26  ;;  %v393_v37 = vpack.c.bf16 %v388_v32, %v387_v30  ;;  %887 = vmatprep.subr.bf16.mxu1 %v928_v29  ;;  %v570_v30 = vld [vmem:[%s1053_s10] sm:$0x1] }
  0x1b   : > { %v390_v47 = vmax.f32 %v382_v42, 0.0  ;;  %v392_v48 = vpack.c.bf16 %v386_v45, %v385_v44 }
  0x1c   : > { %874 = vmatprep.mubr.bf16.mxu0 %v391_v31  ;;  %878 = vmatprep.mubr.bf16.mxu1 %v393_v37 }
  0x1d   : > { %869 = vmatpush3.bf16.msra.mxu0 %v928_v29  ;;  %895 = vmatpush3.bf16.msra.mxu1 %v928_v29  ;;  %v394_v49 = vpack.c.bf16 %v390_v47, %v389_v46 }
  0x1e   : > { %870 = vmatprep.subr.bf16.mxu0 %v929_v38  ;;  %888 = vmatprep.subr.bf16.mxu1 %v929_v38 }
  0x21   : > { %871 = vmatpush3.bf16.msra.mxu0 %v929_v38  ;;  %896 = vmatpush3.bf16.msra.mxu1 %v929_v38 }
  0x22   : > { %872 = vmatprep.subr.bf16.mxu0 %v930_v43  ;;  %889 = vmatprep.subr.bf16.mxu1 %v930_v43 }
  0x25   : > { %873 = vmatpush3.bf16.msra.mxu0 %v930_v43  ;;  %897 = vmatpush3.bf16.msra.mxu1 %v930_v43 }
  0x28   : > { %875 = vmatmul.mubr.bf16.vlgmr.msra.gmra.mrb[0].mxu0 %v392_v48  ;;  %879 = vmatmul.mubr.bf16.vlgmr.msra.gmra.mrb[0].mxu1 %v394_v49 }
  0xfb   : > { %v876_v51 = vpop.f32.mrb[0].mxu0  ;;  %v880_v52 = vpop.f32.mrb[0].mxu1 }
  0xfc   : > { %v493_v53 = vpop.f32.mrb[1].mxu0  ;;  %v509_v54 = vpop.f32.mrb[1].mxu1  ;;  %v589_v2 = vmul.f32 %v876_v51, %v876_v51  ;;  %v593_v14 = vmul.f32 %v880_v52, %v880_v52 }
  0xfd   : > { %v877_v55 = vpop.f32.mrb[2].mxu0  ;;  %v881_v56 = vpop.f32.mrb[2].mxu1  ;;  %v587_v57 = vmul.f32 %v493_v53, %v493_v53  ;;  %v591_v8 = vmul.f32 %v509_v54, %v509_v54 }
  0xfe   : > { %v828_v58 = vpack.c.bf16 %v877_v55, %v876_v51  ;;  %v496_v59 = vpop.f32.mrb[3].mxu0  ;;  %v838_v60 = vpack.c.bf16 %v881_v56, %v880_v52  ;;  %v512_v61 = vpop.f32.mrb[3].mxu1  ;;  %v590_v5 = vmul.f32 %v877_v55, %v877_v55  ;;  %v594_v17 = vmul.f32 %v881_v56, %v881_v56 }
  0xff   : > { %v823_v62 = vpack.c.bf16 %v496_v59, %v493_v53  ;;  %v571_v63 = vadd.f32 %v496_v59, %v493_v53  ;;  %v588_v0 = vmul.f32 %v496_v59, %v496_v59  ;;  %v833_v1 = vpack.c.bf16 %v512_v61, %v509_v54 }
 0x100   : > { %843 = vst [vmem:[%s328_s16 + $0x8] sm:$0xff] %v828_v58   ;;  %845 = vst [vmem:[%s328_s16 + $0x18] sm:$0xff] %v838_v60   ;;  %v592_v13 = vmul.f32 %v512_v61, %v512_v61 }
 0x101   : > { %824 = vst [vmem:[%s328_s16] sm:$0xff] %v823_v62   ;;  %v572_v3 = vadd.f32 %v876_v51, %v571_v63  ;;  %v595_v4 = vadd.f32 %v588_v0, %v587_v57  ;;  %844 = vst [vmem:[%s328_s16 + $0x10] sm:$0xff] %v833_v1  }
 0x103   : > { %v596_v6 = vadd.f32 %v595_v4, %v589_v2  ;;  %v573_v7 = vadd.f32 %v877_v55, %v572_v3 }
 0x105   : > { %v574_v9 = vadd.f32 %v573_v7, %v509_v54  ;;  %v597_v10 = vadd.f32 %v596_v6, %v590_v5 }
 0x107   : > { %v598_v11 = vadd.f32 %v597_v10, %v591_v8  ;;  %v575_v12 = vadd.f32 %v574_v9, %v512_v61 }
 0x109   : > { %v576_v15 = vadd.f32 %v880_v52, %v575_v12  ;;  %v599_v16 = vadd.f32 %v598_v11, %v592_v13 }
 0x10b   : > { %v577_v18 = vadd.f32 %v881_v56, %v576_v15  ;;  %v600_v19 = vadd.f32 %v599_v16, %v593_v14 }
 0x10d   : > { %v578_v20 = vrot.slane %v577_v18, 4  ;;  %v601_v21 = vadd.f32 %v600_v19, %v594_v17 }
 0x10f   : > { %v579_v22 = vadd.f32 %v578_v20, %v577_v18  ;;  %v602_v23 = vrot.slane %v601_v21, 4 }
 0x111   : > { %v580_v24 = vrot.slane %v579_v22, 2  ;;  %v603_v25 = vadd.f32 %v602_v23, %v601_v21 }
 0x113   : > { %v581_v26 = vadd.f32 %v580_v24, %v579_v22  ;;  %v604_v27 = vrot.slane %v603_v25, 2 }
 0x115   : > { %v582_v28 = vrot.slane %v581_v26, 1  ;;  %v605_v29 = vadd.f32 %v604_v27, %v603_v25 }
 0x117   : > { %v583_v31 = vadd.f32 %v582_v28, %v581_v26  ;;  %v606_v32 = vrot.slane %v605_v29, 1 }
 0x119   : > { %v584_v34 = vadd.f32 %v583_v31, %v570_v30  ;;  %v607_v35 = vadd.f32 %v606_v32, %v605_v29 }
 0x11b   : > { %585 = vst [vmem:[%s1053_s10] sm:$0x1] %v584_v34  ;;  %v608_v36 = vadd.f32 %v607_v35, %v586_v33 }
 0x11d   : > { %609 = vst [vmem:[%s1059_s13] sm:$0x1] %v608_v36 }
 0x11e PF: > { %s17_s23 = sadd.s32 1, %s953_s23   ;;  %s1088_s21 = smov %s949_s22 }
 0x11f   : > { %p14_p5 = scmp.ge.s32.totalorder %s17_s23, 4   ;;  %s1089_s22 = smov %s1091_s24 }
 0x121   :  { %16 = sbr.rel (!%p14_p5) target bundleno = 2 (0x2), region = 100 }

// kernel: _lambda_.6
= control target key start
LH: loop header
LB: loop body
LE: loop exit
PB: predicated region body
PF: predicated region fallthrough
CT: control target
= control target key end

     0   :  { %s2966_s15 = smov 0   ;;  %s3405_s0 = inlined_call_operand.vmem [shape: bf16[8,9,9,128], index: 0, kind: input, shape index: {}]   ;;  %s3406_s1 = inlined_call_operand.vmem [shape: bf16[9,128,128], index: 1, kind: input, shape index: {}]   ;;  %s3407_s2 = inlined_call_operand.vmem [shape: bf16[2,64,128], index: 2, kind: output, shape index: {0}]   ;;  %s3408_s3 = inlined_call_operand.vmem [shape: f32[2,1,128], index: 3, kind: output, shape index: {1}]   ;;  %s3409_s4 = inlined_call_operand.vmem [shape: f32[2,1,128], index: 4, kind: output, shape index: {2}]  }
   0x1 LB: > { %s2972_s16 = sadd.s32 4294967295, %s2939_s15   ;;  %p2100_p0 = scmp.ge.s32.totalorder %s2939_s15, 1  ;;  %s2939_s15 = sphi %s2966_s15, %s15_s15  }
   0x2   : > { %p169_p1 = scmp.lt.s32.totalorder %s2939_s15, 3 }
   0x4   : > { %p170_p2 = pnand %p2100_p0, %p169_p1 }
   0x5   : > { %v2837_v0 = vld [vmem:[%s3406_s1 + $0x180] sm:$0xff] (!%p170_p2)   ;;  %s2101_s19 = sshll.u32 (!%p170_p2), %s2972_s16, 2  ;;  %v2839_v2 = vld [vmem:[%s3406_s1 + $0x188] sm:$0xff] (!%p170_p2)   ;;  %v2841_v4 = vld [vmem:[%s3406_s1 + $0x190] sm:$0xff] (!%p170_p2)   ;;  %vm1203_vm0 = vsmask.f32 (!%p170_p2), 3328 }
   0x6   : > { %173 = sbr.rel (%p170_p2) target bundleno = 413 (0x19d), region = 28  ;;  %v2838_v1 = vld [vmem:[%s3406_s1 + $0x1c0] sm:$0xff] (!%p170_p2)   ;;  %p203_p3 = scmp.lt.s32.totalorder (!%p170_p2), %s2101_s19, 7  ;;  %2532 = vmatprep.subr.bf16.mxu1 (!%p170_p2), %v2837_v0  ;;  %v2840_v3 = vld [vmem:[%s3406_s1 + $0x1c8] sm:$0xff] (!%p170_p2)   ;;  %v2842_v5 = vld [vmem:[%s3406_s1 + $0x1d0] sm:$0xff] (!%p170_p2)  }
   0x7   : > { %2628 = vmatprep.subr.bf16.mxu0 (!%p170_p2), %v2838_v1  ;;  %2533 = vmatpush3.bf16.msra.mxu1 (!%p170_p2), %v2837_v0  ;;  %v2843_v6 = vld [vmem:[%s3406_s1 + $0x198] sm:$0xff] (!%p170_p2)   ;;  %v2845_v8 = vld [vmem:[%s3406_s1 + $0x1a0] sm:$0xff] (!%p170_p2)   ;;  %v2847_v10 = vld [vmem:[%s3406_s1 + $0x1a8] sm:$0xff] (!%p170_p2)   ;;  %vm1204_vm1 = vsmask.f32 (!%p170_p2), 7440  ;;  %p209_p4 = scmp.lt.s32.totalorder (!%p170_p2), %s2972_s16, 1 }
   0x8   : > { %2629 = vmatpush3.bf16.msra.mxu0 (!%p170_p2), %v2838_v1  ;;  %2534 = vmatprep.subr.bf16.mxu1 (!%p170_p2), %v2839_v2  ;;  %v2844_v7 = vld [vmem:[%s3406_s1 + $0x1d8] sm:$0xff] (!%p170_p2)   ;;  %v2846_v9 = vld [vmem:[%s3406_s1 + $0x1e0] sm:$0xff] (!%p170_p2)   ;;  %v2848_v13 = vld [vmem:[%s3406_s1 + $0x1e8] sm:$0xff] (!%p170_p2)  }
   0x9   : > { %2630 = vmatprep.subr.bf16.mxu0 (!%p170_p2), %v2840_v3  ;;  %v2849_v18 = vld [vmem:[%s3406_s1 + $0x1b0] sm:$0xff] (!%p170_p2)   ;;  %v2851_v22 = vld [vmem:[%s3406_s1 + $0x1b8] sm:$0xff] (!%p170_p2)   ;;  %v2856_v25 = vld [vmem:[%s3406_s1] sm:$0xff] (!%p170_p2)  }
   0xa   : > { %v2850_v21 = vld [vmem:[%s3406_s1 + $0x1f0] sm:$0xff] (!%p170_p2)   ;;  %v2852_v23 = vld [vmem:[%s3406_s1 + $0x1f8] sm:$0xff] (!%p170_p2)   ;;  %v2860_v28 = vld [vmem:[%s3406_s1 + $0x100] sm:$0xff] (!%p170_p2)  }
   0xb   : > { %2535 = vmatpush3.bf16.msra.mxu1 (!%p170_p2), %v2839_v2  ;;  %v2863_v31 = vld [vmem:[%s3406_s1 + $0x8] sm:$0xff] (!%p170_p2)   ;;  %v2865_v38 = vld [vmem:[%s3406_s1 + $0x10] sm:$0xff] (!%p170_p2)   ;;  %v2867_v50 = vld [vmem:[%s3406_s1 + $0x18] sm:$0xff] (!%p170_p2)  }
   0xc   : > { %2631 = vmatpush3.bf16.msra.mxu0 (!%p170_p2), %v2840_v3  ;;  %2536 = vmatprep.subr.bf16.mxu1 (!%p170_p2), %v2841_v4  ;;  %v2864_v34 = vld [vmem:[%s3406_s1 + $0x108] sm:$0xff] (!%p170_p2)   ;;  %v2866_v46 = vld [vmem:[%s3406_s1 + $0x110] sm:$0xff] (!%p170_p2)   ;;  %v2868_v52 = vld [vmem:[%s3406_s1 + $0x118] sm:$0xff] (!%p170_p2)  }
   0xd   : > { %s3413_s19 = smov (!%p203_p3, %s2101_s19), 7  ;;  %2632 = vmatprep.subr.bf16.mxu0 %v2842_v5  ;;  %v2869_v54 = vld [vmem:[%s3406_s1 + $0x20] sm:$0xff]   ;;  %v2871_v56 = vld [vmem:[%s3406_s1 + $0x28] sm:$0xff]   ;;  %v2874_v58 = vld [vmem:[%s3406_s1 + $0x30] sm:$0xff]   ;;  %s3415_s16 = smov (!%p209_p4, %s2972_s16), 1 }
   0xe   : > { %s2828_s8 = smul.u32 72, %s3413_s19  ;;  %v2870_v55 = vld [vmem:[%s3406_s1 + $0x120] sm:$0xff]   ;;  %v2872_v57 = vld [vmem:[%s3406_s1 + $0x128] sm:$0xff]   ;;  %v2876_v59 = vld [vmem:[%s3406_s1 + $0x130] sm:$0xff]   ;;  %s2392_s26 = sshll.u32 %s3415_s16, 5 }
   0xf   : > { %2537 = vmatpush3.bf16.msra.mxu1 %v2841_v4  ;;  %v2879_v60 = vld [vmem:[%s3406_s1 + $0x38] sm:$0xff]   ;;  %v2881_v62 = vld [vmem:[%s3406_s1 + $0xc0] sm:$0xff]   ;;  %vm3171_vm2 = vmor %vm1203_vm0, %vm1204_vm1  ;;  %s213_s29 = scalar_lea.vmem %s3407_s2, %s2392_s26  ;;  %s216_s6 = scalar_lea.vmem %s3408_s3, %s3415_s16 }
  0x10   : > { %2633 = vmatpush3.bf16.msra.mxu0 %v2842_v5  ;;  %2538 = vmatprep.subr.bf16.mxu1 %v2843_v6  ;;  %s3010_s17 = scalar_lea.vmem %s3405_s0, %s2828_s8  ;;  %v2880_v61 = vld [vmem:[%s3406_s1 + $0x138] sm:$0xff]   ;;  %v2883_v63 = vld [vmem:[%s3406_s1 + $0x80] sm:$0xff]   ;;  %s219_s9 = scalar_lea.vmem %s3409_s4, %s3415_s16 }
  0x11   : > { %2634 = vmatprep.subr.bf16.mxu0 %v2844_v7  ;;  %v3016_v11 = vld [vmem:[%s3010_s17 + $0x8] sm:$0xf]  ;;  %v3019_v12 = vld [vmem:[%s3010_s17 + $0x10] sm:$0xf]  ;;  %v3030_v16 = vld [vmem:[%s3010_s17 + $0x58] sm:$0xf] }
  0x12   : > { %v2121_v14 = vcombine.low %v3016_v11, %v3019_v12  ;;  %v3027_v15 = vld [vmem:[%s3010_s17 + $0x50] sm:$0xf]  ;;  %v3033_v17 = vld [vmem:[%s3010_s17 + $0x60] sm:$0xf]  ;;  %v3052_v24 = vld [vmem:[%s3010_s17 + $0x18] sm:$0xf] }
  0x13   : > { %2539 = vmatpush3.bf16.msra.mxu1 %v2843_v6  ;;  %v2207_v19 = vcombine.low %v3030_v16, %v3033_v17  ;;  %v2234_v20 = vcombine.low %v3027_v15, %v3030_v16  ;;  %v3058_v26 = vld [vmem:[%s3010_s17 + $0x20] sm:$0xf]  ;;  %v3061_v27 = vld [vmem:[%s3010_s17 + $0x68] sm:$0xf]  ;;  %v3077_v33 = vld [vmem:[%s3010_s17 + $0x30] sm:$0xf]  ;;  %v2134_v5 = vcombine.low %v3019_v12, %v3052_v24 }
  0x14   : > { %2635 = vmatpush3.bf16.msra.mxu0 %v2844_v7  ;;  %2540 = vmatprep.subr.bf16.mxu1 %v2845_v8  ;;  %v2122_v29 = vcombine.low %v3052_v24, %v3058_v26  ;;  %v2235_v30 = vcombine.low %v3033_v17, %v3061_v27  ;;  %v3074_v32 = vld [vmem:[%s3010_s17 + $0x28] sm:$0xf]  ;;  %v3085_v36 = vld [vmem:[%s3010_s17 + $0x70] sm:$0xf]  ;;  %v3088_v37 = vld [vmem:[%s3010_s17 + $0x78] sm:$0xf] }
  0x15   : > { %2636 = vmatprep.subr.bf16.mxu0 %v2846_v9  ;;  %2548 = vmatprep.mubr.bf16.mxu1 %v2121_v14  ;;  %v2123_v35 = vcombine.low %v3074_v32, %v3077_v33  ;;  %v2236_v39 = vcombine.low %v3085_v36, %v3088_v37  ;;  %v2208_v40 = vcombine.low %v3061_v27, %v3085_v36  ;;  %v3098_v41 = vld [vmem:[%s3010_s17 + $0x38] sm:$0xf]  ;;  %v229_v42 = vld [vmem:[%s3010_s17 + $0x40] sm:$0xf]  ;;  %v2189_v44 = vld [vmem:[%s3010_s17 + $0x88] sm:$0xf] }
  0x16   : > { %2644 = vmatprep.mubr.bf16.mxu0 %v2234_v20  ;;  %v3102_v43 = vld [vmem:[%s3010_s17 + $0x80] sm:$0xf]  ;;  %v2124_v48 = vcombine.low %v3098_v41, %v229_v42  ;;  %v1186_v1 = vld [vmem:[%s3010_s17 + $0x4] sm:$0x1]  ;;  %v1187_v2 = vld [vmem:[%s3010_s17 + $0x8] sm:$0xf] }
  0x17   : > { %2541 = vmatpush3.bf16.msra.mxu1 %v2845_v8  ;;  %v2209_v45 = vcombine.low %v3088_v37, %v3102_v43  ;;  %v221_v47 = vld [vmem:[%s3010_s17] sm:$0xf]  ;;  %v2237_v49 = vcombine.low %v3102_v43, %v2189_v44  ;;  %v2884_v3 = vld [vmem:[%s3010_s17 + $0xe8] ss:$8 sps:$4 sm:$0xff]   ;;  %v1188_v4 = vld [vmem:[%s3010_s17 + $0xc] sm:$0x1] }
  0x18   : > { %2637 = vmatpush3.bf16.msra.mxu0 %v2846_v9  ;;  %2542 = vmatprep.subr.bf16.mxu1 %v2847_v10  ;;  %v2133_v51 = vcombine.low %v221_v47, %v3016_v11  ;;  %v2882_v53 = vld [vmem:[%s3010_s17 + $0xd8] ss:$8 sps:$4 sm:$0xff]   ;;  %v1221_v8 = vshrl.u32 %v1187_v2, 16  ;;  %v1216_v9 = vshll.u32 %v1186_v1, 16  ;;  %v1230_v11 = vshll.u32 %v1188_v4, 16  ;;  %v2886_v12 = vld [vmem:[%s3406_s1 + $0x88] sm:$0xff]  }
  0x19   : > { %2638 = vmatprep.subr.bf16.mxu0 %v2848_v13  ;;  %v1185_v0 = vld [vmem:[%s3010_s17] sm:$0xf]  ;;  %v2900_v42 = vld [vmem:[%s3010_s17 + $0x108] ss:$8 sps:$4 sm:$0xff]   ;;  %v1191_v44 = vld [vmem:[%s3010_s17 + $0x18] sm:$0xf] }
  0x1a   : > { %v1207_v6 = vshrl.u32 %v1185_v0, 16  ;;  %v1210_v7 = vshll.u32 %v1185_v0, 16  ;;  %v1223_v20 = vrot.slane %v1221_v8, 4  ;;  %v2903_v47 = vld [vmem:[%s3010_s17 + $0x90] ss:$8 sps:$4 sm:$0xff]   ;;  %v2930_v37 = vld [vmem:[%s3406_s1 + $0x168] sm:$0xff]  }
  0x1b   : > { %2543 = vmatpush3.bf16.msra.mxu1 %v2847_v10  ;;  %v1224_v10 = vshll.u32 %v1187_v2, 16  ;;  %v1193_v1 = vld [vmem:[%s3010_s17 + $0x20] sm:$0xf]  ;;  %v1195_v2 = vld [vmem:[%s3010_s17 + $0x28] sm:$0xf]  ;;  %v2927_v16 = vld [vmem:[%s3406_s1 + $0x150] sm:$0xff]  }
  0x1c   : > { %2639 = vmatpush3.bf16.msra.mxu0 %v2848_v13  ;;  %2544 = vmatprep.subr.bf16.mxu1 %v2849_v18  ;;  %v2885_v13 = vld [vmem:[%s3406_s1 + $0xc8] sm:$0xff]   ;;  %v1209_v14 = vrot.slane %v1207_v6, 4  ;;  %v1263_v6 = vshrl.u32 %v1193_v1, 16  ;;  %v1277_v8 = vshrl.u32 %v1195_v2, 16  ;;  %v2928_v27 = vld [vmem:[%s3406_s1 + $0x158] sm:$0xff]  }
  0x1d   : > { %2640 = vmatprep.subr.bf16.mxu0 %v2850_v21  ;;  %v2350_v36 = vld [vmem:[%s3010_s17 + $0xc0] sm:$0xf]  ;;  %v2351_v43 = vld [vmem:[%s3010_s17 + $0xc4] sm:$0x1] }
  0x1f   : > { %2545 = vmatpush3.bf16.msra.mxu1 %v2849_v18  ;;  %v1212_v18 = vrot.slane %v1210_v7, 5  ;;  %v1266_v7 = vshll.u32 %v1193_v1, 16 }
  0x20   : > { %2641 = vmatpush3.bf16.msra.mxu0 %v2850_v21  ;;  %2546 = vmatprep.subr.bf16.mxu1 %v2851_v22  ;;  %v2135_v21 = vcombine.low %v3058_v26, %v3074_v32  ;;  %v2887_v26 = vld [vmem:[%s3406_s1 + $0xd0] sm:$0xff]  }
  0x21   : > { %2642 = vmatprep.subr.bf16.mxu0 %v2852_v23  ;;  %v1213_v24 = vor.u32 %v1212_v18, %v1209_v14  ;;  %v2888_v32 = vld [vmem:[%s3406_s1 + $0x90] sm:$0xff]   ;;  %v1268_v14 = vrot.slane %v1266_v7, 5  ;;  %v1279_v18 = vrot.slane %v1277_v8, 4 }
  0x23   : > { %2547 = vmatpush3.bf16.msra.mxu1 %v2851_v22  ;;  %v1226_v22 = vrot.slane %v1224_v10, 5  ;;  %v2896_v10 = vld [vmem:[%s3406_s1 + $0xf0] sm:$0xff]  }
  0x24   : > { %2643 = vmatpush3.bf16.msra.mxu0 %v2852_v23  ;;  %2556 = vmatprep.subr.bf16.mxu1 %v2856_v25  ;;  %v2897_v23 = vld [vmem:[%s3010_s17 + $0xf8] ss:$8 sps:$4 sm:$0xff]  }
  0x25   : > { %2652 = vmatprep.subr.bf16.mxu0 %v2860_v28 }
  0x26   : > { %2549 = vmatmul.mubr.bf16.vlgmr.msra.gmra.mrb[0].mxu1 %v2122_v29  ;;  %v1232_v29 = vrot.slane %v1230_v11, 5  ;;  %v1196_v11 = vld [vmem:[%s3010_s17 + $0x2c] sm:$0x1] }
  0x27   : > { %2557 = vmatpush3.bf16.msra.mxu1 %v2856_v25  ;;  %2645 = vmatmul.mubr.bf16.vlgmr.msra.gmra.mrb[0].mxu0 %v2235_v30  ;;  %v1218_v25 = vrot.slane %v1216_v9, 5  ;;  %v1280_v9 = vshll.u32 %v1195_v2, 16  ;;  %v2908_v2 = vld [vmem:[%s3406_s1 + $0x208] sm:$0xff]  }
  0x28   : > { %2653 = vmatpush3.bf16.msra.mxu0 %v2860_v28  ;;  %2558 = vmatprep.subr.bf16.mxu1 %v2863_v31  ;;  %v1227_v28 = vor.u32 %v1226_v22, %v1223_v20  ;;  %v2898_v20 = vld [vmem:[%s3406_s1 + $0xb0] sm:$0xff]  }
  0x29   : > { %2654 = vmatprep.subr.bf16.mxu0 %v2864_v34  ;;  %2552 = vmatprep.mubr.bf16.mxu1 %v2123_v35  ;;  %v1189_v35 = vld [vmem:[%s3010_s17 + $0x10] sm:$0xf] }
  0x2a   : > { %2648 = vmatprep.mubr.bf16.mxu0 %v2236_v39  ;;  %v2136_v39 = vcombine.low %v3077_v33, %v3098_v41  ;;  %v1235_v33 = vshrl.u32 %v1189_v35, 16  ;;  %v1238_v41 = vshll.u32 %v1189_v35, 16  ;;  %v2902_v35 = vld [vmem:[%s3406_s1 + $0xb8] sm:$0xff]  }
  0x2b   : > { %2559 = vmatpush3.bf16.msra.mxu1 %v2863_v31  ;;  %v1214_v31 = vrot.slane %v1213_v24, 4 }
  0x2c   : > { %2655 = vmatpush3.bf16.msra.mxu0 %v2864_v34  ;;  %2560 = vmatprep.subr.bf16.mxu1 %v2865_v38  ;;  %v1228_v34 = vrot.slane %v1227_v28, 4 }
  0x2d   : > { %2656 = vmatprep.subr.bf16.mxu0 %v2866_v46 }
  0x2e   : > { %2553 = vmatmul.mubr.bf16.gmra.mrb[4].mxu1 %v2124_v48  ;;  %v1219_v48 = vsel %vm3171_vm2, %v1214_v31, %v1218_v25  ;;  %v1197_v25 = vld [vmem:[%s3010_s17 + $0x30] sm:$0xf] }
  0x2f   : > { %2561 = vmatpush3.bf16.msra.mxu1 %v2865_v38  ;;  %2649 = vmatmul.mubr.bf16.gmra.mrb[4].mxu0 %v2237_v49  ;;  %v2889_v38 = vld [vmem:[%s3406_s1 + $0xd8] sm:$0xff]   ;;  %v3194_v49 = vsel %vm3171_vm2, %v1228_v34, %v1232_v29  ;;  %v1286_v29 = vshll.u32 %v1196_v11, 16  ;;  %v1291_v31 = vshrl.u32 %v1197_v25, 16  ;;  %v2909_v11 = vld [vmem:[%s3406_s1 + $0x50] sm:$0xff]  }
  0x30   : > { %2657 = vmatpush3.bf16.msra.mxu0 %v2866_v46  ;;  %2562 = vmatprep.subr.bf16.mxu1 %v2867_v50  ;;  %v2890_v46 = vld [vmem:[%s3406_s1 + $0x98] sm:$0xff]  }
  0x31   : > { %2658 = vmatprep.subr.bf16.mxu0 %v2868_v52  ;;  %2572 = vmatprep.mubr.bf16.mxu1 %v2133_v51  ;;  %v1252_v51 = vshll.u32 %v1191_v44, 16  ;;  %v2901_v34 = vld [vmem:[%s3406_s1 + $0xf8] sm:$0xff]  }
  0x32   : > { %2668 = vmatprep.mubr.bf16.mxu0 %v2882_v53  ;;  %v2298_v53 = vcombine.low %v1219_v48, %v3194_v49 }
  0x33   : > { %2563 = vmatpush3.bf16.msra.mxu1 %v2867_v50  ;;  %v1249_v50 = vshrl.u32 %v1191_v44, 16 }
  0x34   : > { %2659 = vmatpush3.bf16.msra.mxu0 %v2868_v52  ;;  %2564 = vmatprep.subr.bf16.mxu1 %v2869_v54  ;;  %v2891_v52 = vld [vmem:[%s3406_s1 + $0xe0] sm:$0xff]  }
  0x35   : > { %2660 = vmatprep.subr.bf16.mxu0 %v2870_v55 }
  0x37   : > { %2565 = vmatpush3.bf16.msra.mxu1 %v2869_v54  ;;  %v2892_v54 = vld [vmem:[%s3406_s1 + $0xa0] sm:$0xff]  }
  0x38   : > { %2661 = vmatpush3.bf16.msra.mxu0 %v2870_v55  ;;  %2566 = vmatprep.subr.bf16.mxu1 %v2871_v56  ;;  %v1190_v55 = vld [vmem:[%s3010_s17 + $0x14] sm:$0x1] }
  0x39   : > { %2662 = vmatprep.subr.bf16.mxu0 %v2872_v57 }
  0x3b   : > { %2567 = vmatpush3.bf16.msra.mxu1 %v2871_v56  ;;  %v1192_v56 = vld [vmem:[%s3010_s17 + $0x1c] sm:$0x1] }
  0x3c   : > { %2663 = vmatpush3.bf16.msra.mxu0 %v2872_v57  ;;  %2568 = vmatprep.subr.bf16.mxu1 %v2874_v58  ;;  %v1237_v57 = vrot.slane %v1235_v33, 4  ;;  %v1258_v0 = vshll.u32 %v1192_v56, 16  ;;  %v1200_v33 = vld [vmem:[%s3010_s17 + $0x3c] sm:$0x1] }
  0x3d   : > { %2664 = vmatprep.subr.bf16.mxu0 %v2876_v59 }
  0x3e   : > { %v1260_v24 = vrot.slane %v1258_v0, 5  ;;  %v2907_v0 = vld [vmem:[%s3406_s1 + $0x48] sm:$0xff]  }
  0x3f   : > { %2569 = vmatpush3.bf16.msra.mxu1 %v2874_v58  ;;  %v1240_v58 = vrot.slane %v1238_v41, 5 }
  0x40   : > { %2665 = vmatpush3.bf16.msra.mxu0 %v2876_v59  ;;  %2570 = vmatprep.subr.bf16.mxu1 %v2879_v60  ;;  %v1251_v59 = vrot.slane %v1249_v50, 4 }
  0x41   : > { %2666 = vmatprep.subr.bf16.mxu0 %v2880_v61 }
  0x43   : > { %2571 = vmatpush3.bf16.msra.mxu1 %v2879_v60  ;;  %v1254_v60 = vrot.slane %v1252_v51, 5  ;;  %v2904_v51 = vld [vmem:[%s3406_s1 + $0x40] sm:$0xff]  }
  0x44   : > { %2667 = vmatpush3.bf16.msra.mxu0 %v2880_v61  ;;  %2580 = vmatprep.subr.bf16.mxu1 %v2881_v62  ;;  %v2893_v61 = vld [vmem:[%s3406_s1 + $0xe8] sm:$0xff]  }
  0x45   : > { %2676 = vmatprep.subr.bf16.mxu0 %v2883_v63  ;;  %v1255_v4 = vor.u32 %v1254_v60, %v1251_v59 }
  0x46   : > { %2573 = vmatmul.mubr.bf16.vlgmr.msra.gmra.mrb[0].mxu1 %v2134_v5  ;;  %v1194_v5 = vld [vmem:[%s3010_s17 + $0x24] sm:$0x1] }
  0x47   : > { %2581 = vmatpush3.bf16.msra.mxu1 %v2881_v62  ;;  %2669 = vmatmul.mubr.bf16.vlgmr.msra.gmra.mrb[0].mxu0 %v2884_v3  ;;  %v1241_v62 = vor.u32 %v1240_v58, %v1237_v57  ;;  %v2894_v3 = vld [vmem:[%s3406_s1 + $0xa8] sm:$0xff]   ;;  %v1272_v28 = vshll.u32 %v1194_v5, 16 }
  0x48   : > { %2677 = vmatpush3.bf16.msra.mxu0 %v2883_v63  ;;  %2582 = vmatprep.subr.bf16.mxu1 %v2885_v13  ;;  %v1244_v63 = vshll.u32 %v1190_v55, 16 }
  0x49   : > { %2678 = vmatprep.subr.bf16.mxu0 %v2886_v12  ;;  %2576 = vmatprep.mubr.bf16.mxu1 %v2135_v21  ;;  %v1242_v21 = vrot.slane %v1241_v62, 4  ;;  %v2905_v62 = vld [vmem:[%s3406_s1 + $0x200] sm:$0xff]  }
  0x4a   : > { %2672 = vmatprep.mubr.bf16.mxu0 %v2897_v23  ;;  %v1246_v22 = vrot.slane %v1244_v63, 5  ;;  %v1256_v23 = vrot.slane %v1255_v4, 4  ;;  %v2906_v63 = vld [vmem:[%s3010_s17 + $0xa0] ss:$8 sps:$4 sm:$0xff]  }
  0x4b   : > { %2583 = vmatpush3.bf16.msra.mxu1 %v2885_v13  ;;  %v1265_v13 = vrot.slane %v1263_v6, 4 }
  0x4c   : > { %2679 = vmatpush3.bf16.msra.mxu0 %v2886_v12  ;;  %2584 = vmatprep.subr.bf16.mxu1 %v2887_v26  ;;  %v1282_v12 = vrot.slane %v1280_v9, 5  ;;  %v3238_v55 = vsel %vm3171_vm2, %v1256_v23, %v1260_v24  ;;  %v2917_v9 = vld [vmem:[%s3010_s17 + $0xb0] ss:$8 sps:$4 sm:$0xff]  }
  0x4d   : > { %2680 = vmatprep.subr.bf16.mxu0 %v2888_v32  ;;  %v2912_v24 = vld [vmem:[%s3406_s1 + $0x218] sm:$0xff]  }
  0x4e   : > { %2577 = vmatmul.mubr.bf16.gmra.mrb[4].mxu1 %v2136_v39  ;;  %v1283_v39 = vor.u32 %v1282_v12, %v1279_v18  ;;  %v2910_v18 = vld [vmem:[%s3406_s1 + $0x210] sm:$0xff]   ;;  %v2918_v12 = vld [vmem:[%s3010_s17 + $0xc0] ss:$8 sps:$4 sm:$0xff]  }
  0x4f   : > { %2585 = vmatpush3.bf16.msra.mxu1 %v2887_v26  ;;  %2673 = vmatmul.mubr.bf16.gmra.mrb[4].mxu0 %v2900_v42  ;;  %v1199_v26 = vld [vmem:[%s3010_s17 + $0x38] sm:$0xf] }
  0x50   : > { %2681 = vmatpush3.bf16.msra.mxu0 %v2888_v32  ;;  %2586 = vmatprep.subr.bf16.mxu1 %v2889_v38  ;;  %v1294_v32 = vshll.u32 %v1197_v25, 16  ;;  %v1305_v42 = vshrl.u32 %v1199_v26, 16  ;;  %v1308_v44 = vshll.u32 %v1199_v26, 16  ;;  %v1284_v57 = vrot.slane %v1283_v39, 4  ;;  %v1201_v26 = vld [vmem:[%s3010_s17 + $0x40] sm:$0xf] }
  0x51   : > { %2682 = vmatprep.subr.bf16.mxu0 %v2890_v46  ;;  %2596 = vmatprep.mubr.bf16.mxu1 %v2903_v47  ;;  %v1293_v47 = vrot.slane %v1291_v31, 4  ;;  %v2919_v31 = vld [vmem:[%s3406_s1 + $0x70] sm:$0xff]  }
  0x52   : > { %2692 = vmatprep.mubr.bf16.mxu0 %v2298_v53  ;;  %v1296_v48 = vrot.slane %v1294_v32, 5  ;;  %v1307_v41 = vrot.slane %v1305_v42, 4  ;;  %v1310_v50 = vrot.slane %v1308_v44, 5  ;;  %v1288_v53 = vrot.slane %v1286_v29, 5  ;;  %v2916_v29 = vld [vmem:[%s3406_s1 + $0x228] sm:$0xff]   ;;  %v2920_v44 = vld [vmem:[%s3406_s1 + $0x230] sm:$0xff]  }
  0x53   : > { %2587 = vmatpush3.bf16.msra.mxu1 %v2889_v38  ;;  %v1269_v38 = vor.u32 %v1268_v14, %v1265_v13  ;;  %v2338_v32 = vld [vmem:[%s3010_s17 + $0x90] sm:$0xf]  ;;  %v2348_v42 = vld [vmem:[%s3010_s17 + $0xb8] sm:$0xf] }
  0x54   : > { %2683 = vmatpush3.bf16.msra.mxu0 %v2890_v46  ;;  %2588 = vmatprep.subr.bf16.mxu1 %v2891_v52  ;;  %v1198_v46 = vld [vmem:[%s3010_s17 + $0x34] sm:$0x1]  ;;  %v1297_v58 = vor.u32 %v1296_v48, %v1293_v47  ;;  %v1311_v60 = vor.u32 %v1310_v50, %v1307_v41  ;;  %v3257_v4 = vsel %vm3171_vm2, %v1284_v57, %v1288_v53  ;;  %v2346_v39 = vld [vmem:[%s3010_s17 + $0xb0] sm:$0xf]  ;;  %v1653_v47 = vshll.u32 %v2338_v32, 16  ;;  %v2921_v53 = vld [vmem:[%s3406_s1 + $0x78] sm:$0xff]  }
  0x55   : > { %2684 = vmatprep.subr.bf16.mxu0 %v2892_v54  ;;  %v1270_v56 = vrot.slane %v1269_v38, 4  ;;  %v1300_v59 = vshll.u32 %v1198_v46, 16  ;;  %v1476_v38 = vshll.u32 %v1201_v26, 16  ;;  %v1650_v46 = vshrl.u32 %v2338_v32, 16  ;;  %v2922_v57 = vld [vmem:[%s3406_s1 + $0x238] sm:$0xff]  }
  0x56   : > { %v1298_v5 = vrot.slane %v1297_v58, 4  ;;  %v1312_v7 = vrot.slane %v1311_v60, 4  ;;  %v1706_v41 = vshrl.u32 %v2346_v39, 16  ;;  %v1709_v50 = vshll.u32 %v2346_v39, 16  ;;  %v1202_v58 = vld [vmem:[%s3010_s17 + $0x44] sm:$0x1] }
  0x57   : > { %2589 = vmatpush3.bf16.msra.mxu1 %v2891_v52  ;;  %v1274_v52 = vrot.slane %v1272_v28, 5  ;;  %v1302_v6 = vrot.slane %v1300_v59, 5  ;;  %v2913_v28 = vld [vmem:[%s3406_s1 + $0x60] sm:$0xff]   ;;  %v2339_v59 = vld [vmem:[%s3010_s17 + $0x94] sm:$0x1]  ;;  %v1652_v60 = vrot.slane %v1650_v46, 4 }
  0x58   : > { %2685 = vmatpush3.bf16.msra.mxu0 %v2892_v54  ;;  %2590 = vmatprep.subr.bf16.mxu1 %v2893_v61  ;;  %v1247_v54 = vsel %vm3171_vm2, %v1242_v21, %v1246_v22  ;;  %v2911_v22 = vld [vmem:[%s3406_s1 + $0x58] sm:$0xff]  }
  0x59   : > { %2686 = vmatprep.subr.bf16.mxu0 %v2894_v3  ;;  %v2299_v1 = vcombine.low %v1247_v54, %v3238_v55  ;;  %v3267_v13 = vsel %vm3171_vm2, %v1298_v5, %v1302_v6  ;;  %v2326_v25 = vcombine.low %v3194_v49, %v1247_v54  ;;  %v2915_v49 = vld [vmem:[%s3406_s1 + $0x68] sm:$0xff]  }
  0x5b   : > { %2591 = vmatpush3.bf16.msra.mxu1 %v2893_v61  ;;  %v1314_v61 = vshll.u32 %v1200_v33, 16 }
  0x5c   : > { %2687 = vmatpush3.bf16.msra.mxu0 %v2894_v3  ;;  %2592 = vmatprep.subr.bf16.mxu1 %v2896_v10  ;;  %v3253_v3 = vsel %vm3171_vm2, %v1270_v56, %v1274_v52  ;;  %v1723_v52 = vshll.u32 %v2348_v42, 16  ;;  %v1478_v56 = vrot.slane %v1476_v38, 5 }
  0x5d   : > { %2688 = vmatprep.subr.bf16.mxu0 %v2898_v20  ;;  %v1316_v8 = vrot.slane %v1314_v61, 5  ;;  %v1655_v61 = vrot.slane %v1653_v47, 5  ;;  %v2342_v47 = vld [vmem:[%s3010_s17 + $0xa0] sm:$0xf] }
  0x5e   : > { %v1725_v6 = vrot.slane %v1723_v52, 5  ;;  %v2929_v52 = vld [vmem:[%s3406_s1 + $0x160] sm:$0xff]  }
  0x5f   : > { %2593 = vmatpush3.bf16.msra.mxu1 %v2896_v10  ;;  %v2300_v10 = vcombine.low %v3253_v3, %v3257_v4  ;;  %v3271_v14 = vsel %vm3171_vm2, %v1312_v7, %v1316_v8  ;;  %v2923_v7 = vld [vmem:[%s3406_s1 + $0x140] sm:$0xff]  }
  0x60   : > { %2689 = vmatpush3.bf16.msra.mxu0 %v2898_v20  ;;  %2594 = vmatprep.subr.bf16.mxu1 %v2901_v34  ;;  %v2181_v20 = vld [vmem:[%s3010_s17 + $0x48] sm:$0xf]  ;;  %v2301_v21 = vcombine.low %v3267_v13, %v3271_v14 }
  0x61   : > { %2690 = vmatprep.subr.bf16.mxu0 %v2902_v35  ;;  %v2206_v23 = vcombine.low %v2181_v20, %v3027_v15  ;;  %v2914_v15 = vld [vmem:[%s3406_s1 + $0x220] sm:$0xff]   ;;  %v1656_v20 = vor.u32 %v1655_v61, %v1652_v60 }
  0x63   : > { %2595 = vmatpush3.bf16.msra.mxu1 %v2901_v34  ;;  %v2340_v34 = vld [vmem:[%s3010_s17 + $0x98] sm:$0xf] }
  0x64   : > { %2691 = vmatpush3.bf16.msra.mxu0 %v2902_v35  ;;  %2604 = vmatprep.subr.bf16.mxu1 %v2904_v51  ;;  %v1473_v35 = vshrl.u32 %v1201_v26, 16  ;;  %v1664_v48 = vshrl.u32 %v2340_v34, 16  ;;  %v1667_v33 = vshll.u32 %v2340_v34, 16 }
  0x65   : > { %2700 = vmatprep.subr.bf16.mxu0 %v2905_v62 }
  0x66   : > { %2597 = vmatmul.mubr.bf16.vlgmr.msra.gmra.mrb[0].mxu1 %v2906_v63  ;;  %v1475_v54 = vrot.slane %v1473_v35, 4  ;;  %v1669_v63 = vrot.slane %v1667_v33, 5  ;;  %v1734_v33 = vshrl.u32 %v2350_v36, 16 }
  0x67   : > { %2605 = vmatpush3.bf16.msra.mxu1 %v2904_v51  ;;  %2693 = vmatmul.mubr.bf16.vlgmr.msra.gmra.mrb[0].mxu0 %v2299_v1  ;;  %v1720_v51 = vshrl.u32 %v2348_v42, 16  ;;  %v1708_v1 = vrot.slane %v1706_v41, 4  ;;  %v1737_v41 = vshll.u32 %v2350_v36, 16 }
  0x68   : > { %2701 = vmatpush3.bf16.msra.mxu0 %v2905_v62  ;;  %2606 = vmatprep.subr.bf16.mxu1 %v2907_v0  ;;  %v1666_v62 = vrot.slane %v1664_v48, 4  ;;  %v1479_v8 = vor.u32 %v1478_v56, %v1475_v54  ;;  %v2344_v48 = vld [vmem:[%s3010_s17 + $0xa8] sm:$0xf]  ;;  %v1681_v54 = vshll.u32 %v2342_v47, 16 }
  0x69   : > { %2702 = vmatprep.subr.bf16.mxu0 %v2908_v2  ;;  %2600 = vmatprep.mubr.bf16.mxu1 %v2917_v9  ;;  %v1722_v5 = vrot.slane %v1720_v51, 4  ;;  %v1482_v9 = vshll.u32 %v1202_v58, 16  ;;  %v1692_v56 = vshrl.u32 %v2344_v48, 16  ;;  %v1739_v58 = vrot.slane %v1737_v41, 5 }
  0x6a   : > { %2696 = vmatprep.mubr.bf16.mxu0 %v2300_v10  ;;  %v2347_v10 = vld [vmem:[%s3010_s17 + $0xb4] sm:$0x1] }
  0x6b   : > { %2607 = vmatpush3.bf16.msra.mxu1 %v2907_v0  ;;  %v2341_v0 = vld [vmem:[%s3010_s17 + $0x9c] sm:$0x1] }
  0x6c   : > { %2703 = vmatpush3.bf16.msra.mxu0 %v2908_v2  ;;  %2608 = vmatprep.subr.bf16.mxu1 %v2909_v11  ;;  %v1711_v2 = vrot.slane %v1709_v50, 5 }
  0x6d   : > { %2704 = vmatprep.subr.bf16.mxu0 %v2910_v18 }
  0x6e   : > { %2601 = vmatmul.mubr.bf16.gmra.mrb[4].mxu1 %v2918_v12  ;;  %v1659_v12 = vshll.u32 %v2339_v59, 16 }
  0x6f   : > { %2609 = vmatpush3.bf16.msra.mxu1 %v2909_v11  ;;  %2697 = vmatmul.mubr.bf16.gmra.mrb[4].mxu0 %v2301_v21  ;;  %v2349_v11 = vld [vmem:[%s3010_s17 + $0xbc] sm:$0x1]  ;;  %v1670_v21 = vor.u32 %v1669_v63, %v1666_v62  ;;  %v1683_v62 = vrot.slane %v1681_v54, 5  ;;  %v1694_v63 = vrot.slane %v1692_v56, 4 }
  0x70   : > { %2705 = vmatpush3.bf16.msra.mxu0 %v2910_v18  ;;  %2610 = vmatprep.subr.bf16.mxu1 %v2911_v22  ;;  %v2327_v18 = vcombine.low %v3238_v55, %v3253_v3  ;;  %v2328_v55 = vcombine.low %v3257_v4, %v3267_v13  ;;  %v1657_v3 = vrot.slane %v1656_v20, 4  ;;  %v1661_v26 = vrot.slane %v1659_v12, 5 }
  0x71   : > { %2706 = vmatprep.subr.bf16.mxu0 %v2912_v24  ;;  %2620 = vmatprep.mubr.bf16.mxu1 %v2206_v23  ;;  %v1712_v23 = vor.u32 %v1711_v2, %v1708_v1  ;;  %v2353_v1 = vld [vmem:[%s3010_s17 + $0xcc] sm:$0x1]  ;;  %v2343_v2 = vld [vmem:[%s3010_s17 + $0xa4] sm:$0x1] }
  0x72   : > { %2716 = vmatprep.mubr.bf16.mxu0 %v2326_v25  ;;  %v1726_v25 = vor.u32 %v1725_v6, %v1722_v5  ;;  %v1662_v17 = vsel %vm3171_vm2, %v1657_v3, %v1661_v26  ;;  %v2345_v5 = vld [vmem:[%s3010_s17 + $0xac] sm:$0x1] }
  0x73   : > { %2611 = vmatpush3.bf16.msra.mxu1 %v2911_v22  ;;  %v1673_v22 = vshll.u32 %v2341_v0, 16  ;;  %v1713_v34 = vrot.slane %v1712_v23, 4  ;;  %v1701_v12 = vshll.u32 %v2345_v5, 16 }
  0x74   : > { %2707 = vmatpush3.bf16.msra.mxu0 %v2912_v24  ;;  %2612 = vmatprep.subr.bf16.mxu1 %v2913_v28  ;;  %v1715_v24 = vshll.u32 %v2347_v10, 16  ;;  %v1727_v38 = vrot.slane %v1726_v25, 4  ;;  %v2931_v10 = vld [vmem:[%s3406_s1 + $0x170] sm:$0xff]   ;;  %v2932_v25 = vld [vmem:[%s3406_s1 + $0x178] sm:$0xff]  }
  0x75   : > { %2708 = vmatprep.subr.bf16.mxu0 %v2914_v15  ;;  %v1675_v32 = vrot.slane %v1673_v22, 5 }
  0x76   : > { %v1717_v35 = vrot.slane %v1715_v24, 5 }
  0x77   : > { %2613 = vmatpush3.bf16.msra.mxu1 %v2913_v28  ;;  %v1729_v28 = vshll.u32 %v2349_v11, 16 }
  0x78   : > { %2709 = vmatpush3.bf16.msra.mxu0 %v2914_v15  ;;  %2614 = vmatprep.subr.bf16.mxu1 %v2915_v49  ;;  %v2924_v15 = vld [vmem:[%s3406_s1 + $0x148] sm:$0xff]   ;;  %v1718_v42 = vsel %vm3171_vm2, %v1713_v34, %v1717_v35 }
  0x79   : > { %2710 = vmatprep.subr.bf16.mxu0 %v2916_v29  ;;  %v1731_v39 = vrot.slane %v1729_v28, 5 }
  0x7b   : > { %2615 = vmatpush3.bf16.msra.mxu1 %v2915_v49  ;;  %v1480_v49 = vrot.slane %v1479_v8, 4 }
  0x7c   : > { %2711 = vmatpush3.bf16.msra.mxu0 %v2916_v29  ;;  %2616 = vmatprep.subr.bf16.mxu1 %v2919_v31  ;;  %v1484_v29 = vrot.slane %v1482_v9, 5  ;;  %v1757_v9 = vshll.u32 %v2353_v1, 16 }
  0x7d   : > { %2712 = vmatprep.subr.bf16.mxu0 %v2920_v44 }
  0x7e   : > { %v1485_v4 = vsel %vm3171_vm2, %v1480_v49, %v1484_v29  ;;  %v1759_v24 = vrot.slane %v1757_v9, 5  ;;  %v1703_v29 = vrot.slane %v1701_v12, 5 }
  0x7f   : > { %2617 = vmatpush3.bf16.msra.mxu1 %v2919_v31  ;;  %v1671_v31 = vrot.slane %v1670_v21, 4  ;;  %v2329_v13 = vcombine.low %v3271_v14, %v1485_v4 }
  0x80   : > { %2713 = vmatpush3.bf16.msra.mxu0 %v2920_v44  ;;  %2618 = vmatprep.subr.bf16.mxu1 %v2921_v53  ;;  %v1732_v44 = vsel %vm3171_vm2, %v1727_v38, %v1731_v39 }
  0x81   : > { %2714 = vmatprep.subr.bf16.mxu0 %v2922_v57  ;;  %v2372_v14 = vcombine.low %v1718_v42, %v1732_v44 }
  0x83   : > { %2619 = vmatpush3.bf16.msra.mxu1 %v2921_v53  ;;  %v1678_v53 = vshrl.u32 %v2342_v47, 16 }
  0x84   : > { %2715 = vmatpush3.bf16.msra.mxu0 %v2922_v57  ;;  %2748 = vmatprep.subr.bf16.mxu1 %v2923_v7  ;;  %v1695_v57 = vshll.u32 %v2344_v48, 16 }
  0x85   : > { %2724 = vmatprep.subr.bf16.mxu0 %v2923_v7  ;;  %v1680_v61 = vrot.slane %v1678_v53, 4 }
  0x86   : > { %2621 = vmatmul.mubr.bf16.vlgmr.msra.gmra.mrb[0].mxu1 %v2207_v19  ;;  %v1676_v19 = vsel %vm3171_vm2, %v1671_v31, %v1675_v32  ;;  %v1697_v0 = vrot.slane %v1695_v57, 5 }
  0x87   : > { %2717 = vmatmul.mubr.bf16.vlgmr.msra.gmra.mrb[0].mxu0 %v2327_v18  ;;  %2756 = vmatpush3.bf16.msra.mxu1 %v2923_v7  ;;  %v2370_v46 = vcombine.low %v1662_v17, %v1676_v19  ;;  %v1684_v11 = vor.u32 %v1683_v62, %v1680_v61  ;;  %v1687_v18 = vshll.u32 %v2343_v2, 16 }
  0x88   : > { %2725 = vmatpush3.bf16.msra.mxu0 %v2923_v7  ;;  %2749 = vmatprep.subr.bf16.mxu1 %v2924_v15  ;;  %v1743_v7 = vshll.u32 %v2351_v43, 16  ;;  %v1698_v20 = vor.u32 %v1697_v0, %v1694_v63 }
  0x89   : > { %2726 = vmatprep.subr.bf16.mxu0 %v2924_v15  ;;  %2624 = vmatprep.mubr.bf16.mxu1 %v2208_v40  ;;  %v2352_v40 = vld [vmem:[%s3010_s17 + $0xc8] sm:$0xf]  ;;  %v1685_v28 = vrot.slane %v1684_v11, 4 }
  0x8a   : > { %2720 = vmatprep.mubr.bf16.mxu0 %v2328_v55  ;;  %v1748_v50 = vshrl.u32 %v2352_v40, 16  ;;  %v1751_v51 = vshll.u32 %v2352_v40, 16  ;;  %v1745_v22 = vrot.slane %v1743_v7, 5  ;;  %v1699_v49 = vrot.slane %v1698_v20, 4 }
  0x8b   : > { %2757 = vmatpush3.bf16.msra.mxu1 %v2924_v15 }
  0x8c   : > { %2727 = vmatpush3.bf16.msra.mxu0 %v2924_v15  ;;  %2750 = vmatprep.subr.bf16.mxu1 %v2927_v16  ;;  %v1750_v59 = vrot.slane %v1748_v50, 4  ;;  %v1753_v60 = vrot.slane %v1751_v51, 5  ;;  %v1689_v15 = vrot.slane %v1687_v18, 5  ;;  %v1704_v31 = vsel %vm3171_vm2, %v1699_v49, %v1703_v29 }
  0x8d   : > { %2728 = vmatprep.subr.bf16.mxu0 %v2927_v16 }
  0x8e   : > { %2625 = vmatmul.mubr.bf16.gmra.mrb[4].mxu1 %v2209_v45  ;;  %v1736_v45 = vrot.slane %v1734_v33, 4  ;;  %v1754_v8 = vor.u32 %v1753_v60, %v1750_v59  ;;  %v1690_v26 = vsel %vm3171_vm2, %v1685_v28, %v1689_v15 }
  0x8f   : > { %2721 = vmatmul.mubr.bf16.gmra.mrb[4].mxu0 %v2329_v13  ;;  %2758 = vmatpush3.bf16.msra.mxu1 %v2927_v16  ;;  %v2371_v34 = vcombine.low %v1690_v26, %v1704_v31 }
  0x90   : > { %2729 = vmatpush3.bf16.msra.mxu0 %v2927_v16  ;;  %2751 = vmatprep.subr.bf16.mxu1 %v2928_v27  ;;  %v1740_v6 = vor.u32 %v1739_v58, %v1736_v45  ;;  %v1755_v23 = vrot.slane %v1754_v8, 4 }
  0x91   : > { %2730 = vmatprep.subr.bf16.mxu0 %v2928_v27  ;;  %2740 = vmatprep.mubr.bf16.mxu0 %v2370_v46 }
  0x92   : > { %2744 = vmatprep.mubr.bf16.mxu1 %v2372_v14  ;;  %v1741_v21 = vrot.slane %v1740_v6, 4  ;;  %v1760_v3 = vsel %vm3171_vm2, %v1755_v23, %v1759_v24 }
  0x93   : > { %2759 = vmatpush3.bf16.msra.mxu1 %v2928_v27 }
  0x94   : > { %2731 = vmatpush3.bf16.msra.mxu0 %v2928_v27  ;;  %2752 = vmatprep.subr.bf16.mxu1 %v2929_v52  ;;  %v1746_v55 = vsel %vm3171_vm2, %v1741_v21, %v1745_v22 }
  0x95   : > { %2732 = vmatprep.subr.bf16.mxu0 %v2929_v52  ;;  %v2373_v32 = vcombine.low %v1746_v55, %v1760_v3 }
  0x97   : > { %2760 = vmatpush3.bf16.msra.mxu1 %v2929_v52 }
  0x98   : > { %2733 = vmatpush3.bf16.msra.mxu0 %v2929_v52  ;;  %2753 = vmatprep.subr.bf16.mxu1 %v2930_v37 }
  0x99   : > { %2734 = vmatprep.subr.bf16.mxu0 %v2930_v37 }
  0x9b   : > { %2761 = vmatpush3.bf16.msra.mxu1 %v2930_v37 }
  0x9c   : > { %2735 = vmatpush3.bf16.msra.mxu0 %v2930_v37  ;;  %2754 = vmatprep.subr.bf16.mxu1 %v2931_v10 }
  0x9d   : > { %2736 = vmatprep.subr.bf16.mxu0 %v2931_v10 }
  0x9f   : > { %2762 = vmatpush3.bf16.msra.mxu1 %v2931_v10 }
  0xa0   : > { %2737 = vmatpush3.bf16.msra.mxu0 %v2931_v10  ;;  %2755 = vmatprep.subr.bf16.mxu1 %v2932_v25 }
  0xa1   : > { %2738 = vmatprep.subr.bf16.mxu0 %v2932_v25 }
  0xa3   : > { %2763 = vmatpush3.bf16.msra.mxu1 %v2932_v25 }
  0xa4   : > { %2739 = vmatpush3.bf16.msra.mxu0 %v2932_v25 }
  0xa6   : > { %2745 = vmatmul.mubr.bf16.vlgmr.msra.gmra.mrb[8].mxu1 %v2373_v32 }
  0xa7   : > { %2741 = vmatmul.mubr.bf16.vlgmr.msra.gmra.mrb[0].mxu0 %v2371_v34 }
 0x159   : > { %v2622_v35 = vpop.f32.mrb[0].mxu1 }
 0x15a   : > { %v827_v38 = vpop.f32.mrb[1].mxu1 }
 0x15b   : > { %v2623_v39 = vpop.f32.mrb[2].mxu1 }
 0x15c   : > { %v830_v4 = vpop.f32.mrb[3].mxu1 }
 0x161   : > { %v2626_v16 = vpop.f32.mrb[4].mxu1 }
 0x162   : > { %v2722_v17 = vpop.f32.mrb[4].mxu0  ;;  %v843_v19 = vpop.f32.mrb[5].mxu1 }
 0x163   : > { %v2768_v13 = vadd.f32 %v2722_v17, %v2626_v16  ;;  %v1610_v42 = vpop.f32.mrb[5].mxu0  ;;  %v2627_v30 = vpop.f32.mrb[6].mxu1 }
 0x164   : > { %v2770_v44 = vadd.f32 %v1610_v42, %v843_v19  ;;  %v2723_v27 = vpop.f32.mrb[6].mxu0  ;;  %v846_v36 = vpop.f32.mrb[7].mxu1 }
 0x165   : > { %v2772_v40 = vadd.f32 %v2723_v27, %v2627_v30  ;;  %v1613_v46 = vpop.f32.mrb[7].mxu0 }
 0x166   : > { %v2774_v47 = vadd.f32 %v1613_v46, %v846_v36 }
 0x179   : > { %v2746_v48 = vpop.f32.mrb[8].mxu1 }
 0x17a   : > { %v2742_v14 = vpop.f32.mrb[0].mxu0  ;;  %v2769_v33 = vadd.f32 %v2768_v13, %v2746_v48  ;;  %v1892_v41 = vpop.f32.mrb[9].mxu1 }
 0x17b   : > { %v2764_v50 = vadd.f32 %v2742_v14, %v2622_v35  ;;  %v1876_v51 = vpop.f32.mrb[1].mxu0  ;;  %v2771_v52 = vadd.f32 %v2770_v44, %v1892_v41  ;;  %v2747_v53 = vpop.f32.mrb[10].mxu1 }
 0x17c   : > { %v2765_v54 = vadd.f32 %v1876_v51, %v827_v38  ;;  %v2743_v56 = vpop.f32.mrb[2].mxu0  ;;  %v2773_v57 = vadd.f32 %v2772_v40, %v2747_v53  ;;  %v1895_v37 = vpop.f32.mrb[11].mxu1  ;;  %v1975_v23 = vmul.f32 %v2769_v33, %v2769_v33 }
 0x17d   : > { %v2766_v43 = vadd.f32 %v2743_v56, %v2623_v39  ;;  %v1879_v45 = vpop.f32.mrb[3].mxu0  ;;  %v2775_v58 = vadd.f32 %v2774_v47, %v1895_v37  ;;  %v1971_v5 = vmul.f32 %v2764_v50, %v2764_v50  ;;  %v1973_v11 = vmul.f32 %v2771_v52, %v2771_v52 }
 0x17e   : > { %v2419_v59 = vpack.c.bf16 %v2773_v57, %v2769_v33  ;;  %v2767_v60 = vadd.f32 %v1879_v45, %v830_v4  ;;  %v1969_v63 = vmul.f32 %v2765_v54, %v2765_v54  ;;  %v1976_v28 = vmul.f32 %v2773_v57, %v2773_v57 }
 0x17f   : > { %v2409_v61 = vpack.c.bf16 %v2766_v43, %v2764_v50  ;;  %v2414_v62 = vpack.c.bf16 %v2775_v58, %v2771_v52  ;;  %v1972_v8 = vmul.f32 %v2766_v43, %v2766_v43  ;;  %v1974_v21 = vmul.f32 %v2775_v58, %v2775_v58 }
 0x180   : > { %2423 = vst [vmem:[%s213_s29 + $0x18] sm:$0xff] %v2419_v59   ;;  %v2404_v0 = vpack.c.bf16 %v2767_v60, %v2765_v54  ;;  %v1955_v1 = vadd.f32 %v2767_v60, %v2765_v54  ;;  %v1970_v2 = vmul.f32 %v2767_v60, %v2767_v60 }
 0x181   : > { %2421 = vst [vmem:[%s213_s29 + $0x8] sm:$0xff] %v2409_v61   ;;  %2422 = vst [vmem:[%s213_s29 + $0x10] sm:$0xff] %v2414_v62  }
 0x182   : > { %2405 = vst [vmem:[%s213_s29] sm:$0xff] %v2404_v0   ;;  %v1956_v6 = vadd.f32 %v2764_v50, %v1955_v1  ;;  %v1977_v7 = vadd.f32 %v1970_v2, %v1969_v63 }
 0x184   : > { %v1978_v9 = vadd.f32 %v1977_v7, %v1971_v5  ;;  %v1957_v10 = vadd.f32 %v2766_v43, %v1956_v6 }
 0x186   : > { %v1958_v18 = vadd.f32 %v2771_v52, %v1957_v10  ;;  %v1979_v20 = vadd.f32 %v1978_v9, %v1972_v8 }
 0x188   : > { %v1959_v12 = vadd.f32 %v2775_v58, %v1958_v18  ;;  %v1980_v22 = vadd.f32 %v1979_v20, %v1973_v11 }
 0x18a   : > { %v1960_v24 = vadd.f32 %v2769_v33, %v1959_v12  ;;  %v1981_v25 = vadd.f32 %v1980_v22, %v1974_v21 }
 0x18c   : > { %v1961_v15 = vadd.f32 %v2773_v57, %v1960_v24  ;;  %v1982_v49 = vadd.f32 %v1981_v25, %v1975_v23 }
 0x18e   : > { %v1962_v29 = vrot.slane %v1961_v15, 4  ;;  %v1983_v55 = vadd.f32 %v1982_v49, %v1976_v28 }
 0x190   : > { %v1963_v3 = vadd.f32 %v1962_v29, %v1961_v15  ;;  %v1984_v26 = vrot.slane %v1983_v55, 4 }
 0x192   : > { %v1964_v31 = vrot.slane %v1963_v3, 2  ;;  %v1985_v32 = vadd.f32 %v1984_v26, %v1983_v55 }
 0x194   : > { %v1965_v34 = vadd.f32 %v1964_v31, %v1963_v3  ;;  %v1986_v35 = vrot.slane %v1985_v32, 2 }
 0x196   : > { %v1966_v38 = vrot.slane %v1965_v34, 1  ;;  %v1987_v39 = vadd.f32 %v1986_v35, %v1985_v32 }
 0x198   : > { %v1967_v4 = vadd.f32 %v1966_v38, %v1965_v34  ;;  %v1988_v16 = vrot.slane %v1987_v39, 1 }
 0x19a   : > { %1968 = vst [vmem:[%s216_s6] sm:$0x1] %v1967_v4  ;;  %v1989_v17 = vadd.f32 %v1988_v16, %v1987_v39 }
 0x19c   : > { %1990 = vst [vmem:[%s219_s9] sm:$0x1] %v1989_v17 }
 0x19d PF: > { %s15_s15 = sadd.s32 1, %s2939_s15  }
 0x19e   : > { %p12_p5 = scmp.ge.s32.totalorder %s15_s15, 4  }
 0x1a0   :  { %14 = sbr.rel (!%p12_p5) target bundleno = 1 (0x1), region = 93 }

</bundles_post_ra>
